<compile_context>
chip_gen: v6e
topology: v6e:2x2x1
jax: 0.10.0
libtpu: 0.0.40
codegen_flags: <defaults>
</compile_context>

<pallas_src>
import functools
import math
from collections import namedtuple
from typing import List, Optional

import numpy as np
import jax
import jax.numpy as jnp
from jax.experimental import pallas as pl
from jax.experimental.pallas import tpu as pltpu


def _round_up(x: int, m: int) -> int:
    return ((x + m - 1) // m) * m


# -------------------- deterministic parameter construction -----------------

def _hann_window_periodic(n: int) -> np.ndarray:
    k = np.arange(n, dtype=np.float64)
    return 0.5 - 0.5 * np.cos(2.0 * np.pi * k / n)


def _hz_to_mel(f):
    f = np.asarray(f, dtype=np.float64)
    f_sp = 200.0 / 3
    mels = f / f_sp
    min_log_hz = 1000.0
    min_log_mel = min_log_hz / f_sp
    logstep = np.log(6.4) / 27.0
    return np.where(
        f >= min_log_hz,
        min_log_mel + np.log(np.maximum(f, 1e-10) / min_log_hz) / logstep,
        mels,
    )


def _mel_to_hz(m):
    m = np.asarray(m, dtype=np.float64)
    f_sp = 200.0 / 3
    freqs = f_sp * m
    min_log_hz = 1000.0
    min_log_mel = min_log_hz / f_sp
    logstep = np.log(6.4) / 27.0
    return np.where(
        m >= min_log_mel,
        min_log_hz * np.exp(logstep * (m - min_log_mel)),
        freqs,
    )


def _mel_filterbank(sr: int, n_fft: int, n_mels: int,
                    fmin: float, fmax: Optional[float]) -> np.ndarray:
    """librosa-style (Slaney norm) mel filterbank, shape (n_mels, n_freq)."""
    if fmax is None:
        fmax = sr / 2.0
    n_freq = n_fft // 2 + 1
    fftfreqs = np.linspace(0.0, sr / 2.0, n_freq)
    mel_pts = _mel_to_hz(np.linspace(_hz_to_mel(fmin), _hz_to_mel(fmax),
                                     n_mels + 2))
    fdiff = np.diff(mel_pts)
    ramps = mel_pts[:, None] - fftfreqs[None, :]
    weights = np.zeros((n_mels, n_freq), dtype=np.float64)
    for i in range(n_mels):
        lower = -ramps[i] / fdiff[i]
        upper = ramps[i + 2] / fdiff[i + 1]
        weights[i] = np.maximum(0.0, np.minimum(lower, upper))
    enorm = 2.0 / (mel_pts[2:n_mels + 2] - mel_pts[:n_mels])
    weights *= enorm[:, None]
    return weights


def _stft_matrices(n_fft: int):
    """Windowed one-sided DFT matrices, each (n_fft, n_freq), float32."""
    n_freq = n_fft // 2 + 1
    window = _hann_window_periodic(n_fft)
    n = np.arange(n_fft, dtype=np.float64)[:, None]
    k = np.arange(n_freq, dtype=np.float64)[None, :]
    ang = 2.0 * np.pi * n * k / n_fft
    w_re = window[:, None] * np.cos(ang)
    w_im = -window[:, None] * np.sin(ang)
    return w_re.astype(np.float32), w_im.astype(np.float32)


# ------------------------------- Pallas kernel ------------------------------

def _mel_l1_kernel(xf_ref, yf_ref, w_ref, mel_ref, out_ref, *,
                   clamp_eps: float, pow_: float, n_freq_pad: int):
    """One row-tile: fused windowed-DFT -> |.| -> mel -> log10 -> |diff| sum."""
    tr = xf_ref.shape[0]

    # Concatenate x / y frame tiles -> a single MXU pass with M = 2*tile_rows.
    frames = jnp.concatenate([xf_ref[...], yf_ref[...]], axis=0)   # (2tr, n_fft) bf16

    # Windowed one-sided DFT: one bf16 matmul against [W_re | W_im] (f32 acc).
    ri = jnp.dot(frames, w_ref[...], preferred_element_type=jnp.float32)
    re = ri[:, :n_freq_pad]                                        # lane-aligned slices
    im = ri[:, n_freq_pad:]
    mag = jnp.sqrt(re * re + im * im)                              # (2tr, nfp) f32

    # Mel projection (bf16 MXU, f32 accumulation).
    mel = jnp.dot(mag.astype(jnp.bfloat16), mel_ref[...],
                  preferred_element_type=jnp.float32)              # (2tr, nmp) f32

    # log10(clamp(mel, eps) ** pow) == pow * ln(clamp(mel, eps)) / ln(10)
    logm = (pow_ / math.log(10.0)) * jnp.log(jnp.maximum(mel, clamp_eps))

    diff = jnp.abs(logm[:tr, :] - logm[tr:, :])                    # (tr, nmp)
    partial = jnp.sum(diff, axis=0, keepdims=True)                 # (1, nmp)

    # Lane-dense (8, nmp) output block per tile; rows 1..7 are exactly zero so
    # the host-side jnp.sum over all blocks gives the exact total.
    nmp = out_ref.shape[1]
    row = jax.lax.broadcasted_iota(jnp.int32, (8, nmp), 0)
    out_ref[...] = jnp.where(row == 0,
                             jnp.broadcast_to(partial, (8, nmp)),
                             jnp.float32(0.0))


def _mel_l1_sum(xf, yf, w_cat, mel_b, clamp_eps, pow_, n_freq_pad, tile_rows):
    """Sum over all (frame, mel-bin) elements of |logmel(x) - logmel(y)|."""
    R, n_fft = xf.shape
    nmp = mel_b.shape[1]

    rp = _round_up(R, tile_rows)
    pad = rp - R
    if pad:
        # zero frames -> mel == 0 -> clamp to eps on both sides -> 0 contribution
        xf = jnp.pad(xf, ((0, pad), (0, 0)))
        yf = jnp.pad(yf, ((0, pad), (0, 0)))
    num_tiles = rp // tile_rows

    kernel = functools.partial(_mel_l1_kernel, clamp_eps=clamp_eps,
                               pow_=pow_, n_freq_pad=n_freq_pad)

    out = pl.pallas_call(
        kernel,
        out_shape=jax.ShapeDtypeStruct((8 * num_tiles, nmp), jnp.float32),
        grid_spec=pltpu.PrefetchScalarGridSpec(
            num_scalar_prefetch=0,
            grid=(num_tiles,),
            in_specs=[
                pl.BlockSpec((tile_rows, n_fft), lambda i: (i, 0)),
                pl.BlockSpec((tile_rows, n_fft), lambda i: (i, 0)),
                # constant weight blocks (re-used, never re-fetched)
                pl.BlockSpec((n_fft, 2 * n_freq_pad), lambda i: (0, 0)),
                pl.BlockSpec((n_freq_pad, nmp), lambda i: (0, 0)),
            ],
            out_specs=pl.BlockSpec((8, nmp), lambda i: (i, 0)),
        ),
        compiler_params=pltpu.CompilerParams(
            # Independent per-tile partial sums -> row axis can be sharded
            # across TensorCores (v7x megacore).
            dimension_semantics=("parallel",),
            vmem_limit_bytes=64 * 1024 * 1024,
        ),
    )(xf, yf, w_cat, mel_b)
    return jnp.sum(out)


# --------------------------- host-side glue ---------------------------------

def _frame_signal(wav, n_fft, hop):
    """torch.stft(center=True) framing. wav: (B, C, T) -> (B*C*n_frames, n_fft)."""
    B, C, T = wav.shape
    pad = n_fft // 2
    w = jnp.pad(wav, ((0, 0), (0, 0), (pad, pad)), mode="reflect")
    n_frames = T // hop + 1
    idx = (jnp.arange(n_frames)[:, None] * hop
           + jnp.arange(n_fft)[None, :])                 # (n_frames, n_fft)
    frames = w[:, :, idx]                                # (B, C, n_frames, n_fft)
    return frames.reshape(B * C * n_frames, n_fft)


STFTParams = namedtuple("STFTParams",
                        ["window_length", "hop_length", "window_type",
                         "match_stride"])


class MultiScaleMelSpectrogramLoss:
    """JAX / Pallas port of the PyTorch MultiScaleMelSpectrogramLoss forward."""

    def __init__(self,
                 sampling_rate: int,
                 n_mels: List[int] = (5, 10, 20, 40, 80, 160, 320),
                 window_lengths: List[int] = (32, 64, 128, 256, 512, 1024, 2048),
                 clamp_eps: float = 1e-05,
                 mag_weight: float = 0.0,
                 log_weight: float = 1.0,
                 pow: float = 1.0,
                 weight: float = 1.0,
                 match_stride: bool = False,
                 mel_fmin: List[float] = (0, 0, 0, 0, 0, 0, 0),
                 mel_fmax: List[Optional[float]] = (None,) * 7,
                 window_type: str = "hann"):
        assert window_type == "hann", "only hann windows are generated in-script"
        # TODO(synk): match_stride=True path (extra padding + frame trimming) not ported.
        assert not match_stride
        self.sampling_rate = sampling_rate
        self.stft_params = [
            STFTParams(window_length=w, hop_length=w // 4,
                       match_stride=match_stride, window_type=window_type)
            for w in window_lengths
        ]
        self.n_mels = list(n_mels)
        self.clamp_eps = clamp_eps
        self.log_weight = log_weight
        self.mag_weight = mag_weight
        self.weight = weight
        self.mel_fmin = list(mel_fmin)
        self.mel_fmax = list(mel_fmax)
        self.pow = pow

        # Precompute deterministic per-scale matrices.
        #  _mats:     bf16, lane-aligned (128-padded) fused matrices for the kernel
        #  _ref_mats: f32, unpadded matrices for the pure-JAX reference
        self._mats = []
        self._ref_mats = []
        for nm, fmin, fmax, s in zip(self.n_mels, self.mel_fmin,
                                     self.mel_fmax, self.stft_params):
            n_fft = s.window_length
            n_freq = n_fft // 2 + 1
            nfp = max(128, _round_up(n_freq, 128))   # lane-aligned freq dim
            nmp = max(128, _round_up(nm, 128))       # lane-aligned mel dim

            w_re, w_im = _stft_matrices(n_fft)       # (n_fft, n_freq) f32
            melb = _mel_filterbank(self.sampling_rate, n_fft,
                                   nm, fmin, fmax).T.astype(np.float32)  # (n_freq, nm)

            # Zero-pad to 128-aligned shapes (padded bins contribute exactly 0)
            # and fuse [W_re | W_im] so the DFT is a single matmul.
            w_re_p = np.zeros((n_fft, nfp), np.float32); w_re_p[:, :n_freq] = w_re
            w_im_p = np.zeros((n_fft, nfp), np.float32); w_im_p[:, :n_freq] = w_im
            w_cat = np.concatenate([w_re_p, w_im_p], axis=1)             # (n_fft, 2*nfp)
            mel_p = np.zeros((nfp, nmp), np.float32); mel_p[:n_freq, :nm] = melb

            self._mats.append((jnp.asarray(w_cat, dtype=jnp.bfloat16),
                               jnp.asarray(mel_p, dtype=jnp.bfloat16),
                               nfp))
            self._ref_mats.append((jnp.asarray(w_re), jnp.asarray(w_im),
                                   jnp.asarray(melb)))

        # One traced graph for all scales: removes per-scale dispatch overhead
        # and lets XLA fuse the pad/gather glue.
        self._jit_forward = jax.jit(self._forward)

    # ----------------------------------------------------------------- forward

    def _forward(self, x, y):
        # bf16 inputs: native MXU rate, half the HBM traffic of the framed data.
        x = x.astype(jnp.bfloat16)
        y = y.astype(jnp.bfloat16)
        loss = jnp.float32(0.0)
        for nm, s, (w_cat, mel_p, nfp) in zip(self.n_mels, self.stft_params,
                                              self._mats):
            win, hop = s.window_length, s.hop_length
            # TODO(synk): frames are still materialized by an XLA gather (bf16);
            # building them in-kernel from the padded waveform via strided DMA
            # would cut the frame HBM traffic another ~4x for the small scales.
            xf = _frame_signal(x, win, hop)
            yf = _frame_signal(y, win, hop)
            R = xf.shape[0]
            # Big row tiles for the tiny FFTs (per-step overhead), smaller for
            # the 1024/2048-point scales (VMEM: weights + f32 intermediates).
            tile_rows = min(512 if win <= 512 else 256, _round_up(R, 16))
            sad = _mel_l1_sum(xf, yf, w_cat, mel_p,
                              self.clamp_eps, self.pow, nfp, tile_rows)
            mean_l1 = sad / jnp.float32(R * nm)      # L1Loss 'mean' over B*C*frames*mels
            # The provided reference applies BOTH log_weight and mag_weight to
            # the L1 of the *log*-mels, so they fold into a single factor here.
            loss = loss + (self.log_weight + self.mag_weight) * mean_l1
        return loss

    def __call__(self, x, y):
        """x, y: (B, C, T) float waveforms -> scalar loss (float32)."""
        return self._jit_forward(x, y)

    # ------------------------------------------------------- pure-JAX reference

    def reference_loss(self, x, y):
        """Float32, Pallas-free reference of the same forward (for validation)."""
        x = x.astype(jnp.float32)
        y = y.astype(jnp.float32)
        loss = jnp.float32(0.0)
        for nm, s, (w_re, w_im, melb) in zip(self.n_mels, self.stft_params,
                                             self._ref_mats):
            win, hop = s.window_length, s.hop_length

            def logmel(wav):
                f = _frame_signal(wav, win, hop)
                re = f @ w_re
                im = f @ w_im
                mag = jnp.sqrt(re * re + im * im)
                mel = mag @ melb
                return (self.pow * jnp.log(jnp.maximum(mel, self.clamp_eps))
                        / math.log(10.0))

            l1 = jnp.mean(jnp.abs(logmel(x) - logmel(y)))
            loss = loss + (self.log_weight + self.mag_weight) * l1
        return loss


# ---------------------------------- demo ------------------------------------

if __name__ == "__main__":
    key = jax.random.PRNGKey(0)
    kx, ky = jax.random.split(key)

    B, C, T = 2, 1, 1024
    x = 0.1 * jax.random.normal(kx, (B, C, T), dtype=jnp.float32)
    y = 0.1 * jax.random.normal(ky, (B, C, T), dtype=jnp.float32)

    loss_mod = MultiScaleMelSpectrogramLoss(
        sampling_rate=16000,
        n_mels=[5, 10, 20, 40],
        window_lengths=[32, 64, 128, 256],
        mel_fmin=[0, 0, 0, 0],
        mel_fmax=[None, None, None, None],
    )

    loss = loss_mod(x, y)
    loss = jax.block_until_ready(loss)
    assert jnp.isfinite(loss)

    # Validate the bf16 Pallas path against the f32 pure-JAX reference.
    ref = jax.block_until_ready(loss_mod.reference_loss(x, y))
    rel = abs(float(loss) - float(ref)) / max(abs(float(ref)), 1e-6)
    assert rel < 0.05, f"mismatch: pallas={float(loss)} ref={float(ref)} rel={rel}"

    print("KERNEL_OK")
</pallas_src>

<mosaic_0001>
module attributes {stable_mosaic.version = 11 : i64} {
  func.func @_mel_l1_kernel(%arg0: i32, %arg1: memref<272x32xbf16, #tpu.memory_space<vmem>>, %arg2: memref<272x32xbf16, #tpu.memory_space<vmem>>, %arg3: memref<32x256xbf16, #tpu.memory_space<vmem>>, %arg4: memref<128x128xbf16, #tpu.memory_space<vmem>>, %arg5: memref<8x128xf32, #tpu.memory_space<vmem>>) attributes {dimension_semantics = [#tpu.dimension_semantics<parallel>], iteration_bounds = array<i64: 1>, scalar_prefetch = 0 : i64, scratch_operands = 0 : i64, tpu.core_type = #tpu.core_type<tc>, window_params = [{transform_indices = @transform_0, window_bounds = array<i64: 272, 32>}, {transform_indices = @transform_1, window_bounds = array<i64: 272, 32>}, {pipeline_mode = #tpu.pipeline_mode<synchronous>, transform_indices = @transform_2, window_bounds = array<i64: 32, 256>}, {pipeline_mode = #tpu.pipeline_mode<synchronous>, transform_indices = @transform_3, window_bounds = array<i64: 128, 128>}, {transform_indices = @transform_4, window_bounds = array<i64: 8, 128>}]} {
    %c0 = arith.constant 0 : index
    %c0_0 = arith.constant 0 : index
    %0 = vector.load %arg1[%c0, %c0_0] : memref<272x32xbf16, #tpu.memory_space<vmem>>, vector<272x32xbf16>
    %c0_1 = arith.constant 0 : index
    %c0_2 = arith.constant 0 : index
    %1 = vector.load %arg2[%c0_1, %c0_2] : memref<272x32xbf16, #tpu.memory_space<vmem>>, vector<272x32xbf16>
    %2 = tpu.concatenate %0, %1 in 0 : vector<272x32xbf16>, vector<272x32xbf16> -> vector<544x32xbf16>
    %c0_3 = arith.constant 0 : index
    %c0_4 = arith.constant 0 : index
    %3 = vector.load %arg3[%c0_3, %c0_4] : memref<32x256xbf16, #tpu.memory_space<vmem>>, vector<32x256xbf16>
    %cst = arith.constant dense<0.000000e+00> : vector<544x256xf32>
    %4 = tpu.matmul %2, %3, %cst {dimension_numbers = #tpu.dot_dimension_numbers<[1], [0], [0], [1], [0, 0, 1, 1], [], []>} : vector<544x32xbf16>, vector<32x256xbf16>, vector<544x256xf32> -> vector<544x256xf32>
    %5 = vector.extract_strided_slice %4 {offsets = [0, 0], sizes = [544, 128], strides = [1, 1]} : vector<544x256xf32> to vector<544x128xf32>
    %6 = vector.extract_strided_slice %4 {offsets = [0, 128], sizes = [544, 128], strides = [1, 1]} : vector<544x256xf32> to vector<544x128xf32>
    %7 = arith.mulf %5, %5 : vector<544x128xf32>
    %8 = arith.mulf %6, %6 : vector<544x128xf32>
    %9 = arith.addf %7, %8 : vector<544x128xf32>
    %10 = math.sqrt %9 : vector<544x128xf32>
    %11 = arith.truncf %10 : vector<544x128xf32> to vector<544x128xbf16>
    %c0_5 = arith.constant 0 : index
    %c0_6 = arith.constant 0 : index
    %12 = vector.load %arg4[%c0_5, %c0_6] : memref<128x128xbf16, #tpu.memory_space<vmem>>, vector<128x128xbf16>
    %cst_7 = arith.constant dense<0.000000e+00> : vector<544x128xf32>
    %13 = tpu.matmul %11, %12, %cst_7 {dimension_numbers = #tpu.dot_dimension_numbers<[1], [0], [0], [1], [0, 0, 1, 1], [], []>} : vector<544x128xbf16>, vector<128x128xbf16>, vector<544x128xf32> -> vector<544x128xf32>
    %cst_8 = arith.constant 9.99999974E-6 : f32
    %14 = vector.broadcast %cst_8 : f32 to vector<544x128xf32>
    %15 = arith.maximumf %13, %14 : vector<544x128xf32>
    %16 = math.log %15 : vector<544x128xf32>
    %cst_9 = arith.constant 0.434294492 : f32
    %17 = vector.broadcast %cst_9 : f32 to vector<544x128xf32>
    %18 = arith.mulf %17, %16 : vector<544x128xf32>
    %19 = vector.extract_strided_slice %18 {offsets = [0, 0], sizes = [272, 128], strides = [1, 1]} : vector<544x128xf32> to vector<272x128xf32>
    %20 = vector.extract_strided_slice %18 {offsets = [272, 0], sizes = [272, 128], strides = [1, 1]} : vector<544x128xf32> to vector<272x128xf32>
    %21 = arith.subf %19, %20 : vector<272x128xf32>
    %22 = math.absf %21 : vector<272x128xf32>
    %cst_10 = arith.constant dense<0.000000e+00> : vector<128xf32>
    %23 = vector.multi_reduction <add>, %22, %cst_10 [0] : vector<272x128xf32> to vector<128xf32>
    %24 = vector.shape_cast %23 : vector<128xf32> to vector<1x128xf32>
    %25 = tpu.iota {dimensions = array<i32: 0>} : vector<8x128xi32>
    %c0_i32 = arith.constant 0 : i32
    %26 = vector.broadcast %c0_i32 : i32 to vector<8x128xi32>
    %27 = arith.cmpi eq, %25, %26 : vector<8x128xi32>
    %28 = vector.shape_cast %24 : vector<1x128xf32> to vector<1x128xf32>
    %29 = vector.broadcast %28 : vector<1x128xf32> to vector<8x128xf32>
    %cst_11 = arith.constant 0.000000e+00 : f32
    %30 = vector.broadcast %cst_11 : f32 to vector<8x128xf32>
    %31 = arith.select %27, %29, %30 : vector<8x128xi1>, vector<8x128xf32>
    %c0_12 = arith.constant 0 : index
    %c0_13 = arith.constant 0 : index
    %32 = vector.load %arg5[%c0_12, %c0_13] : memref<8x128xf32, #tpu.memory_space<vmem>>, vector<8x128xf32>
    tpu.vector_store %arg5[%c0_12, %c0_13], %31 {strides = array<i32>} : memref<8x128xf32, #tpu.memory_space<vmem>>, vector<8x128xf32>,
    return
  }
  func.func @transform_0(%arg0: i32) -> (i32, i32) {
    %c0_i32 = arith.constant 0 : i32
    %c0_i32_0 = arith.constant 0 : i32
    return %arg0, %c0_i32 : i32, i32
  }
  func.func @transform_1(%arg0: i32) -> (i32, i32) {
    %c0_i32 = arith.constant 0 : i32
    %c0_i32_0 = arith.constant 0 : i32
    return %arg0, %c0_i32 : i32, i32
  }
  func.func @transform_2(%arg0: i32) -> (i32, i32) {
    %c0_i32 = arith.constant 0 : i32
    %c0_i32_0 = arith.constant 0 : i32
    %c0_i32_1 = arith.constant 0 : i32
    return %c0_i32, %c0_i32_0 : i32, i32
  }
  func.func @transform_3(%arg0: i32) -> (i32, i32) {
    %c0_i32 = arith.constant 0 : i32
    %c0_i32_0 = arith.constant 0 : i32
    %c0_i32_1 = arith.constant 0 : i32
    return %c0_i32, %c0_i32_0 : i32, i32
  }
  func.func @transform_4(%arg0: i32) -> (i32, i32) {
    %c0_i32 = arith.constant 0 : i32
    %c0_i32_0 = arith.constant 0 : i32
    return %arg0, %c0_i32 : i32, i32
  }
}

module attributes {stable_mosaic.version = 11 : i64} {
  func.func @_mel_l1_kernel(%arg0: i32, %arg1: memref<144x64xbf16, #tpu.memory_space<vmem>>, %arg2: memref<144x64xbf16, #tpu.memory_space<vmem>>, %arg3: memref<64x256xbf16, #tpu.memory_space<vmem>>, %arg4: memref<128x128xbf16, #tpu.memory_space<vmem>>, %arg5: memref<8x128xf32, #tpu.memory_space<vmem>>) attributes {dimension_semantics = [#tpu.dimension_semantics<parallel>], iteration_bounds = array<i64: 1>, scalar_prefetch = 0 : i64, scratch_operands = 0 : i64, tpu.core_type = #tpu.core_type<tc>, window_params = [{transform_indices = @transform_0, window_bounds = array<i64: 144, 64>}, {transform_indices = @transform_1, window_bounds = array<i64: 144, 64>}, {pipeline_mode = #tpu.pipeline_mode<synchronous>, transform_indices = @transform_2, window_bounds = array<i64: 64, 256>}, {pipeline_mode = #tpu.pipeline_mode<synchronous>, transform_indices = @transform_3, window_bounds = array<i64: 128, 128>}, {transform_indices = @transform_4, window_bounds = array<i64: 8, 128>}]} {
    %c0 = arith.constant 0 : index
    %c0_0 = arith.constant 0 : index
    %0 = vector.load %arg1[%c0, %c0_0] : memref<144x64xbf16, #tpu.memory_space<vmem>>, vector<144x64xbf16>
    %c0_1 = arith.constant 0 : index
    %c0_2 = arith.constant 0 : index
    %1 = vector.load %arg2[%c0_1, %c0_2] : memref<144x64xbf16, #tpu.memory_space<vmem>>, vector<144x64xbf16>
    %2 = tpu.concatenate %0, %1 in 0 : vector<144x64xbf16>, vector<144x64xbf16> -> vector<288x64xbf16>
    %c0_3 = arith.constant 0 : index
    %c0_4 = arith.constant 0 : index
    %3 = vector.load %arg3[%c0_3, %c0_4] : memref<64x256xbf16, #tpu.memory_space<vmem>>, vector<64x256xbf16>
    %cst = arith.constant dense<0.000000e+00> : vector<288x256xf32>
    %4 = tpu.matmul %2, %3, %cst {dimension_numbers = #tpu.dot_dimension_numbers<[1], [0], [0], [1], [0, 0, 1, 1], [], []>} : vector<288x64xbf16>, vector<64x256xbf16>, vector<288x256xf32> -> vector<288x256xf32>
    %5 = vector.extract_strided_slice %4 {offsets = [0, 0], sizes = [288, 128], strides = [1, 1]} : vector<288x256xf32> to vector<288x128xf32>
    %6 = vector.extract_strided_slice %4 {offsets = [0, 128], sizes = [288, 128], strides = [1, 1]} : vector<288x256xf32> to vector<288x128xf32>
    %7 = arith.mulf %5, %5 : vector<288x128xf32>
    %8 = arith.mulf %6, %6 : vector<288x128xf32>
    %9 = arith.addf %7, %8 : vector<288x128xf32>
    %10 = math.sqrt %9 : vector<288x128xf32>
    %11 = arith.truncf %10 : vector<288x128xf32> to vector<288x128xbf16>
    %c0_5 = arith.constant 0 : index
    %c0_6 = arith.constant 0 : index
    %12 = vector.load %arg4[%c0_5, %c0_6] : memref<128x128xbf16, #tpu.memory_space<vmem>>, vector<128x128xbf16>
    %cst_7 = arith.constant dense<0.000000e+00> : vector<288x128xf32>
    %13 = tpu.matmul %11, %12, %cst_7 {dimension_numbers = #tpu.dot_dimension_numbers<[1], [0], [0], [1], [0, 0, 1, 1], [], []>} : vector<288x128xbf16>, vector<128x128xbf16>, vector<288x128xf32> -> vector<288x128xf32>
    %cst_8 = arith.constant 9.99999974E-6 : f32
    %14 = vector.broadcast %cst_8 : f32 to vector<288x128xf32>
    %15 = arith.maximumf %13, %14 : vector<288x128xf32>
    %16 = math.log %15 : vector<288x128xf32>
    %cst_9 = arith.constant 0.434294492 : f32
    %17 = vector.broadcast %cst_9 : f32 to vector<288x128xf32>
    %18 = arith.mulf %17, %16 : vector<288x128xf32>
    %19 = vector.extract_strided_slice %18 {offsets = [0, 0], sizes = [144, 128], strides = [1, 1]} : vector<288x128xf32> to vector<144x128xf32>
    %20 = vector.extract_strided_slice %18 {offsets = [144, 0], sizes = [144, 128], strides = [1, 1]} : vector<288x128xf32> to vector<144x128xf32>
    %21 = arith.subf %19, %20 : vector<144x128xf32>
    %22 = math.absf %21 : vector<144x128xf32>
    %cst_10 = arith.constant dense<0.000000e+00> : vector<128xf32>
    %23 = vector.multi_reduction <add>, %22, %cst_10 [0] : vector<144x128xf32> to vector<128xf32>
    %24 = vector.shape_cast %23 : vector<128xf32> to vector<1x128xf32>
    %25 = tpu.iota {dimensions = array<i32: 0>} : vector<8x128xi32>
    %c0_i32 = arith.constant 0 : i32
    %26 = vector.broadcast %c0_i32 : i32 to vector<8x128xi32>
    %27 = arith.cmpi eq, %25, %26 : vector<8x128xi32>
    %28 = vector.shape_cast %24 : vector<1x128xf32> to vector<1x128xf32>
    %29 = vector.broadcast %28 : vector<1x128xf32> to vector<8x128xf32>
    %cst_11 = arith.constant 0.000000e+00 : f32
    %30 = vector.broadcast %cst_11 : f32 to vector<8x128xf32>
    %31 = arith.select %27, %29, %30 : vector<8x128xi1>, vector<8x128xf32>
    %c0_12 = arith.constant 0 : index
    %c0_13 = arith.constant 0 : index
    %32 = vector.load %arg5[%c0_12, %c0_13] : memref<8x128xf32, #tpu.memory_space<vmem>>, vector<8x128xf32>
    tpu.vector_store %arg5[%c0_12, %c0_13], %31 {strides = array<i32>} : memref<8x128xf32, #tpu.memory_space<vmem>>, vector<8x128xf32>,
    return
  }
  func.func @transform_0(%arg0: i32) -> (i32, i32) {
    %c0_i32 = arith.constant 0 : i32
    %c0_i32_0 = arith.constant 0 : i32
    return %arg0, %c0_i32 : i32, i32
  }
  func.func @transform_1(%arg0: i32) -> (i32, i32) {
    %c0_i32 = arith.constant 0 : i32
    %c0_i32_0 = arith.constant 0 : i32
    return %arg0, %c0_i32 : i32, i32
  }
  func.func @transform_2(%arg0: i32) -> (i32, i32) {
    %c0_i32 = arith.constant 0 : i32
    %c0_i32_0 = arith.constant 0 : i32
    %c0_i32_1 = arith.constant 0 : i32
    return %c0_i32, %c0_i32_0 : i32, i32
  }
  func.func @transform_3(%arg0: i32) -> (i32, i32) {
    %c0_i32 = arith.constant 0 : i32
    %c0_i32_0 = arith.constant 0 : i32
    %c0_i32_1 = arith.constant 0 : i32
    return %c0_i32, %c0_i32_0 : i32, i32
  }
  func.func @transform_4(%arg0: i32) -> (i32, i32) {
    %c0_i32 = arith.constant 0 : i32
    %c0_i32_0 = arith.constant 0 : i32
    return %arg0, %c0_i32 : i32, i32
  }
}

module attributes {stable_mosaic.version = 11 : i64} {
  func.func @_mel_l1_kernel(%arg0: i32, %arg1: memref<80x128xbf16, #tpu.memory_space<vmem>>, %arg2: memref<80x128xbf16, #tpu.memory_space<vmem>>, %arg3: memref<128x256xbf16, #tpu.memory_space<vmem>>, %arg4: memref<128x128xbf16, #tpu.memory_space<vmem>>, %arg5: memref<8x128xf32, #tpu.memory_space<vmem>>) attributes {dimension_semantics = [#tpu.dimension_semantics<parallel>], iteration_bounds = array<i64: 1>, scalar_prefetch = 0 : i64, scratch_operands = 0 : i64, tpu.core_type = #tpu.core_type<tc>, window_params = [{transform_indices = @transform_0, window_bounds = array<i64: 80, 128>}, {transform_indices = @transform_1, window_bounds = array<i64: 80, 128>}, {pipeline_mode = #tpu.pipeline_mode<synchronous>, transform_indices = @transform_2, window_bounds = array<i64: 128, 256>}, {pipeline_mode = #tpu.pipeline_mode<synchronous>, transform_indices = @transform_3, window_bounds = array<i64: 128, 128>}, {transform_indices = @transform_4, window_bounds = array<i64: 8, 128>}]} {
    %c0 = arith.constant 0 : index
    %c0_0 = arith.constant 0 : index
    %0 = vector.load %arg1[%c0, %c0_0] : memref<80x128xbf16, #tpu.memory_space<vmem>>, vector<80x128xbf16>
    %c0_1 = arith.constant 0 : index
    %c0_2 = arith.constant 0 : index
    %1 = vector.load %arg2[%c0_1, %c0_2] : memref<80x128xbf16, #tpu.memory_space<vmem>>, vector<80x128xbf16>
    %2 = tpu.concatenate %0, %1 in 0 : vector<80x128xbf16>, vector<80x128xbf16> -> vector<160x128xbf16>
    %c0_3 = arith.constant 0 : index
    %c0_4 = arith.constant 0 : index
    %3 = vector.load %arg3[%c0_3, %c0_4] : memref<128x256xbf16, #tpu.memory_space<vmem>>, vector<128x256xbf16>
    %cst = arith.constant dense<0.000000e+00> : vector<160x256xf32>
    %4 = tpu.matmul %2, %3, %cst {dimension_numbers = #tpu.dot_dimension_numbers<[1], [0], [0], [1], [0, 0, 1, 1], [], []>} : vector<160x128xbf16>, vector<128x256xbf16>, vector<160x256xf32> -> vector<160x256xf32>
    %5 = vector.extract_strided_slice %4 {offsets = [0, 0], sizes = [160, 128], strides = [1, 1]} : vector<160x256xf32> to vector<160x128xf32>
    %6 = vector.extract_strided_slice %4 {offsets = [0, 128], sizes = [160, 128], strides = [1, 1]} : vector<160x256xf32> to vector<160x128xf32>
    %7 = arith.mulf %5, %5 : vector<160x128xf32>
    %8 = arith.mulf %6, %6 : vector<160x128xf32>
    %9 = arith.addf %7, %8 : vector<160x128xf32>
    %10 = math.sqrt %9 : vector<160x128xf32>
    %11 = arith.truncf %10 : vector<160x128xf32> to vector<160x128xbf16>
    %c0_5 = arith.constant 0 : index
    %c0_6 = arith.constant 0 : index
    %12 = vector.load %arg4[%c0_5, %c0_6] : memref<128x128xbf16, #tpu.memory_space<vmem>>, vector<128x128xbf16>
    %cst_7 = arith.constant dense<0.000000e+00> : vector<160x128xf32>
    %13 = tpu.matmul %11, %12, %cst_7 {dimension_numbers = #tpu.dot_dimension_numbers<[1], [0], [0], [1], [0, 0, 1, 1], [], []>} : vector<160x128xbf16>, vector<128x128xbf16>, vector<160x128xf32> -> vector<160x128xf32>
    %cst_8 = arith.constant 9.99999974E-6 : f32
    %14 = vector.broadcast %cst_8 : f32 to vector<160x128xf32>
    %15 = arith.maximumf %13, %14 : vector<160x128xf32>
    %16 = math.log %15 : vector<160x128xf32>
    %cst_9 = arith.constant 0.434294492 : f32
    %17 = vector.broadcast %cst_9 : f32 to vector<160x128xf32>
    %18 = arith.mulf %17, %16 : vector<160x128xf32>
    %19 = vector.extract_strided_slice %18 {offsets = [0, 0], sizes = [80, 128], strides = [1, 1]} : vector<160x128xf32> to vector<80x128xf32>
    %20 = vector.extract_strided_slice %18 {offsets = [80, 0], sizes = [80, 128], strides = [1, 1]} : vector<160x128xf32> to vector<80x128xf32>
    %21 = arith.subf %19, %20 : vector<80x128xf32>
    %22 = math.absf %21 : vector<80x128xf32>
    %cst_10 = arith.constant dense<0.000000e+00> : vector<128xf32>
    %23 = vector.multi_reduction <add>, %22, %cst_10 [0] : vector<80x128xf32> to vector<128xf32>
    %24 = vector.shape_cast %23 : vector<128xf32> to vector<1x128xf32>
    %25 = tpu.iota {dimensions = array<i32: 0>} : vector<8x128xi32>
    %c0_i32 = arith.constant 0 : i32
    %26 = vector.broadcast %c0_i32 : i32 to vector<8x128xi32>
    %27 = arith.cmpi eq, %25, %26 : vector<8x128xi32>
    %28 = vector.shape_cast %24 : vector<1x128xf32> to vector<1x128xf32>
    %29 = vector.broadcast %28 : vector<1x128xf32> to vector<8x128xf32>
    %cst_11 = arith.constant 0.000000e+00 : f32
    %30 = vector.broadcast %cst_11 : f32 to vector<8x128xf32>
    %31 = arith.select %27, %29, %30 : vector<8x128xi1>, vector<8x128xf32>
    %c0_12 = arith.constant 0 : index
    %c0_13 = arith.constant 0 : index
    %32 = vector.load %arg5[%c0_12, %c0_13] : memref<8x128xf32, #tpu.memory_space<vmem>>, vector<8x128xf32>
    tpu.vector_store %arg5[%c0_12, %c0_13], %31 {strides = array<i32>} : memref<8x128xf32, #tpu.memory_space<vmem>>, vector<8x128xf32>,
    return
  }
  func.func @transform_0(%arg0: i32) -> (i32, i32) {
    %c0_i32 = arith.constant 0 : i32
    %c0_i32_0 = arith.constant 0 : i32
    return %arg0, %c0_i32 : i32, i32
  }
  func.func @transform_1(%arg0: i32) -> (i32, i32) {
    %c0_i32 = arith.constant 0 : i32
    %c0_i32_0 = arith.constant 0 : i32
    return %arg0, %c0_i32 : i32, i32
  }
  func.func @transform_2(%arg0: i32) -> (i32, i32) {
    %c0_i32 = arith.constant 0 : i32
    %c0_i32_0 = arith.constant 0 : i32
    %c0_i32_1 = arith.constant 0 : i32
    return %c0_i32, %c0_i32_0 : i32, i32
  }
  func.func @transform_3(%arg0: i32) -> (i32, i32) {
    %c0_i32 = arith.constant 0 : i32
    %c0_i32_0 = arith.constant 0 : i32
    %c0_i32_1 = arith.constant 0 : i32
    return %c0_i32, %c0_i32_0 : i32, i32
  }
  func.func @transform_4(%arg0: i32) -> (i32, i32) {
    %c0_i32 = arith.constant 0 : i32
    %c0_i32_0 = arith.constant 0 : i32
    return %arg0, %c0_i32 : i32, i32
  }
}

module attributes {stable_mosaic.version = 11 : i64} {
  func.func @_mel_l1_kernel(%arg0: i32, %arg1: memref<48x256xbf16, #tpu.memory_space<vmem>>, %arg2: memref<48x256xbf16, #tpu.memory_space<vmem>>, %arg3: memref<256x512xbf16, #tpu.memory_space<vmem>>, %arg4: memref<256x128xbf16, #tpu.memory_space<vmem>>, %arg5: memref<8x128xf32, #tpu.memory_space<vmem>>) attributes {dimension_semantics = [#tpu.dimension_semantics<parallel>], iteration_bounds = array<i64: 1>, scalar_prefetch = 0 : i64, scratch_operands = 0 : i64, tpu.core_type = #tpu.core_type<tc>, window_params = [{transform_indices = @transform_0, window_bounds = array<i64: 48, 256>}, {transform_indices = @transform_1, window_bounds = array<i64: 48, 256>}, {pipeline_mode = #tpu.pipeline_mode<synchronous>, transform_indices = @transform_2, window_bounds = array<i64: 256, 512>}, {pipeline_mode = #tpu.pipeline_mode<synchronous>, transform_indices = @transform_3, window_bounds = array<i64: 256, 128>}, {transform_indices = @transform_4, window_bounds = array<i64: 8, 128>}]} {
    %c0 = arith.constant 0 : index
    %c0_0 = arith.constant 0 : index
    %0 = vector.load %arg1[%c0, %c0_0] : memref<48x256xbf16, #tpu.memory_space<vmem>>, vector<48x256xbf16>
    %c0_1 = arith.constant 0 : index
    %c0_2 = arith.constant 0 : index
    %1 = vector.load %arg2[%c0_1, %c0_2] : memref<48x256xbf16, #tpu.memory_space<vmem>>, vector<48x256xbf16>
    %2 = tpu.concatenate %0, %1 in 0 : vector<48x256xbf16>, vector<48x256xbf16> -> vector<96x256xbf16>
    %c0_3 = arith.constant 0 : index
    %c0_4 = arith.constant 0 : index
    %3 = vector.load %arg3[%c0_3, %c0_4] : memref<256x512xbf16, #tpu.memory_space<vmem>>, vector<256x512xbf16>
    %cst = arith.constant dense<0.000000e+00> : vector<96x512xf32>
    %4 = tpu.matmul %2, %3, %cst {dimension_numbers = #tpu.dot_dimension_numbers<[1], [0], [0], [1], [0, 0, 1, 1], [], []>} : vector<96x256xbf16>, vector<256x512xbf16>, vector<96x512xf32> -> vector<96x512xf32>
    %5 = vector.extract_strided_slice %4 {offsets = [0, 0], sizes = [96, 256], strides = [1, 1]} : vector<96x512xf32> to vector<96x256xf32>
    %6 = vector.extract_strided_slice %4 {offsets = [0, 256], sizes = [96, 256], strides = [1, 1]} : vector<96x512xf32> to vector<96x256xf32>
    %7 = arith.mulf %5, %5 : vector<96x256xf32>
    %8 = arith.mulf %6, %6 : vector<96x256xf32>
    %9 = arith.addf %7, %8 : vector<96x256xf32>
    %10 = math.sqrt %9 : vector<96x256xf32>
    %11 = arith.truncf %10 : vector<96x256xf32> to vector<96x256xbf16>
    %c0_5 = arith.constant 0 : index
    %c0_6 = arith.constant 0 : index
    %12 = vector.load %arg4[%c0_5, %c0_6] : memref<256x128xbf16, #tpu.memory_space<vmem>>, vector<256x128xbf16>
    %cst_7 = arith.constant dense<0.000000e+00> : vector<96x128xf32>
    %13 = tpu.matmul %11, %12, %cst_7 {dimension_numbers = #tpu.dot_dimension_numbers<[1], [0], [0], [1], [0, 0, 1, 1], [], []>} : vector<96x256xbf16>, vector<256x128xbf16>, vector<96x128xf32> -> vector<96x128xf32>
    %cst_8 = arith.constant 9.99999974E-6 : f32
    %14 = vector.broadcast %cst_8 : f32 to vector<96x128xf32>
    %15 = arith.maximumf %13, %14 : vector<96x128xf32>
    %16 = math.log %15 : vector<96x128xf32>
    %cst_9 = arith.constant 0.434294492 : f32
    %17 = vector.broadcast %cst_9 : f32 to vector<96x128xf32>
    %18 = arith.mulf %17, %16 : vector<96x128xf32>
    %19 = vector.extract_strided_slice %18 {offsets = [0, 0], sizes = [48, 128], strides = [1, 1]} : vector<96x128xf32> to vector<48x128xf32>
    %20 = vector.extract_strided_slice %18 {offsets = [48, 0], sizes = [48, 128], strides = [1, 1]} : vector<96x128xf32> to vector<48x128xf32>
    %21 = arith.subf %19, %20 : vector<48x128xf32>
    %22 = math.absf %21 : vector<48x128xf32>
    %cst_10 = arith.constant dense<0.000000e+00> : vector<128xf32>
    %23 = vector.multi_reduction <add>, %22, %cst_10 [0] : vector<48x128xf32> to vector<128xf32>
    %24 = vector.shape_cast %23 : vector<128xf32> to vector<1x128xf32>
    %25 = tpu.iota {dimensions = array<i32: 0>} : vector<8x128xi32>
    %c0_i32 = arith.constant 0 : i32
    %26 = vector.broadcast %c0_i32 : i32 to vector<8x128xi32>
    %27 = arith.cmpi eq, %25, %26 : vector<8x128xi32>
    %28 = vector.shape_cast %24 : vector<1x128xf32> to vector<1x128xf32>
    %29 = vector.broadcast %28 : vector<1x128xf32> to vector<8x128xf32>
    %cst_11 = arith.constant 0.000000e+00 : f32
    %30 = vector.broadcast %cst_11 : f32 to vector<8x128xf32>
    %31 = arith.select %27, %29, %30 : vector<8x128xi1>, vector<8x128xf32>
    %c0_12 = arith.constant 0 : index
    %c0_13 = arith.constant 0 : index
    %32 = vector.load %arg5[%c0_12, %c0_13] : memref<8x128xf32, #tpu.memory_space<vmem>>, vector<8x128xf32>
    tpu.vector_store %arg5[%c0_12, %c0_13], %31 {strides = array<i32>} : memref<8x128xf32, #tpu.memory_space<vmem>>, vector<8x128xf32>,
    return
  }
  func.func @transform_0(%arg0: i32) -> (i32, i32) {
    %c0_i32 = arith.constant 0 : i32
    %c0_i32_0 = arith.constant 0 : i32
    return %arg0, %c0_i32 : i32, i32
  }
  func.func @transform_1(%arg0: i32) -> (i32, i32) {
    %c0_i32 = arith.constant 0 : i32
    %c0_i32_0 = arith.constant 0 : i32
    return %arg0, %c0_i32 : i32, i32
  }
  func.func @transform_2(%arg0: i32) -> (i32, i32) {
    %c0_i32 = arith.constant 0 : i32
    %c0_i32_0 = arith.constant 0 : i32
    %c0_i32_1 = arith.constant 0 : i32
    return %c0_i32, %c0_i32_0 : i32, i32
  }
  func.func @transform_3(%arg0: i32) -> (i32, i32) {
    %c0_i32 = arith.constant 0 : i32
    %c0_i32_0 = arith.constant 0 : i32
    %c0_i32_1 = arith.constant 0 : i32
    return %c0_i32, %c0_i32_0 : i32, i32
  }
  func.func @transform_4(%arg0: i32) -> (i32, i32) {
    %c0_i32 = arith.constant 0 : i32
    %c0_i32_0 = arith.constant 0 : i32
    return %arg0, %c0_i32 : i32, i32
  }
}

</mosaic_0001>

<bundles_post_ra>
// kernel: _forward.4
= control target key start
LH: loop header
LB: loop body
LE: loop exit
PB: predicated region body
PF: predicated region fallthrough
CT: control target
= control target key end

     0   :  { %v2758_v1 = vmov 0   ;;  %vm280_vm0 = vcmask 261120   ;;  %s3804_s2 = inlined_call_operand.vmem [shape: bf16[32,256], index: 2, kind: input, shape index: {}]   ;;  %s3805_s0 = inlined_call_operand.vmem [shape: bf16[272,32], index: 0, kind: input, shape index: {}]   ;;  %s3806_s1 = inlined_call_operand.vmem [shape: bf16[272,32], index: 1, kind: input, shape index: {}]   ;;  %s3807_s3 = inlined_call_operand.vmem [shape: bf16[128,128], index: 3, kind: input, shape index: {}]   ;;  %s3808_s4 = inlined_call_operand.vmem [shape: f32[8,128], index: 4, kind: output, shape index: {}]  }
   0x1   :  { %v2438_v0 = vld [vmem:[%s3804_s2 + $0x14] ss:$8 sps:$4 sm:$0xff]   ;;  %415 = vmatprep.mubr.bf16.mxu0 %v2758_v1  ;;  %675 = vmatprep.mubr.bf16.mxu1 %v2758_v1  ;;  %v2440_v2 = vld [vmem:[%s3804_s2 + $0x10] ss:$8 sps:$4 sm:$0xff]   ;;  %v2441_v3 = vld [vmem:[%s3804_s2 + $0x4] ss:$8 sps:$4 sm:$0xff]  }
   0x2   :  { %395 = vmatprep.subr.bf16.mxu0 %v2438_v0  ;;  %2433 = vmatprep.subr.bf16.mxu1 %v2438_v0  ;;  %v2443_v4 = vld [vmem:[%s3804_s2] ss:$8 sps:$4 sm:$0xff]   ;;  %v2446_v7 = vld [vmem:[%s3805_s0 + $0x10] sm:$0xff]   ;;  %v2447_v8 = vld [vmem:[%s3805_s0 + $0x18] sm:$0xff]  }
   0x3   :  { %396 = vmatpush1.bf16.msra.mxu0 %v2440_v2  ;;  %2435 = vmatpush1.bf16.msra.mxu1 %v2440_v2  ;;  %v2444_v5 = vld [vmem:[%s3805_s0] sm:$0xff]   ;;  %v2445_v6 = vld [vmem:[%s3805_s0 + $0x8] sm:$0xff]   ;;  %v2466_v11 = vld [vmem:[%s3806_s1 + $0x50] sm:$0xff]  }
   0x4   :  { %397 = vmatprep.subr.bf16.mxu0 %v2441_v3  ;;  %2434 = vmatprep.subr.bf16.mxu1 %v2441_v3  ;;  %v2464_v9 = vld [vmem:[%s3806_s1 + $0x48] sm:$0xff]   ;;  %v2448_v10 = vld [vmem:[%s3805_s0 + $0x20] sm:$0xff]   ;;  %v2468_v13 = vld [vmem:[%s3806_s1 + $0x58] sm:$0xff]  }
   0x5   :  { %v2449_v12 = vld [vmem:[%s3805_s0 + $0x28] sm:$0xff]   ;;  %v2450_v14 = vld [vmem:[%s3805_s0 + $0x30] sm:$0xff]   ;;  %v2470_v15 = vld [vmem:[%s3806_s1 + $0x60] sm:$0xff]  }
   0x6   :  { %v2451_v16 = vld [vmem:[%s3805_s0 + $0x38] sm:$0xff]   ;;  %v2472_v17 = vld [vmem:[%s3806_s1 + $0x68] sm:$0xff]   ;;  %v2452_v18 = vld [vmem:[%s3805_s0 + $0x40] sm:$0xff]  }
   0x7   :  { %398 = vmatpush1.bf16.msra.mxu0 %v2443_v4  ;;  %2436 = vmatpush1.bf16.msra.mxu1 %v2443_v4  ;;  %v2474_v19 = vld [vmem:[%s3806_s1 + $0x70] sm:$0xff]   ;;  %v2453_v20 = vld [vmem:[%s3805_s0 + $0x48] sm:$0xff]   ;;  %v2475_v21 = vld [vmem:[%s3807_s3 + $0x38] sm:$0xff]  }
   0x8   :  { %2349 = vmatprep.subr.bf16.mxu1 %v2475_v21  ;;  %v2477_v22 = vld [vmem:[%s3806_s1 + $0x78] sm:$0xff]   ;;  %v2478_v23 = vld [vmem:[%s3807_s3 + $0x30] sm:$0xff]   ;;  %v2479_v25 = vld [vmem:[%s3807_s3 + $0x28] sm:$0xff]  }
   0x9   :  { %v2454_v24 = vld [vmem:[%s3805_s0 + $0x50] sm:$0xff]   ;;  %v2480_v26 = vld [vmem:[%s3806_s1 + $0x80] sm:$0xff]   ;;  %v2455_v28 = vld [vmem:[%s3805_s0 + $0x58] sm:$0xff]  }
   0xa   :  { %2265 = vmatmul.mubr.msk.bf16.vlgmr.msra.gmra.mxu0 %vm280_vm0, %v2444_v5  ;;  %2291 = vmatmul.mubr.msk.bf16.vlgmr.msra.gmra.mxu1 %vm280_vm0, %v2464_v9  ;;  %v2481_v27 = vld [vmem:[%s3807_s3 + $0x20] sm:$0xff]   ;;  %v2482_v29 = vld [vmem:[%s3807_s3 + $0x18] sm:$0xff]   ;;  %v2483_v30 = vld [vmem:[%s3807_s3 + $0x10] sm:$0xff]  }
   0xb   :  { %425 = vmatprep.mubr.bf16.mxu0 %v2758_v1  ;;  %685 = vmatprep.mubr.bf16.mxu1 %v2758_v1  ;;  %v2456_v31 = vld [vmem:[%s3805_s0 + $0x60] sm:$0xff]   ;;  %v2484_v32 = vld [vmem:[%s3807_s3 + $0x8] sm:$0xff]   ;;  %v2458_v35 = vld [vmem:[%s3805_s0 + $0x70] sm:$0xff]  }
   0xc   :  { %2350 = vmatpush3.bf16.msra.mxu1 %v2475_v21  ;;  %v2485_v33 = vld [vmem:[%s3807_s3] sm:$0xff]   ;;  %v2457_v34 = vld [vmem:[%s3805_s0 + $0x68] sm:$0xff]   ;;  %v2459_v36 = vld [vmem:[%s3805_s0 + $0x78] sm:$0xff]  }
   0xd   :  { %2351 = vmatprep.subr.bf16.mxu1 %v2478_v23  ;;  %v2460_v37 = vld [vmem:[%s3805_s0 + $0x80] sm:$0xff]   ;;  %v2462_v39 = vld [vmem:[%s3806_s1 + $0x8] sm:$0xff]   ;;  %v2463_v40 = vld [vmem:[%s3806_s1 + $0x10] sm:$0xff]  }
   0xe   :  { %v2461_v38 = vld [vmem:[%s3806_s1] sm:$0xff]   ;;  %v2465_v41 = vld [vmem:[%s3806_s1 + $0x18] sm:$0xff]   ;;  %v2469_v43 = vld [vmem:[%s3806_s1 + $0x28] sm:$0xff]  }
   0xf   :  { %v2467_v42 = vld [vmem:[%s3806_s1 + $0x20] sm:$0xff]   ;;  %v2471_v44 = vld [vmem:[%s3806_s1 + $0x30] sm:$0xff]   ;;  %v2473_v45 = vld [vmem:[%s3806_s1 + $0x38] sm:$0xff]  }
  0x10   :  { %2352 = vmatpush3.bf16.msra.mxu1 %v2478_v23  ;;  %v2476_v51 = vld [vmem:[%s3806_s1 + $0x40] sm:$0xff]  }
  0x11   :  { %2353 = vmatprep.subr.bf16.mxu1 %v2479_v25 }
  0x12   :  { %2266 = vmatmul.mubr.msk.bf16.gmra.mxu0 %vm280_vm0, %v2445_v6  ;;  %2292 = vmatmul.mubr.msk.bf16.gmra.mxu1 %vm280_vm0, %v2466_v11 }
  0x13   :  { %435 = vmatprep.mubr.bf16.mxu0 %v2758_v1  ;;  %695 = vmatprep.mubr.bf16.mxu1 %v2758_v1 }
  0x14   :  { %2354 = vmatpush3.bf16.msra.mxu1 %v2479_v25 }
  0x15   :  { %2355 = vmatprep.subr.bf16.mxu1 %v2481_v27 }
  0x18   :  { %2356 = vmatpush3.bf16.msra.mxu1 %v2481_v27 }
  0x19   :  { %2357 = vmatprep.subr.bf16.mxu1 %v2482_v29 }
  0x1a   :  { %2267 = vmatmul.mubr.msk.bf16.gmra.mxu0 %vm280_vm0, %v2446_v7  ;;  %2293 = vmatmul.mubr.msk.bf16.gmra.mxu1 %vm280_vm0, %v2468_v13 }
  0x1b   :  { %445 = vmatprep.mubr.bf16.mxu0 %v2758_v1  ;;  %705 = vmatprep.mubr.bf16.mxu1 %v2758_v1 }
  0x1c   :  { %2358 = vmatpush3.bf16.msra.mxu1 %v2482_v29 }
  0x1d   :  { %2359 = vmatprep.subr.bf16.mxu1 %v2483_v30 }
  0x20   :  { %2360 = vmatpush3.bf16.msra.mxu1 %v2483_v30 }
  0x21   :  { %2361 = vmatprep.subr.bf16.mxu1 %v2484_v32 }
  0x22   :  { %2268 = vmatmul.mubr.msk.bf16.gmra.mxu0 %vm280_vm0, %v2447_v8  ;;  %2294 = vmatmul.mubr.msk.bf16.gmra.mxu1 %vm280_vm0, %v2470_v15 }
  0x23   :  { %455 = vmatprep.mubr.bf16.mxu0 %v2758_v1  ;;  %715 = vmatprep.mubr.bf16.mxu1 %v2758_v1 }
  0x24   :  { %2362 = vmatpush3.bf16.msra.mxu1 %v2484_v32 }
  0x25   :  { %2363 = vmatprep.subr.bf16.mxu1 %v2485_v33 }
  0x28   :  { %2364 = vmatpush3.bf16.msra.mxu1 %v2485_v33 }
  0x2a   :  { %2269 = vmatmul.mubr.msk.bf16.gmra.mxu0 %vm280_vm0, %v2448_v10  ;;  %2295 = vmatmul.mubr.msk.bf16.gmra.mxu1 %vm280_vm0, %v2472_v17 }
  0x2b   :  { %465 = vmatprep.mubr.bf16.mxu0 %v2758_v1  ;;  %725 = vmatprep.mubr.bf16.mxu1 %v2758_v1 }
  0x32   :  { %2270 = vmatmul.mubr.msk.bf16.gmra.mxu0 %vm280_vm0, %v2449_v12  ;;  %2296 = vmatmul.mubr.msk.bf16.gmra.mxu1 %vm280_vm0, %v2474_v19 }
  0x33   :  { %475 = vmatprep.mubr.bf16.mxu0 %v2758_v1  ;;  %735 = vmatprep.mubr.bf16.mxu1 %v2758_v1 }
  0x3a   :  { %2271 = vmatmul.mubr.msk.bf16.gmra.mxu0 %vm280_vm0, %v2450_v14  ;;  %2297 = vmatmul.mubr.msk.bf16.gmra.mxu1 %vm280_vm0, %v2477_v22 }
  0x3b   :  { %485 = vmatprep.mubr.bf16.mxu0 %v2758_v1  ;;  %745 = vmatprep.mubr.bf16.mxu1 %v2758_v1 }
  0x42   :  { %2272 = vmatmul.mubr.msk.bf16.gmra.mxu0 %vm280_vm0, %v2451_v16  ;;  %2298 = vmatmul.mubr.msk.bf16.gmra.mxu1 %vm280_vm0, %v2480_v26 }
  0x43   :  { %495 = vmatprep.mubr.bf16.mxu0 %v2758_v1 }
  0x4a   :  { %2273 = vmatmul.mubr.msk.bf16.gmra.mxu0 %vm280_vm0, %v2452_v18 }
  0x4b   :  { %505 = vmatprep.mubr.bf16.mxu0 %v2758_v1 }
  0x52   :  { %2274 = vmatmul.mubr.msk.bf16.gmra.mxu0 %vm280_vm0, %v2453_v20 }
  0x53   :  { %515 = vmatprep.mubr.bf16.mxu0 %v2758_v1 }
  0x5a   :  { %2275 = vmatmul.mubr.msk.bf16.gmra.mxu0 %vm280_vm0, %v2454_v24 }
  0x5b   :  { %525 = vmatprep.mubr.bf16.mxu0 %v2758_v1 }
  0x62   :  { %2276 = vmatmul.mubr.msk.bf16.gmra.mxu0 %vm280_vm0, %v2455_v28 }
  0x63   :  { %535 = vmatprep.mubr.bf16.mxu0 %v2758_v1 }
  0x6a   :  { %2277 = vmatmul.mubr.msk.bf16.gmra.mxu0 %vm280_vm0, %v2456_v31 }
  0x6b   :  { %545 = vmatprep.mubr.bf16.mxu0 %v2758_v1 }
  0x72   :  { %2278 = vmatmul.mubr.msk.bf16.gmra.mxu0 %vm280_vm0, %v2457_v34 }
  0x73   :  { %555 = vmatprep.mubr.bf16.mxu0 %v2758_v1 }
  0x7a   :  { %2279 = vmatmul.mubr.msk.bf16.gmra.mxu0 %vm280_vm0, %v2458_v35 }
  0x7b   :  { %565 = vmatprep.mubr.bf16.mxu0 %v2758_v1 }
  0x82   :  { %2280 = vmatmul.mubr.msk.bf16.gmra.mxu0 %vm280_vm0, %v2459_v36 }
  0x83   :  { %575 = vmatprep.mubr.bf16.mxu0 %v2758_v1 }
  0x8a   :  { %2281 = vmatmul.mubr.msk.bf16.gmra.mxu0 %vm280_vm0, %v2460_v37 }
  0x8b   :  { %585 = vmatprep.mubr.bf16.mxu0 %v2758_v1 }
  0x92   :  { %2282 = vmatmul.mubr.msk.bf16.gmra.mxu0 %vm280_vm0, %v2461_v38 }
  0x93   :  { %595 = vmatprep.mubr.bf16.mxu0 %v2758_v1 }
  0x9a   :  { %2283 = vmatmul.mubr.msk.bf16.gmra.mxu0 %vm280_vm0, %v2462_v39 }
  0x9b   :  { %605 = vmatprep.mubr.bf16.mxu0 %v2758_v1 }
  0xa2   :  { %2284 = vmatmul.mubr.msk.bf16.gmra.mxu0 %vm280_vm0, %v2463_v40 }
  0xa3   :  { %615 = vmatprep.mubr.bf16.mxu0 %v2758_v1 }
  0xaa   :  { %2285 = vmatmul.mubr.msk.bf16.gmra.mxu0 %vm280_vm0, %v2465_v41 }
  0xab   :  { %625 = vmatprep.mubr.bf16.mxu0 %v2758_v1 }
  0xb2   :  { %2286 = vmatmul.mubr.msk.bf16.gmra.mxu0 %vm280_vm0, %v2467_v42 }
  0xb3   :  { %635 = vmatprep.mubr.bf16.mxu0 %v2758_v1 }
  0xba   :  { %2287 = vmatmul.mubr.msk.bf16.gmra.mxu0 %vm280_vm0, %v2469_v43 }
  0xbb   :  { %645 = vmatprep.mubr.bf16.mxu0 %v2758_v1 }
  0xc2   :  { %2288 = vmatmul.mubr.msk.bf16.gmra.mxu0 %vm280_vm0, %v2471_v44 }
  0xc3   :  { %655 = vmatprep.mubr.bf16.mxu0 %v2758_v1 }
  0xca   :  { %v417_v46 = vpop.f32.mrf.mxu0  ;;  %2289 = vmatmul.mubr.msk.bf16.gmra.mxu0 %vm280_vm0, %v2473_v45 }
  0xcb   :  { %665 = vmatprep.mubr.bf16.mxu0 %v2758_v1  ;;  %v756_v48 = vmul.f32 %v417_v46, %v417_v46 }
  0xcc   :  { %v419_v47 = vpop.f32.mrf.mxu0 }
  0xcd   :  { %v824_v49 = vmul.f32 %v419_v47, %v419_v47 }
  0xce   :  { %v421_v50 = vpop.f32.mrf.mxu0 }
  0xcf   :  { %v892_v52 = vadd.f32 %v824_v49, %v756_v48  ;;  %v757_v54 = vmul.f32 %v421_v50, %v421_v50 }
  0xd0   :  { %v423_v53 = vpop.f32.mrf.mxu0 }
  0xd1   :  { %2486 = vrsqrt.f32 %v892_v52  ;;  %v825_v55 = vmul.f32 %v423_v53, %v423_v53  ;;  %vm962_vm1 = vcmp.eq.f32.partialorder %v892_v52, inf  ;;  %vm964_vm2 = vcmp.eq.f32.partialorder %v892_v52, 0.0 }
  0xd2   :  { %v427_v56 = vpop.f32.mrf.mxu0  ;;  %2290 = vmatmul.mubr.msk.bf16.gmra.mxu0 %vm280_vm0, %v2476_v51  ;;  %v965_v20 = vand.u32 2147483648, %v892_v52 }
  0xd3   :  { %v893_v57 = vadd.f32 %v825_v55, %v757_v54  ;;  %v758_v59 = vmul.f32 %v427_v56, %v427_v56 }
  0xd4   :  { %v429_v58 = vpop.f32.mrf.mxu0 }
  0xd5   :  { %2488 = vrsqrt.f32 %v893_v57  ;;  %v826_v60 = vmul.f32 %v429_v58, %v429_v58  ;;  %vm969_vm3 = vcmp.eq.f32.partialorder %v893_v57, inf  ;;  %vm971_vm4 = vcmp.eq.f32.partialorder %v893_v57, 0.0 }
  0xd6   :  { %v431_v61 = vpop.f32.mrf.mxu0  ;;  %v972_v21 = vand.u32 2147483648, %v893_v57 }
  0xd7   :  { %v2990_v62 = vadd.f32 %v826_v60, %v758_v59  ;;  %v759_v0 = vmul.f32 %v431_v61, %v431_v61 }
  0xd8   :  { %v433_v63 = vpop.f32.mrf.mxu0 }
  0xd9   :  { %2490 = vrsqrt.f32 %v2990_v62  ;;  %v827_v1 = vmul.f32 %v433_v63, %v433_v63  ;;  %vm976_vm5 = vcmp.eq.f32.partialorder %v2990_v62, inf  ;;  %vm978_vm6 = vcmp.eq.f32.partialorder %v2990_v62, 0.0 }
  0xda   :  { %v437_v2 = vpop.f32.mrf.mxu0  ;;  %v979_v41 = vand.u32 2147483648, %v2990_v62 }
  0xdb   :  { %v895_v3 = vadd.f32 %v827_v1, %v759_v0  ;;  %v760_v5 = vmul.f32 %v437_v2, %v437_v2 }
  0xdc   :  { %v439_v4 = vpop.f32.mrf.mxu0 }
  0xdd   :  { %2492 = vrsqrt.f32 %v895_v3  ;;  %v828_v6 = vmul.f32 %v439_v4, %v439_v4  ;;  %vm983_vm7 = vcmp.eq.f32.partialorder %v895_v3, inf  ;;  %vm985_vm8 = vcmp.eq.f32.partialorder %v895_v3, 0.0 }
  0xde   :  { %v2487_v7 = vpop.eup %2486  ;;  %v441_v8 = vpop.f32.mrf.mxu0  ;;  %v986_v42 = vand.u32 2147483648, %v895_v3 }
  0xdf   :  { %v2993_v9 = vadd.f32 %v828_v6, %v760_v5  ;;  %v961_v10 = vmul.f32 %v2487_v7, %v892_v52  ;;  %v761_v12 = vmul.f32 %v441_v8, %v441_v8 }
  0xe0   :  { %v443_v11 = vpop.f32.mrf.mxu0 }
  0xe1   :  { %2494 = vrsqrt.f32 %v2993_v9  ;;  %v829_v13 = vmul.f32 %v443_v11, %v443_v11  ;;  %v963_v17 = vsel %vm962_vm1, %v892_v52, %v961_v10  ;;  %vm990_vm9 = vcmp.eq.f32.partialorder %v2993_v9, inf }
  0xe2   :  { %v2489_v14 = vpop.eup %2488  ;;  %v447_v15 = vpop.f32.mrf.mxu0  ;;  %v966_v27 = vsel %vm964_vm2, %v965_v20, %v963_v17  ;;  %vm992_vm10 = vcmp.eq.f32.partialorder %v2993_v9, 0.0 }
  0xe3   :  { %v2996_v16 = vadd.f32 %v829_v13, %v761_v12  ;;  %v968_v18 = vmul.f32 %v2489_v14, %v893_v57  ;;  %v762_v22 = vmul.f32 %v447_v15, %v447_v15 }
  0xe4   :  { %v449_v19 = vpop.f32.mrf.mxu0 }
  0xe5   :  { %2496 = vrsqrt.f32 %v2996_v16  ;;  %v830_v23 = vmul.f32 %v449_v19, %v449_v19  ;;  %v970_v24 = vsel %vm969_vm3, %v893_v57, %v968_v18  ;;  %vm997_vm11 = vcmp.eq.f32.partialorder %v2996_v16, inf }
  0xe6   :  { %v2491_v25 = vpop.eup %2490  ;;  %v451_v26 = vpop.f32.mrf.mxu0  ;;  %v973_v28 = vsel %vm971_vm4, %v972_v21, %v970_v24  ;;  %vm999_vm12 = vcmp.eq.f32.partialorder %v2996_v16, 0.0  ;;  %v1000_v63 = vand.u32 2147483648, %v2996_v16 }
  0xe7   :  { %v2999_v29 = vadd.f32 %v830_v23, %v762_v22  ;;  %v1436_v30 = vpack.c.bf16 %v973_v28, %v966_v27  ;;  %v975_v31 = vmul.f32 %v2491_v25, %v2990_v62  ;;  %v763_v33 = vmul.f32 %v451_v26, %v451_v26 }
  0xe8   :  { %v453_v32 = vpop.f32.mrf.mxu0 }
  0xe9   :  { %2498 = vrsqrt.f32 %v2999_v29  ;;  %v831_v34 = vmul.f32 %v453_v32, %v453_v32  ;;  %2365 = vmatprep.mubr.bf16.mxu1 %v1436_v30  ;;  %v977_v38 = vsel %vm976_vm5, %v2990_v62, %v975_v31  ;;  %v993_v62 = vand.u32 2147483648, %v2993_v9 }
  0xea   :  { %v2493_v35 = vpop.eup %2492  ;;  %v457_v36 = vpop.f32.mrf.mxu0  ;;  %v980_v48 = vsel %vm978_vm6, %v979_v41, %v977_v38  ;;  %vm1004_vm13 = vcmp.eq.f32.partialorder %v2999_v29, inf  ;;  %vm1006_vm14 = vcmp.eq.f32.partialorder %v2999_v29, 0.0  ;;  %v1007_v19 = vand.u32 2147483648, %v2999_v29 }
  0xeb   :  { %v3004_v37 = vadd.f32 %v831_v34, %v763_v33  ;;  %v982_v39 = vmul.f32 %v2493_v35, %v895_v3  ;;  %v764_v43 = vmul.f32 %v457_v36, %v457_v36 }
  0xec   :  { %v459_v40 = vpop.f32.mrf.mxu0 }
  0xed   :  { %2500 = vrsqrt.f32 %v3004_v37  ;;  %v832_v44 = vmul.f32 %v459_v40, %v459_v40  ;;  %v984_v45 = vsel %vm983_vm7, %v895_v3, %v982_v39  ;;  %vm1011_vm15 = vcmp.eq.f32.partialorder %v3004_v37, inf }
  0xee   :  { %v2495_v46 = vpop.eup %2494  ;;  %v461_v47 = vpop.f32.mrf.mxu0  ;;  %v987_v49 = vsel %vm985_vm8, %v986_v42, %v984_v45  ;;  %vm1013_vm0 = vcmp.eq.f32.partialorder %v3004_v37, 0.0  ;;  %v1014_v20 = vand.u32 2147483648, %v3004_v37 }
  0xef   :  { %v3010_v50 = vadd.f32 %v832_v44, %v764_v43  ;;  %v1437_v51 = vpack.c.bf16 %v987_v49, %v980_v48  ;;  %v989_v52 = vmul.f32 %v2495_v46, %v2993_v9  ;;  %v765_v54 = vmul.f32 %v461_v47, %v461_v47 }
  0xf0   :  { %v463_v53 = vpop.f32.mrf.mxu0 }
  0xf1   :  { %2502 = vrsqrt.f32 %v3010_v50  ;;  %v833_v55 = vmul.f32 %v463_v53, %v463_v53  ;;  %2366 = vmatmul.mubr.bf16.vlgmr.msra.gmra.mxu1 %v1437_v51  ;;  %v991_v59 = vsel %vm990_vm9, %v2993_v9, %v989_v52  ;;  %vm1018_vm1 = vcmp.eq.f32.partialorder %v3010_v50, inf }
  0xf2   :  { %v2497_v56 = vpop.eup %2496  ;;  %v467_v57 = vpop.f32.mrf.mxu0  ;;  %v994_v5 = vsel %vm992_vm10, %v993_v62, %v991_v59  ;;  %vm1020_vm2 = vcmp.eq.f32.partialorder %v3010_v50, 0.0  ;;  %v1021_v40 = vand.u32 2147483648, %v3010_v50 }
  0xf3   :  { %v3015_v58 = vadd.f32 %v833_v55, %v765_v54  ;;  %v996_v60 = vmul.f32 %v2497_v56, %v2996_v16  ;;  %v766_v0 = vmul.f32 %v467_v57, %v467_v57 }
  0xf4   :  { %v469_v61 = vpop.f32.mrf.mxu0 }
  0xf5   :  { %2504 = vrsqrt.f32 %v3015_v58  ;;  %v834_v1 = vmul.f32 %v469_v61, %v469_v61  ;;  %v998_v2 = vsel %vm997_vm11, %v2996_v16, %v996_v60  ;;  %vm1025_vm3 = vcmp.eq.f32.partialorder %v3015_v58, inf }
  0xf6   :  { %v2499_v3 = vpop.eup %2498  ;;  %v471_v4 = vpop.f32.mrf.mxu0  ;;  %v1001_v6 = vsel %vm999_vm12, %v1000_v63, %v998_v2  ;;  %vm1027_vm4 = vcmp.eq.f32.partialorder %v3015_v58, 0.0  ;;  %v1028_v41 = vand.u32 2147483648, %v3015_v58 }
  0xf7   :  { %v3026_v7 = vadd.f32 %v834_v1, %v766_v0  ;;  %v1438_v8 = vpack.c.bf16 %v1001_v6, %v994_v5  ;;  %v1003_v9 = vmul.f32 %v2499_v3, %v2999_v29  ;;  %v767_v11 = vmul.f32 %v471_v4, %v471_v4 }
  0xf8   :  { %v473_v10 = vpop.f32.mrf.mxu0 }
  0xf9   :  { %2506 = vrsqrt.f32 %v3026_v7  ;;  %v835_v12 = vmul.f32 %v473_v10, %v473_v10  ;;  %2369 = vmatprep.mubr.bf16.mxu1 %v1438_v8  ;;  %v1005_v16 = vsel %vm1004_vm13, %v2999_v29, %v1003_v9  ;;  %vm1032_vm5 = vcmp.eq.f32.partialorder %v3026_v7, inf }
  0xfa   :  { %v2501_v13 = vpop.eup %2500  ;;  %v477_v14 = vpop.f32.mrf.mxu0  ;;  %v1008_v26 = vsel %vm1006_vm14, %v1007_v19, %v1005_v16  ;;  %vm1034_vm6 = vcmp.eq.f32.partialorder %v3026_v7, 0.0  ;;  %v1035_v61 = vand.u32 2147483648, %v3026_v7 }
  0xfb   :  { %v3031_v15 = vadd.f32 %v835_v12, %v767_v11  ;;  %v1010_v17 = vmul.f32 %v2501_v13, %v3004_v37  ;;  %v768_v21 = vmul.f32 %v477_v14, %v477_v14 }
  0xfc   :  { %v479_v18 = vpop.f32.mrf.mxu0 }
  0xfd   :  { %2508 = vrsqrt.f32 %v3031_v15  ;;  %v836_v22 = vmul.f32 %v479_v18, %v479_v18  ;;  %v1012_v23 = vsel %vm1011_vm15, %v3004_v37, %v1010_v17  ;;  %vm1039_vm7 = vcmp.eq.f32.partialorder %v3031_v15, inf }
  0xfe   :  { %v2503_v24 = vpop.eup %2502  ;;  %v481_v25 = vpop.f32.mrf.mxu0  ;;  %v1015_v27 = vsel %vm1013_vm0, %v1014_v20, %v1012_v23  ;;  %vm1041_vm8 = vcmp.eq.f32.partialorder %v3031_v15, 0.0  ;;  %v1042_v62 = vand.u32 2147483648, %v3031_v15 }
  0xff   :  { %v3042_v28 = vadd.f32 %v836_v22, %v768_v21  ;;  %v1439_v30 = vpack.c.bf16 %v1015_v27, %v1008_v26  ;;  %v1017_v29 = vmul.f32 %v2503_v24, %v3010_v50  ;;  %v769_v32 = vmul.f32 %v481_v25, %v481_v25 }
 0x100   :  { %v483_v31 = vpop.f32.mrf.mxu0 }
 0x101   :  { %2510 = vrsqrt.f32 %v3042_v28  ;;  %v837_v33 = vmul.f32 %v483_v31, %v483_v31  ;;  %2370 = vmatmul.mubr.bf16.gmra.mxu1 %v1439_v30  ;;  %v1019_v37 = vsel %vm1018_vm1, %v3010_v50, %v1017_v29  ;;  %vm1046_vm9 = vcmp.eq.f32.partialorder %v3042_v28, inf }
 0x102   :  { %v2505_v34 = vpop.eup %2504  ;;  %v487_v35 = vpop.f32.mrf.mxu0  ;;  %v1022_v47 = vsel %vm1020_vm2, %v1021_v40, %v1019_v37  ;;  %vm1048_vm10 = vcmp.eq.f32.partialorder %v3042_v28, 0.0  ;;  %v1049_v18 = vand.u32 2147483648, %v3042_v28 }
 0x103   :  { %v3047_v36 = vadd.f32 %v837_v33, %v769_v32  ;;  %v1024_v38 = vmul.f32 %v2505_v34, %v3015_v58  ;;  %v770_v42 = vmul.f32 %v487_v35, %v487_v35 }
 0x104   :  { %v489_v39 = vpop.f32.mrf.mxu0 }
 0x105   :  { %2512 = vrsqrt.f32 %v3047_v36  ;;  %v838_v43 = vmul.f32 %v489_v39, %v489_v39  ;;  %v1026_v44 = vsel %vm1025_vm3, %v3015_v58, %v1024_v38  ;;  %vm1053_vm11 = vcmp.eq.f32.partialorder %v3047_v36, inf }
 0x106   :  { %v2507_v45 = vpop.eup %2506  ;;  %v491_v46 = vpop.f32.mrf.mxu0  ;;  %v1029_v48 = vsel %vm1027_vm4, %v1028_v41, %v1026_v44  ;;  %vm1055_vm12 = vcmp.eq.f32.partialorder %v3047_v36, 0.0  ;;  %v1056_v19 = vand.u32 2147483648, %v3047_v36 }
 0x107   :  { %v3058_v49 = vadd.f32 %v838_v43, %v770_v42  ;;  %v1440_v51 = vpack.c.bf16 %v1029_v48, %v1022_v47  ;;  %v1031_v50 = vmul.f32 %v2507_v45, %v3026_v7  ;;  %v771_v53 = vmul.f32 %v491_v46, %v491_v46 }
 0x108   :  { %v493_v52 = vpop.f32.mrf.mxu0 }
 0x109   :  { %2514 = vrsqrt.f32 %v3058_v49  ;;  %v839_v54 = vmul.f32 %v493_v52, %v493_v52  ;;  %2373 = vmatprep.mubr.bf16.mxu1 %v1440_v51  ;;  %v1033_v58 = vsel %vm1032_vm5, %v3026_v7, %v1031_v50  ;;  %vm1060_vm13 = vcmp.eq.f32.partialorder %v3058_v49, inf }
 0x10a   :  { %v2509_v55 = vpop.eup %2508  ;;  %v497_v56 = vpop.f32.mrf.mxu0  ;;  %v1036_v4 = vsel %vm1034_vm6, %v1035_v61, %v1033_v58  ;;  %vm1062_vm14 = vcmp.eq.f32.partialorder %v3058_v49, 0.0  ;;  %v1063_v39 = vand.u32 2147483648, %v3058_v49 }
 0x10b   :  { %v3063_v57 = vadd.f32 %v839_v54, %v771_v53  ;;  %v1038_v59 = vmul.f32 %v2509_v55, %v3031_v15  ;;  %v772_v63 = vmul.f32 %v497_v56, %v497_v56 }
 0x10c   :  { %v499_v60 = vpop.f32.mrf.mxu0 }
 0x10d   :  { %2516 = vrsqrt.f32 %v3063_v57  ;;  %v840_v0 = vmul.f32 %v499_v60, %v499_v60  ;;  %v1040_v1 = vsel %vm1039_vm7, %v3031_v15, %v1038_v59  ;;  %vm1067_vm15 = vcmp.eq.f32.partialorder %v3063_v57, inf }
 0x10e   :  { %v2511_v2 = vpop.eup %2510  ;;  %v501_v3 = vpop.f32.mrf.mxu0  ;;  %v1043_v5 = vsel %vm1041_vm8, %v1042_v62, %v1040_v1  ;;  %vm1069_vm0 = vcmp.eq.f32.partialorder %v3063_v57, 0.0  ;;  %v1070_v40 = vand.u32 2147483648, %v3063_v57 }
 0x10f   :  { %v3074_v6 = vadd.f32 %v840_v0, %v772_v63  ;;  %v1441_v8 = vpack.c.bf16 %v1043_v5, %v1036_v4  ;;  %v1045_v7 = vmul.f32 %v2511_v2, %v3042_v28  ;;  %v773_v10 = vmul.f32 %v501_v3, %v501_v3 }
 0x110   :  { %v503_v9 = vpop.f32.mrf.mxu0 }
 0x111   :  { %2518 = vrsqrt.f32 %v3074_v6  ;;  %v841_v11 = vmul.f32 %v503_v9, %v503_v9  ;;  %2374 = vmatmul.mubr.bf16.gmra.mxu1 %v1441_v8  ;;  %v1047_v15 = vsel %vm1046_vm9, %v3042_v28, %v1045_v7  ;;  %vm1074_vm1 = vcmp.eq.f32.partialorder %v3074_v6, inf  ;;  %v3125_v7 = vpop.f32.mrf.mxu1 }
 0x112   :  { %v2513_v12 = vpop.eup %2512  ;;  %v507_v13 = vpop.f32.mrf.mxu0  ;;  %v1050_v25 = vsel %vm1048_vm10, %v1049_v18, %v1047_v15  ;;  %vm1076_vm2 = vcmp.eq.f32.partialorder %v3074_v6, 0.0  ;;  %v1077_v60 = vand.u32 2147483648, %v3074_v6 }
 0x113   :  { %v3079_v14 = vadd.f32 %v841_v11, %v773_v10  ;;  %v1052_v16 = vmul.f32 %v2513_v12, %v3047_v36  ;;  %v774_v20 = vmul.f32 %v507_v13, %v507_v13 }
 0x114   :  { %v509_v17 = vpop.f32.mrf.mxu0 }
 0x115   :  { %2520 = vrsqrt.f32 %v3079_v14  ;;  %v842_v21 = vmul.f32 %v509_v17, %v509_v17  ;;  %v1054_v22 = vsel %vm1053_vm11, %v3047_v36, %v1052_v16  ;;  %vm1081_vm3 = vcmp.eq.f32.partialorder %v3079_v14, inf  ;;  %v3134_v17 = vpop.f32.mrf.mxu1 }
 0x116   :  { %v2515_v23 = vpop.eup %2514  ;;  %v511_v24 = vpop.f32.mrf.mxu0  ;;  %v1057_v26 = vsel %vm1055_vm12, %v1056_v19, %v1054_v22  ;;  %vm1083_vm4 = vcmp.eq.f32.partialorder %v3079_v14, 0.0  ;;  %v1084_v61 = vand.u32 2147483648, %v3079_v14 }
 0x117   :  { %v3090_v27 = vadd.f32 %v842_v21, %v774_v20  ;;  %v1442_v30 = vpack.c.bf16 %v1057_v26, %v1050_v25  ;;  %v1059_v28 = vmul.f32 %v2515_v23, %v3058_v49  ;;  %v775_v31 = vmul.f32 %v511_v24, %v511_v24 }
 0x118   :  { %v513_v29 = vpop.f32.mrf.mxu0 }
 0x119   :  { %2522 = vrsqrt.f32 %v3090_v27  ;;  %v843_v32 = vmul.f32 %v513_v29, %v513_v29  ;;  %2377 = vmatprep.mubr.bf16.mxu1 %v1442_v30  ;;  %v1061_v36 = vsel %vm1060_vm13, %v3058_v49, %v1059_v28  ;;  %vm1088_vm5 = vcmp.eq.f32.partialorder %v3090_v27, inf }
 0x11a   :  { %v2517_v33 = vpop.eup %2516  ;;  %v517_v34 = vpop.f32.mrf.mxu0  ;;  %v1064_v46 = vsel %vm1062_vm14, %v1063_v39, %v1061_v36  ;;  %vm1090_vm6 = vcmp.eq.f32.partialorder %v3090_v27, 0.0  ;;  %v1091_v19 = vand.u32 2147483648, %v3090_v27 }
 0x11b   :  { %v3095_v35 = vadd.f32 %v843_v32, %v775_v31  ;;  %v1066_v37 = vmul.f32 %v2517_v33, %v3063_v57  ;;  %v776_v41 = vmul.f32 %v517_v34, %v517_v34  ;;  %v3145_v31 = vpop.f32.mrf.mxu1 }
 0x11c   :  { %v519_v38 = vpop.f32.mrf.mxu0 }
 0x11d   :  { %2524 = vrsqrt.f32 %v3095_v35  ;;  %v844_v42 = vmul.f32 %v519_v38, %v519_v38  ;;  %v1068_v43 = vsel %vm1067_vm15, %v3063_v57, %v1066_v37  ;;  %vm1095_vm7 = vcmp.eq.f32.partialorder %v3095_v35, inf }
 0x11e   :  { %v2519_v44 = vpop.eup %2518  ;;  %v521_v45 = vpop.f32.mrf.mxu0  ;;  %v1071_v47 = vsel %vm1069_vm0, %v1070_v40, %v1068_v43  ;;  %vm1097_vm8 = vcmp.eq.f32.partialorder %v3095_v35, 0.0  ;;  %v1098_v20 = vand.u32 2147483648, %v3095_v35 }
 0x11f   :  { %v3106_v48 = vadd.f32 %v844_v42, %v776_v41  ;;  %v1443_v51 = vpack.c.bf16 %v1071_v47, %v1064_v46  ;;  %v1073_v49 = vmul.f32 %v2519_v44, %v3074_v6  ;;  %v777_v52 = vmul.f32 %v521_v45, %v521_v45  ;;  %v3154_v40 = vpop.f32.mrf.mxu1 }
 0x120   :  { %v523_v50 = vpop.f32.mrf.mxu0 }
 0x121   :  { %2526 = vrsqrt.f32 %v3106_v48  ;;  %v845_v53 = vmul.f32 %v523_v50, %v523_v50  ;;  %2378 = vmatmul.mubr.bf16.gmra.mxu1 %v1443_v51  ;;  %v1075_v57 = vsel %vm1074_vm1, %v3074_v6, %v1073_v49  ;;  %vm1102_vm9 = vcmp.eq.f32.partialorder %v3106_v48, inf }
 0x122   :  { %v2521_v54 = vpop.eup %2520  ;;  %v527_v55 = vpop.f32.mrf.mxu0  ;;  %v1078_v3 = vsel %vm1076_vm2, %v1077_v60, %v1075_v57  ;;  %vm1104_vm10 = vcmp.eq.f32.partialorder %v3106_v48, 0.0  ;;  %v1105_v42 = vand.u32 2147483648, %v3106_v48 }
 0x123   :  { %v3111_v56 = vadd.f32 %v845_v53, %v777_v52  ;;  %v1080_v58 = vmul.f32 %v2521_v54, %v3079_v14  ;;  %v778_v62 = vmul.f32 %v527_v55, %v527_v55  ;;  %v3165_v54 = vpop.f32.mrf.mxu1 }
 0x124   :  { %v529_v59 = vpop.f32.mrf.mxu0 }
 0x125   :  { %2528 = vrsqrt.f32 %v3111_v56  ;;  %v846_v63 = vmul.f32 %v529_v59, %v529_v59  ;;  %v1082_v0 = vsel %vm1081_vm3, %v3079_v14, %v1080_v58  ;;  %vm1109_vm11 = vcmp.eq.f32.partialorder %v3111_v56, inf }
 0x126   :  { %v2523_v1 = vpop.eup %2522  ;;  %v531_v2 = vpop.f32.mrf.mxu0  ;;  %v1085_v4 = vsel %vm1083_vm4, %v1084_v61, %v1082_v0  ;;  %vm1111_vm12 = vcmp.eq.f32.partialorder %v3111_v56, 0.0  ;;  %v1112_v43 = vand.u32 2147483648, %v3111_v56 }
 0x127   :  { %v3122_v5 = vadd.f32 %v846_v63, %v778_v62  ;;  %v1444_v8 = vpack.c.bf16 %v1085_v4, %v1078_v3  ;;  %v1087_v6 = vmul.f32 %v2523_v1, %v3090_v27  ;;  %v779_v10 = vmul.f32 %v531_v2, %v531_v2  ;;  %v3174_v63 = vpop.f32.mrf.mxu1 }
 0x128   :  { %v533_v9 = vpop.f32.mrf.mxu0 }
 0x129   :  { %2530 = vrsqrt.f32 %v3122_v5  ;;  %v847_v11 = vmul.f32 %v533_v9, %v533_v9  ;;  %2381 = vmatprep.mubr.bf16.mxu1 %v1444_v8  ;;  %v1089_v15 = vsel %vm1088_vm5, %v3090_v27, %v1087_v6  ;;  %vm1116_vm13 = vcmp.eq.f32.partialorder %v3122_v5, inf }
 0x12a   :  { %v2525_v12 = vpop.eup %2524  ;;  %v537_v13 = vpop.f32.mrf.mxu0  ;;  %v1092_v26 = vsel %vm1090_vm6, %v1091_v19, %v1089_v15  ;;  %vm1118_vm14 = vcmp.eq.f32.partialorder %v3122_v5, 0.0  ;;  %v1119_v1 = vand.u32 2147483648, %v3122_v5 }
 0x12b   :  { %v3129_v14 = vadd.f32 %v847_v11, %v779_v10  ;;  %v1094_v16 = vmul.f32 %v2525_v12, %v3095_v35  ;;  %v780_v21 = vmul.f32 %v537_v13, %v537_v13  ;;  %v3185_v15 = vpop.f32.mrf.mxu1 }
 0x12c   :  { %v539_v18 = vpop.f32.mrf.mxu0 }
 0x12d   :  { %2532 = vrsqrt.f32 %v3129_v14  ;;  %v848_v22 = vmul.f32 %v539_v18, %v539_v18  ;;  %v1096_v23 = vsel %vm1095_vm7, %v3095_v35, %v1094_v16  ;;  %vm1123_vm15 = vcmp.eq.f32.partialorder %v3129_v14, inf }
 0x12e   :  { %v2527_v24 = vpop.eup %2526  ;;  %v541_v25 = vpop.f32.mrf.mxu0  ;;  %v1099_v30 = vsel %vm1097_vm8, %v1098_v20, %v1096_v23  ;;  %vm1125_vm0 = vcmp.eq.f32.partialorder %v3129_v14, 0.0  ;;  %v1126_v2 = vand.u32 2147483648, %v3129_v14 }
 0x12f   :  { %v3142_v28 = vadd.f32 %v848_v22, %v780_v21  ;;  %v1445_v29 = vpack.c.bf16 %v1099_v30, %v1092_v26  ;;  %v1101_v27 = vmul.f32 %v2527_v24, %v3106_v48  ;;  %v781_v33 = vmul.f32 %v541_v25, %v541_v25  ;;  %v3194_v24 = vpop.f32.mrf.mxu1 }
 0x130   :  { %v543_v32 = vpop.f32.mrf.mxu0 }
 0x131   :  { %2534 = vrsqrt.f32 %v3142_v28  ;;  %v849_v34 = vmul.f32 %v543_v32, %v543_v32  ;;  %2382 = vmatmul.mubr.bf16.gmra.mxu1 %v1445_v29  ;;  %v1103_v38 = vsel %vm1102_vm9, %v3106_v48, %v1101_v27  ;;  %vm1130_vm1 = vcmp.eq.f32.partialorder %v3142_v28, inf }
 0x132   :  { %v2529_v36 = vpop.eup %2528  ;;  %v547_v37 = vpop.f32.mrf.mxu0  ;;  %v1106_v49 = vsel %vm1104_vm10, %v1105_v42, %v1103_v38  ;;  %vm1132_vm2 = vcmp.eq.f32.partialorder %v3142_v28, 0.0  ;;  %v1133_v26 = vand.u32 2147483648, %v3142_v28 }
 0x133   :  { %v3149_v35 = vadd.f32 %v849_v34, %v781_v33  ;;  %v1108_v39 = vmul.f32 %v2529_v36, %v3111_v56  ;;  %v782_v44 = vmul.f32 %v547_v37, %v547_v37 }
 0x134   :  { %v549_v41 = vpop.f32.mrf.mxu0 }
 0x135   :  { %2536 = vrsqrt.f32 %v3149_v35  ;;  %v850_v45 = vmul.f32 %v549_v41, %v549_v41  ;;  %v1110_v46 = vsel %vm1109_vm11, %v3111_v56, %v1108_v39  ;;  %vm1137_vm3 = vcmp.eq.f32.partialorder %v3149_v35, inf  ;;  %v3205_v41 = vpop.f32.mrf.mxu1 }
 0x136   :  { %v2531_v47 = vpop.eup %2530  ;;  %v551_v51 = vpop.f32.mrf.mxu0  ;;  %v1113_v50 = vsel %vm1111_vm12, %v1112_v43, %v1110_v46  ;;  %vm1139_vm4 = vcmp.eq.f32.partialorder %v3149_v35, 0.0  ;;  %v1140_v30 = vand.u32 2147483648, %v3149_v35 }
 0x137   :  { %v3162_v52 = vadd.f32 %v850_v45, %v782_v44  ;;  %v1446_v53 = vpack.c.bf16 %v1113_v50, %v1106_v49  ;;  %v1115_v48 = vmul.f32 %v2531_v47, %v3122_v5  ;;  %v783_v57 = vmul.f32 %v551_v51, %v551_v51  ;;  %v3214_v49 = vpop.f32.mrf.mxu1 }
 0x138   :  { %v553_v55 = vpop.f32.mrf.mxu0 }
 0x139   :  { %2538 = vrsqrt.f32 %v3162_v52  ;;  %v851_v58 = vmul.f32 %v553_v55, %v553_v55  ;;  %2385 = vmatprep.mubr.bf16.mxu1 %v1446_v53  ;;  %v1117_v61 = vsel %vm1116_vm13, %v3122_v5, %v1115_v48  ;;  %vm1144_vm5 = vcmp.eq.f32.partialorder %v3162_v52, inf }
 0x13a   :  { %v2533_v59 = vpop.eup %2532  ;;  %v557_v60 = vpop.f32.mrf.mxu0  ;;  %v1120_v10 = vsel %vm1118_vm14, %v1119_v1, %v1117_v61  ;;  %vm1146_vm6 = vcmp.eq.f32.partialorder %v3162_v52, 0.0  ;;  %v1147_v53 = vand.u32 2147483648, %v3162_v52 }
 0x13b   :  { %v3169_v56 = vadd.f32 %v851_v58, %v783_v57  ;;  %v1122_v62 = vmul.f32 %v2533_v59, %v3129_v14  ;;  %v784_v3 = vmul.f32 %v557_v60, %v557_v60 }
 0x13c   :  { %v559_v0 = vpop.f32.mrf.mxu0 }
 0x13d   :  { %2540 = vrsqrt.f32 %v3169_v56  ;;  %v852_v4 = vmul.f32 %v559_v0, %v559_v0  ;;  %v1124_v8 = vsel %vm1123_vm15, %v3129_v14, %v1122_v62  ;;  %vm1151_vm7 = vcmp.eq.f32.partialorder %v3169_v56, inf }
 0x13e   :  { %v2535_v6 = vpop.eup %2534  ;;  %v561_v9 = vpop.f32.mrf.mxu0  ;;  %v1127_v11 = vsel %vm1125_vm0, %v1126_v2, %v1124_v8  ;;  %vm1153_vm8 = vcmp.eq.f32.partialorder %v3169_v56, 0.0  ;;  %v1154_v48 = vand.u32 2147483648, %v3169_v56 }
 0x13f   :  { %v3182_v12 = vadd.f32 %v852_v4, %v784_v3  ;;  %v1447_v13 = vpack.c.bf16 %v1127_v11, %v1120_v10  ;;  %v1129_v5 = vmul.f32 %v2535_v6, %v3142_v28  ;;  %v785_v18 = vmul.f32 %v561_v9, %v561_v9  ;;  %v3225_v2 = vpop.f32.mrf.mxu1 }
 0x140   :  { %v563_v16 = vpop.f32.mrf.mxu0 }
 0x141   :  { %2542 = vrsqrt.f32 %v3182_v12  ;;  %v853_v19 = vmul.f32 %v563_v16, %v563_v16  ;;  %2386 = vmatmul.mubr.bf16.gmra.mxu1 %v1447_v13  ;;  %v1131_v22 = vsel %vm1130_vm1, %v3142_v28, %v1129_v5  ;;  %vm1158_vm9 = vcmp.eq.f32.partialorder %v3182_v12, inf  ;;  %v3234_v13 = vpop.f32.mrf.mxu1 }
 0x142   :  { %v2537_v20 = vpop.eup %2536  ;;  %v567_v21 = vpop.f32.mrf.mxu0  ;;  %v1134_v36 = vsel %vm1132_vm2, %v1133_v26, %v1131_v22  ;;  %vm1160_vm10 = vcmp.eq.f32.partialorder %v3182_v12, 0.0  ;;  %v1161_v16 = vand.u32 2147483648, %v3182_v12 }
 0x143   :  { %v3189_v14 = vadd.f32 %v853_v19, %v785_v18  ;;  %v1136_v23 = vmul.f32 %v2537_v20, %v3149_v35  ;;  %v786_v29 = vmul.f32 %v567_v21, %v567_v21 }
 0x144   :  { %v569_v25 = vpop.f32.mrf.mxu0 }
 0x145   :  { %2544 = vrsqrt.f32 %v3189_v14  ;;  %v854_v27 = vmul.f32 %v569_v25, %v569_v25  ;;  %v1138_v32 = vsel %vm1137_vm3, %v3149_v35, %v1136_v23  ;;  %vm1165_vm11 = vcmp.eq.f32.partialorder %v3189_v14, inf }
 0x146   :  { %v2539_v33 = vpop.eup %2538  ;;  %v571_v34 = vpop.f32.mrf.mxu0  ;;  %v1141_v37 = vsel %vm1139_vm4, %v1140_v30, %v1138_v32  ;;  %vm1167_vm12 = vcmp.eq.f32.partialorder %v3189_v14, 0.0  ;;  %v1168_v18 = vand.u32 2147483648, %v3189_v14 }
 0x147   :  { %v3202_v38 = vadd.f32 %v854_v27, %v786_v29  ;;  %v1448_v39 = vpack.c.bf16 %v1141_v37, %v1134_v36  ;;  %v1143_v28 = vmul.f32 %v2539_v33, %v3162_v52  ;;  %v787_v43 = vmul.f32 %v571_v34, %v571_v34  ;;  %v3245_v27 = vpop.f32.mrf.mxu1 }
 0x148   :  { %v573_v42 = vpop.f32.mrf.mxu0 }
 0x149   :  { %2546 = vrsqrt.f32 %v3202_v38  ;;  %v855_v44 = vmul.f32 %v573_v42, %v573_v42  ;;  %2389 = vmatprep.mubr.bf16.mxu1 %v1448_v39  ;;  %v1145_v47 = vsel %vm1144_vm5, %v3162_v52, %v1143_v28  ;;  %vm1172_vm13 = vcmp.eq.f32.partialorder %v3202_v38, inf  ;;  %v3254_v42 = vpop.f32.mrf.mxu1 }
 0x14a   :  { %v2541_v45 = vpop.eup %2540  ;;  %v577_v46 = vpop.f32.mrf.mxu0  ;;  %v1148_v61 = vsel %vm1146_vm6, %v1147_v53, %v1145_v47  ;;  %vm1174_vm14 = vcmp.eq.f32.partialorder %v3202_v38, 0.0 }
 0x14b   :  { %v3209_v35 = vadd.f32 %v855_v44, %v787_v43  ;;  %v1150_v51 = vmul.f32 %v2541_v45, %v3169_v56  ;;  %v788_v55 = vmul.f32 %v577_v46, %v577_v46  ;;  %v1175_v44 = vand.u32 2147483648, %v3202_v38 }
 0x14c   :  { %v579_v50 = vpop.f32.mrf.mxu0 }
 0x14d   :  { %2548 = vrsqrt.f32 %v3209_v35  ;;  %v856_v57 = vmul.f32 %v579_v50, %v579_v50  ;;  %v1152_v58 = vsel %vm1151_vm7, %v3169_v56, %v1150_v51  ;;  %vm1179_vm15 = vcmp.eq.f32.partialorder %v3209_v35, inf }
 0x14e   :  { %v2543_v59 = vpop.eup %2542  ;;  %v581_v60 = vpop.f32.mrf.mxu0  ;;  %v1155_v62 = vsel %vm1153_vm8, %v1154_v48, %v1152_v58  ;;  %vm1181_vm0 = vcmp.eq.f32.partialorder %v3209_v35, 0.0  ;;  %v1182_v45 = vand.u32 2147483648, %v3209_v35 }
 0x14f   :  { %v3222_v0 = vadd.f32 %v856_v57, %v788_v55  ;;  %v1449_v1 = vpack.c.bf16 %v1155_v62, %v1148_v61  ;;  %v1157_v52 = vmul.f32 %v2543_v59, %v3182_v12  ;;  %v789_v4 = vmul.f32 %v581_v60, %v581_v60  ;;  %v3265_v59 = vpop.f32.mrf.mxu1 }
 0x150   :  { %v583_v3 = vpop.f32.mrf.mxu0 }
 0x151   :  { %2550 = vrsqrt.f32 %v3222_v0  ;;  %v857_v8 = vmul.f32 %v583_v3, %v583_v3  ;;  %2390 = vmatmul.mubr.bf16.gmra.mxu1 %v1449_v1  ;;  %v1159_v10 = vsel %vm1158_vm9, %v3182_v12, %v1157_v52  ;;  %vm1186_vm1 = vcmp.eq.f32.partialorder %v3222_v0, inf }
 0x152   :  { %v2545_v6 = vpop.eup %2544  ;;  %v587_v9 = vpop.f32.mrf.mxu0  ;;  %v1162_v25 = vsel %vm1160_vm10, %v1161_v16, %v1159_v10  ;;  %vm1188_vm2 = vcmp.eq.f32.partialorder %v3222_v0, 0.0 }
 0x153   :  { %v3229_v56 = vadd.f32 %v857_v8, %v789_v4  ;;  %v1164_v11 = vmul.f32 %v2545_v6, %v3189_v14  ;;  %v790_v19 = vmul.f32 %v587_v9, %v587_v9  ;;  %v3274_v8 = vpop.f32.mrf.mxu1  ;;  %v1189_v9 = vand.u32 2147483648, %v3222_v0 }
 0x154   :  { %v589_v5 = vpop.f32.mrf.mxu0 }
 0x155   :  { %2552 = vrsqrt.f32 %v3229_v56  ;;  %v858_v20 = vmul.f32 %v589_v5, %v589_v5  ;;  %v1166_v21 = vsel %vm1165_vm11, %v3189_v14, %v1164_v11  ;;  %vm1193_vm3 = vcmp.eq.f32.partialorder %v3229_v56, inf }
 0x156   :  { %v2547_v22 = vpop.eup %2546  ;;  %v591_v23 = vpop.f32.mrf.mxu0  ;;  %v1169_v26 = vsel %vm1167_vm12, %v1168_v18, %v1166_v21  ;;  %vm1195_vm4 = vcmp.eq.f32.partialorder %v3229_v56, 0.0  ;;  %v1196_v10 = vand.u32 2147483648, %v3229_v56 }
 0x157   :  { %v3242_v30 = vadd.f32 %v858_v20, %v790_v19  ;;  %v1450_v29 = vpack.c.bf16 %v1169_v26, %v1162_v25  ;;  %v1171_v12 = vmul.f32 %v2547_v22, %v3202_v38  ;;  %v791_v33 = vmul.f32 %v591_v23, %v591_v23  ;;  %v3285_v25 = vpop.f32.mrf.mxu1 }
 0x158   :  { %v593_v32 = vpop.f32.mrf.mxu0 }
 0x159   :  { %2554 = vrsqrt.f32 %v3242_v30  ;;  %v859_v34 = vmul.f32 %v593_v32, %v593_v32  ;;  %2393 = vmatprep.mubr.bf16.mxu1 %v1450_v29  ;;  %v1173_v39 = vsel %vm1172_vm13, %v3202_v38, %v1171_v12  ;;  %vm1200_vm5 = vcmp.eq.f32.partialorder %v3242_v30, inf }
 0x15a   :  { %v2549_v36 = vpop.eup %2548  ;;  %v597_v37 = vpop.f32.mrf.mxu0  ;;  %v1176_v48 = vsel %vm1174_vm14, %v1175_v44, %v1173_v39  ;;  %vm1202_vm6 = vcmp.eq.f32.partialorder %v3242_v30, 0.0 }
 0x15b   :  { %v3249_v14 = vadd.f32 %v859_v34, %v791_v33  ;;  %v1178_v28 = vmul.f32 %v2549_v36, %v3209_v35  ;;  %v792_v46 = vmul.f32 %v597_v37, %v597_v37  ;;  %v3294_v37 = vpop.f32.mrf.mxu1 }
 0x15c   :  { %v599_v43 = vpop.f32.mrf.mxu0 }
 0x15d   :  { %2556 = vrsqrt.f32 %v3249_v14  ;;  %v860_v47 = vmul.f32 %v599_v43, %v599_v43  ;;  %v1180_v51 = vsel %vm1179_vm15, %v3209_v35, %v1178_v28  ;;  %v1203_v28 = vand.u32 2147483648, %v3242_v30 }
 0x15e   :  { %v2551_v50 = vpop.eup %2550  ;;  %v601_v53 = vpop.f32.mrf.mxu0  ;;  %v1183_v55 = vsel %vm1181_vm0, %v1182_v45, %v1180_v51  ;;  %vm1207_vm7 = vcmp.eq.f32.partialorder %v3249_v14, inf  ;;  %vm1209_vm8 = vcmp.eq.f32.partialorder %v3249_v14, 0.0  ;;  %v1210_v43 = vand.u32 2147483648, %v3249_v14 }
 0x15f   :  { %v3262_v57 = vadd.f32 %v860_v47, %v792_v46  ;;  %v1451_v58 = vpack.c.bf16 %v1183_v55, %v1176_v48  ;;  %v1185_v38 = vmul.f32 %v2551_v50, %v3222_v0  ;;  %v793_v61 = vmul.f32 %v601_v53, %v601_v53 }
 0x160   :  { %v603_v60 = vpop.f32.mrf.mxu0  ;;  %v808_v51 = vmul.f32 %v3125_v7, %v3125_v7  ;;  %v876_v50 = vmul.f32 %v3134_v17, %v3134_v17 }
 0x161   :  { %2558 = vrsqrt.f32 %v3262_v57  ;;  %v861_v62 = vmul.f32 %v603_v60, %v603_v60  ;;  %2394 = vmatmul.mubr.bf16.gmra.mxu1 %v1451_v58  ;;  %v1187_v3 = vsel %vm1186_vm1, %v3222_v0, %v1185_v38  ;;  %vm1214_vm9 = vcmp.eq.f32.partialorder %v3262_v57, inf }
 0x162   :  { %v2553_v1 = vpop.eup %2552  ;;  %v607_v52 = vpop.f32.mrf.mxu0  ;;  %v1190_v20 = vsel %vm1188_vm2, %v1189_v9, %v1187_v3  ;;  %v3314_v17 = vadd.f32 %v876_v50, %v808_v51  ;;  %vm1216_vm10 = vcmp.eq.f32.partialorder %v3262_v57, 0.0 }
 0x163   :  { %v3269_v35 = vadd.f32 %v861_v62, %v793_v61  ;;  %v1192_v4 = vmul.f32 %v2553_v1, %v3229_v56  ;;  %v794_v11 = vmul.f32 %v607_v52, %v607_v52  ;;  %v3311_v61 = vpop.f32.mrf.mxu1  ;;  %v877_v52 = vmul.f32 %v3154_v40, %v3154_v40 }
 0x164   :  { %v609_v6 = vpop.f32.mrf.mxu0 }
 0x165   :  { %2560 = vrsqrt.f32 %v3269_v35  ;;  %v862_v5 = vmul.f32 %v609_v6, %v609_v6  ;;  %v1194_v16 = vsel %vm1193_vm3, %v3229_v56, %v1192_v4  ;;  %vm1221_vm11 = vcmp.eq.f32.partialorder %v3269_v35, inf }
 0x166   :  { %v2555_v18 = vpop.eup %2554  ;;  %v611_v19 = vpop.f32.mrf.mxu0  ;;  %v1197_v21 = vsel %vm1195_vm4, %v1196_v10, %v1194_v16  ;;  %vm1223_vm12 = vcmp.eq.f32.partialorder %v3269_v35, 0.0 }
 0x167   :  { %v3282_v22 = vadd.f32 %v862_v5, %v794_v11  ;;  %v1452_v23 = vpack.c.bf16 %v1197_v21, %v1190_v20  ;;  %v1199_v0 = vmul.f32 %v2555_v18, %v3242_v30  ;;  %v795_v29 = vmul.f32 %v611_v19, %v611_v19  ;;  %v3326_v10 = vpop.f32.mrf.mxu1 }
 0x168   :  { %v613_v26 = vpop.f32.mrf.mxu0  ;;  %v1217_v5 = vand.u32 2147483648, %v3262_v57 }
 0x169   :  { %2562 = vrsqrt.f32 %v3282_v22  ;;  %v863_v12 = vmul.f32 %v613_v26, %v613_v26  ;;  %2397 = vmatprep.mubr.bf16.mxu1 %v1452_v23  ;;  %v1201_v34 = vsel %vm1200_vm5, %v3242_v30, %v1199_v0  ;;  %v809_v30 = vmul.f32 %v3145_v31, %v3145_v31 }
 0x16a   :  { %v2557_v32 = vpop.eup %2556  ;;  %v617_v33 = vpop.f32.mrf.mxu0  ;;  %v1204_v48 = vsel %vm1202_vm6, %v1203_v28, %v1201_v34  ;;  %v1224_v31 = vand.u32 2147483648, %v3269_v35  ;;  %v811_v28 = vmul.f32 %v3185_v15, %v3185_v15  ;;  %vm1228_vm13 = vcmp.eq.f32.partialorder %v3282_v22, inf }
 0x16b   :  { %v3289_v56 = vadd.f32 %v863_v12, %v795_v29  ;;  %v1206_v36 = vmul.f32 %v2557_v32, %v3249_v14  ;;  %v796_v44 = vmul.f32 %v617_v33, %v617_v33  ;;  %v3337_v29 = vpop.f32.mrf.mxu1  ;;  %v3340_v12 = vadd.f32 %v877_v52, %v809_v30 }
 0x16c   :  { %v619_v39 = vpop.f32.mrf.mxu0  ;;  %v810_v33 = vmul.f32 %v3165_v54, %v3165_v54  ;;  %vm1230_vm14 = vcmp.eq.f32.partialorder %v3282_v22, 0.0  ;;  %v1231_v51 = vand.u32 2147483648, %v3282_v22  ;;  %vm1326_vm5 = vcmp.eq.f32.partialorder %v3314_v17, inf }
 0x16d   :  { %2564 = vrsqrt.f32 %v3289_v56  ;;  %v864_v45 = vmul.f32 %v619_v39, %v619_v39  ;;  %v1208_v46 = vsel %vm1207_vm7, %v3249_v14, %v1206_v36  ;;  %v878_v39 = vmul.f32 %v3174_v63, %v3174_v63 }
 0x16e   :  { %v2559_v47 = vpop.eup %2558  ;;  %v621_v53 = vpop.f32.mrf.mxu0  ;;  %v1211_v55 = vsel %vm1209_vm8, %v1210_v43, %v1208_v46  ;;  %v879_v43 = vmul.f32 %v3194_v24, %v3194_v24  ;;  %vm1235_vm15 = vcmp.eq.f32.partialorder %v3289_v56, inf  ;;  %vm1237_vm0 = vcmp.eq.f32.partialorder %v3289_v56, 0.0 }
 0x16f   :  { %v3308_v58 = vadd.f32 %v864_v45, %v796_v44  ;;  %v1453_v38 = vpack.c.bf16 %v1211_v55, %v1204_v48  ;;  %v1213_v60 = vmul.f32 %v2559_v47, %v3262_v57  ;;  %v797_v62 = vmul.f32 %v621_v53, %v621_v53  ;;  %v3357_v47 = vpop.f32.mrf.mxu1 }
 0x170   :  { %v623_v14 = vpop.f32.mrf.mxu0  ;;  %v1238_v15 = vand.u32 2147483648, %v3289_v56  ;;  %v3373_v30 = vadd.f32 %v879_v43, %v811_v28 }
 0x171   :  { %2566 = vrsqrt.f32 %v3308_v58  ;;  %v865_v7 = vmul.f32 %v623_v14, %v623_v14  ;;  %2398 = vmatmul.mubr.bf16.gmra.mxu1 %v1453_v38  ;;  %v1215_v6 = vsel %vm1214_vm9, %v3262_v57, %v1213_v60  ;;  %vm1242_vm1 = vcmp.eq.f32.partialorder %v3308_v58, inf }
 0x172   :  { %v2561_v1 = vpop.eup %2560  ;;  %v627_v3 = vpop.f32.mrf.mxu0  ;;  %v1218_v21 = vsel %vm1216_vm10, %v1217_v5, %v1215_v6  ;;  %v813_v5 = vmul.f32 %v3225_v2, %v3225_v2  ;;  %vm1244_vm2 = vcmp.eq.f32.partialorder %v3308_v58, 0.0 }
 0x173   :  { %v3321_v4 = vadd.f32 %v865_v7, %v797_v62  ;;  %v1220_v9 = vmul.f32 %v2561_v1, %v3269_v35  ;;  %v798_v40 = vmul.f32 %v627_v3, %v627_v3  ;;  %v3368_v7 = vpop.f32.mrf.mxu1  ;;  %v3371_v1 = vadd.f32 %v878_v39, %v810_v33 }
 0x174   :  { %v629_v11 = vpop.f32.mrf.mxu0  ;;  %v882_v33 = vmul.f32 %v3254_v42, %v3254_v42 }
 0x175   :  { %2568 = vrsqrt.f32 %v3321_v4  ;;  %v866_v16 = vmul.f32 %v629_v11, %v629_v11  ;;  %v1222_v18 = vsel %vm1221_vm11, %v3269_v35, %v1220_v9  ;;  %v880_v11 = vmul.f32 %v3214_v49, %v3214_v49 }
 0x176   :  { %v2563_v19 = vpop.eup %2562  ;;  %v631_v20 = vpop.f32.mrf.mxu0  ;;  %v1225_v23 = vsel %vm1223_vm12, %v1224_v31, %v1222_v18  ;;  %2570 = vrsqrt.f32 %v3314_v17  ;;  %v881_v31 = vmul.f32 %v3234_v13, %v3234_v13  ;;  %vm1249_vm3 = vcmp.eq.f32.partialorder %v3321_v4, inf }
 0x177   :  { %v3334_v0 = vadd.f32 %v866_v16, %v798_v40  ;;  %v1454_v26 = vpack.c.bf16 %v1225_v23, %v1218_v21  ;;  %v1227_v57 = vmul.f32 %v2563_v19, %v3282_v22  ;;  %v799_v35 = vmul.f32 %v631_v20, %v631_v20  ;;  %v3390_v19 = vpop.f32.mrf.mxu1 }
 0x178   :  { %v633_v32 = vpop.f32.mrf.mxu0  ;;  %v1245_v20 = vand.u32 2147483648, %v3308_v58  ;;  %vm1251_vm4 = vcmp.eq.f32.partialorder %v3321_v4, 0.0  ;;  %v1252_v2 = vand.u32 2147483648, %v3321_v4 }
 0x179   :  { %2572 = vrsqrt.f32 %v3334_v0  ;;  %v867_v34 = vmul.f32 %v633_v32, %v633_v32  ;;  %2401 = vmatprep.mubr.bf16.mxu1 %v1454_v26  ;;  %v1229_v54 = vsel %vm1228_vm13, %v3282_v22, %v1227_v57  ;;  %v814_v32 = vmul.f32 %v3245_v27, %v3245_v27 }
 0x17a   :  { %v2565_v36 = vpop.eup %2564  ;;  %v637_v44 = vpop.f32.mrf.mxu0  ;;  %v1232_v38 = vsel %vm1230_vm14, %v1231_v51, %v1229_v54  ;;  %vm1256_vm6 = vcmp.eq.f32.partialorder %v3334_v0, inf  ;;  %vm1258_vm7 = vcmp.eq.f32.partialorder %v3334_v0, 0.0  ;;  %vm1328_vm14 = vcmp.eq.f32.partialorder %v3314_v17, 0.0 }
 0x17b   :  { %v3352_v45 = vadd.f32 %v867_v34, %v799_v35  ;;  %v1234_v46 = vmul.f32 %v2565_v36, %v3289_v56  ;;  %v800_v24 = vmul.f32 %v637_v44, %v637_v44  ;;  %v3413_v44 = vadd.f32 %v881_v31, %v813_v5 }
 0x17c   :  { %v639_v63 = vpop.f32.mrf.mxu0  ;;  %v3418_v51 = vadd.f32 %v882_v33, %v814_v32 }
 0x17d   :  { %2574 = vrsqrt.f32 %v3352_v45  ;;  %v868_v50 = vmul.f32 %v639_v63, %v639_v63  ;;  %v1236_v53 = vsel %vm1235_vm15, %v3289_v56, %v1234_v46  ;;  %v812_v56 = vmul.f32 %v3205_v41, %v3205_v41 }
 0x17e   :  { %v2567_v48 = vpop.eup %2566  ;;  %v641_v55 = vpop.f32.mrf.mxu0  ;;  %v1239_v60 = vsel %vm1237_vm0, %v1238_v15, %v1236_v53  ;;  %2576 = vrsqrt.f32 %v3340_v12  ;;  %v815_v15 = vmul.f32 %v3265_v59, %v3265_v59  ;;  %vm1263_vm8 = vcmp.eq.f32.partialorder %v3352_v45, inf }
 0x17f   :  { %v3365_v14 = vadd.f32 %v868_v50, %v800_v24  ;;  %v1455_v62 = vpack.c.bf16 %v1239_v60, %v1232_v38  ;;  %v1241_v22 = vmul.f32 %v2567_v48, %v3308_v58  ;;  %v801_v3 = vmul.f32 %v641_v55, %v641_v55 }
 0x180   :  { %v643_v52 = vpop.f32.mrf.mxu0  ;;  %v3411_v27 = vadd.f32 %v880_v11, %v812_v56  ;;  %v883_v24 = vmul.f32 %v3274_v8, %v3274_v8  ;;  %vm1265_vm9 = vcmp.eq.f32.partialorder %v3352_v45, 0.0  ;;  %v1266_v59 = vand.u32 2147483648, %v3352_v45 }
 0x181   :  { %2578 = vrsqrt.f32 %v3365_v14  ;;  %v869_v6 = vmul.f32 %v643_v52, %v643_v52  ;;  %2402 = vmatmul.mubr.bf16.gmra.mxu1 %v1455_v62  ;;  %v1243_v41 = vsel %vm1242_vm1, %v3308_v58, %v1241_v22  ;;  %v1259_v62 = vand.u32 2147483648, %v3334_v0 }
 0x182   :  { %v2569_v9 = vpop.eup %2568  ;;  %v647_v40 = vpop.f32.mrf.mxu0  ;;  %v1246_v34 = vsel %vm1244_vm2, %v1245_v20, %v1243_v41  ;;  %v884_v20 = vmul.f32 %v3294_v37, %v3294_v37  ;;  %vm1270_vm10 = vcmp.eq.f32.partialorder %v3365_v14, inf  ;;  %vm1272_vm11 = vcmp.eq.f32.partialorder %v3365_v14, 0.0 }
 0x183   :  { %v3385_v16 = vadd.f32 %v869_v6, %v801_v3  ;;  %v1248_v18 = vmul.f32 %v2569_v9, %v3321_v4  ;;  %v2571_v13 = vpop.eup %2570  ;;  %v802_v21 = vmul.f32 %v647_v40, %v647_v40  ;;  %vm1333_vm15 = vcmp.eq.f32.partialorder %v3340_v12, inf }
 0x184   :  { %v649_v49 = vpop.f32.mrf.mxu0  ;;  %v1325_v58 = vmul.f32 %v2571_v13, %v3314_v17  ;;  %vm1335_vm1 = vcmp.eq.f32.partialorder %v3340_v12, 0.0 }
 0x185   :  { %2580 = vrsqrt.f32 %v3385_v16  ;;  %v870_v23 = vmul.f32 %v649_v49, %v649_v49  ;;  %v1250_v26 = vsel %vm1249_vm3, %v3321_v4, %v1248_v18  ;;  %v3408_v4 = vpop.f32.mrf.mxu1  ;;  %v816_v18 = vmul.f32 %v3285_v25, %v3285_v25 }
 0x186   :  { %v2573_v57 = vpop.eup %2572  ;;  %v651_v35 = vpop.f32.mrf.mxu0  ;;  %v1253_v36 = vsel %vm1251_vm4, %v1252_v2, %v1250_v26  ;;  %2582 = vrsqrt.f32 %v3371_v1  ;;  %v885_v25 = vmul.f32 %v3326_v10, %v3326_v10  ;;  %vm1277_vm12 = vcmp.eq.f32.partialorder %v3385_v16, inf }
 0x187   :  { %v3405_v39 = vadd.f32 %v870_v23, %v802_v21  ;;  %v1456_v28 = vpack.c.bf16 %v1253_v36, %v1246_v34  ;;  %v1255_v43 = vmul.f32 %v2573_v57, %v3334_v0  ;;  %2584 = vrsqrt.f32 %v3373_v30  ;;  %v3430_v38 = vpop.f32.mrf.mxu1 }
 0x188   :  { %v653_v42 = vpop.f32.mrf.mxu0  ;;  %v803_v54 = vmul.f32 %v651_v35, %v651_v35  ;;  %v817_v23 = vmul.f32 %v3311_v61, %v3311_v61  ;;  %v1273_v36 = vand.u32 2147483648, %v3365_v14  ;;  %vm1279_vm13 = vcmp.eq.f32.partialorder %v3385_v16, 0.0 }
 0x189   :  { %2586 = vrsqrt.f32 %v3405_v39  ;;  %v871_v46 = vmul.f32 %v653_v42, %v653_v42  ;;  %2405 = vmatprep.mubr.bf16.mxu1 %v1456_v28  ;;  %v1257_v48 = vsel %vm1256_vm6, %v3334_v0, %v1255_v43  ;;  %v3444_v40 = vpop.f32.mrf.mxu1  ;;  %v3455_v0 = vsel %vm1326_vm5, %v3314_v17, %v1325_v58 }
 0x18a   :  { %v2575_v63 = vpop.eup %2574  ;;  %v657_v50 = vpop.f32.mrf.mxu0  ;;  %v1260_v9 = vsel %vm1258_vm7, %v1259_v62, %v1257_v48  ;;  %v1280_v10 = vand.u32 2147483648, %v3385_v16  ;;  %vm1284_vm0 = vcmp.eq.f32.partialorder %v3405_v39, inf  ;;  %vm1286_vm3 = vcmp.eq.f32.partialorder %v3405_v39, 0.0 }
 0x18b   :  { %v3425_v53 = vadd.f32 %v871_v46, %v803_v54  ;;  %v1262_v55 = vmul.f32 %v2575_v63, %v3352_v45  ;;  %v2577_v8 = vpop.eup %2576  ;;  %v804_v22 = vmul.f32 %v657_v50, %v657_v50  ;;  %v743_v35 = vpop.f32.mrf.mxu1  ;;  %v818_v46 = vmul.f32 %v3337_v29, %v3337_v29 }
 0x18c   :  { %v659_v60 = vpop.f32.mrf.mxu0  ;;  %v1332_v57 = vmul.f32 %v2577_v8, %v3340_v12  ;;  %v886_v63 = vmul.f32 %v3357_v47, %v3357_v47  ;;  %v3493_v29 = vadd.f32 %v884_v20, %v816_v18  ;;  %v3495_v47 = vadd.f32 %v885_v25, %v817_v23 }
 0x18d   :  { %2588 = vrsqrt.f32 %v3425_v53  ;;  %v872_v52 = vmul.f32 %v659_v60, %v659_v60  ;;  %v1264_v56 = vsel %vm1263_vm8, %v3352_v45, %v1262_v55  ;;  %v3448_v45 = vadd.f32 %v883_v24, %v815_v15  ;;  %v747_v60 = vpop.f32.mrf.mxu1 }
 0x18e   :  { %v2579_v3 = vpop.eup %2578  ;;  %2590 = vrsqrt.f32 %v3411_v27  ;;  %v661_v6 = vpop.f32.mrf.mxu0  ;;  %v1267_v11 = vsel %vm1265_vm9, %v1266_v59, %v1264_v56  ;;  %v819_v59 = vmul.f32 %v3368_v7, %v3368_v7  ;;  %v3501_v56 = vadd.f32 %v886_v63, %v818_v46 }
 0x18f   :  { %2592 = vrsqrt.f32 %v3413_v44  ;;  %v3442_v5 = vadd.f32 %v872_v52, %v804_v22  ;;  %v1457_v31 = vpack.c.bf16 %v1267_v11, %v1260_v9  ;;  %v1269_v41 = vmul.f32 %v2579_v3, %v3365_v14  ;;  %v749_v7 = vpop.f32.mrf.mxu1 }
 0x190   :  { %2594 = vrsqrt.f32 %v3418_v51  ;;  %v663_v49 = vpop.f32.mrf.mxu0  ;;  %v805_v2 = vmul.f32 %v661_v6, %v661_v6  ;;  %v887_v3 = vmul.f32 %v3390_v19, %v3390_v19  ;;  %v1334_v6 = vsel %vm1333_vm15, %v3340_v12, %v1332_v57 }
 0x191   :  { %2596 = vrsqrt.f32 %v3442_v5  ;;  %v873_v13 = vmul.f32 %v663_v49, %v663_v49  ;;  %2406 = vmatmul.mubr.bf16.gmra.mxu1 %v1457_v31  ;;  %v1271_v37 = vsel %vm1270_vm10, %v3365_v14, %v1269_v41  ;;  %v1329_v14 = vand.u32 2147483648, %v3314_v17 }
 0x192   :  { %v2581_v21 = vpop.eup %2580  ;;  %v667_v26 = vpop.f32.mrf.mxu0  ;;  %v1274_v24 = vsel %vm1272_vm11, %v1273_v36, %v1271_v37  ;;  %v1287_v49 = vand.u32 2147483648, %v3405_v39  ;;  %vm1291_vm2 = vcmp.eq.f32.partialorder %v3425_v53, inf  ;;  %v1294_v19 = vand.u32 2147483648, %v3425_v53 }
 0x193   :  { %v3466_v32 = vadd.f32 %v873_v13, %v805_v2  ;;  %v1276_v33 = vmul.f32 %v2581_v21, %v3385_v16  ;;  %v3471_v34 = vpop.eup %2582  ;;  %v806_v43 = vmul.f32 %v667_v26, %v667_v26  ;;  %v1336_v20 = vand.u32 2147483648, %v3340_v12 }
 0x194   :  { %v669_v61 = vpop.f32.mrf.mxu0  ;;  %v3477_v28 = vpop.eup %2584  ;;  %vm1293_vm4 = vcmp.eq.f32.partialorder %v3425_v53, 0.0  ;;  %v820_v23 = vmul.f32 %v3408_v4, %v3408_v4  ;;  %v888_v25 = vmul.f32 %v3430_v38, %v3430_v38  ;;  %v821_v37 = vmul.f32 %v3444_v40, %v3444_v40 }
 0x195   :  { %2598 = vrsqrt.f32 %v3466_v32  ;;  %v874_v42 = vmul.f32 %v669_v61, %v669_v61  ;;  %v1278_v58 = vsel %vm1277_vm12, %v3385_v16, %v1276_v33  ;;  %v889_v33 = vmul.f32 %v743_v35, %v743_v35  ;;  %v751_v61 = vpop.f32.mrf.mxu1 }
 0x196   :  { %v2587_v54 = vpop.eup %2586  ;;  %v671_v15 = vpop.f32.mrf.mxu0  ;;  %v1281_v50 = vsel %vm1279_vm13, %v1280_v10, %v1278_v58  ;;  %2600 = vrsqrt.f32 %v3448_v45  ;;  %v3538_v4 = vsel %vm1328_vm14, %v1329_v14, %v3455_v0  ;;  %v3541_v38 = vadd.f32 %v887_v3, %v819_v59 }
 0x197   :  { %v3488_v48 = vadd.f32 %v874_v42, %v806_v43  ;;  %v1458_v55 = vpack.c.bf16 %v1281_v50, %v1274_v24  ;;  %v1283_v16 = vmul.f32 %v2587_v54, %v3405_v39  ;;  %v807_v8 = vmul.f32 %v671_v15, %v671_v15  ;;  %v753_v43 = vpop.f32.mrf.mxu1 }
 0x198   :  { %v673_v62 = vpop.f32.mrf.mxu0  ;;  %vm1298_vm5 = vcmp.eq.f32.partialorder %v3442_v5, inf  ;;  %v3546_v40 = vsel %vm1335_vm1, %v1336_v20, %v1334_v6  ;;  %v3548_v35 = vadd.f32 %v888_v25, %v820_v23  ;;  %v3550_v10 = vadd.f32 %v889_v33, %v821_v37 }
 0x199   :  { %2602 = vrsqrt.f32 %v3488_v48  ;;  %v875_v22 = vmul.f32 %v673_v62, %v673_v62  ;;  %2409 = vmatprep.mubr.bf16.mxu1 %v1458_v55  ;;  %v1285_v31 = vsel %vm1284_vm0, %v3405_v39, %v1283_v16  ;;  %v822_v42 = vmul.f32 %v747_v60, %v747_v60 }
 0x19a   :  { %v2589_v52 = vpop.eup %2588  ;;  %v1288_v26 = vsel %vm1286_vm3, %v1287_v49, %v1285_v31  ;;  %v1301_v58 = vand.u32 2147483648, %v3442_v5  ;;  %vm1305_vm6 = vcmp.eq.f32.partialorder %v3466_v32, inf  ;;  %v1308_v54 = vand.u32 2147483648, %v3466_v32 }
 0x19b   :  { %v3507_v9 = vpop.eup %2590  ;;  %v3509_v11 = vadd.f32 %v875_v22, %v807_v8  ;;  %v1290_v41 = vmul.f32 %v2589_v52, %v3425_v53  ;;  %v890_v12 = vmul.f32 %v749_v7, %v749_v7  ;;  %vm1300_vm7 = vcmp.eq.f32.partialorder %v3442_v5, 0.0 }
 0x19c   :  { %v3514_v18 = vpop.eup %2592  ;;  %vm1307_vm8 = vcmp.eq.f32.partialorder %v3466_v32, 0.0  ;;  %v823_v24 = vmul.f32 %v751_v61, %v751_v61  ;;  %v891_v50 = vmul.f32 %v753_v43, %v753_v43  ;;  %vm1312_vm9 = vcmp.eq.f32.partialorder %v3488_v48, inf }
 0x19d   :  { %v3520_v2 = vpop.eup %2594  ;;  %2604 = vrsqrt.f32 %v3509_v11  ;;  %v1292_v13 = vsel %vm1291_vm2, %v3425_v53, %v1290_v41  ;;  %v3566_v14 = vadd.f32 %v890_v12, %v822_v42  ;;  %vm1340_vm10 = vcmp.eq.f32.partialorder %v3371_v1, inf }
 0x19e   :  { %v2597_v21 = vpop.eup %2596  ;;  %v1295_v57 = vsel %vm1293_vm4, %v1294_v19, %v1292_v13  ;;  %2606 = vrsqrt.f32 %v3493_v29  ;;  %v3572_v8 = vadd.f32 %v891_v50, %v823_v24  ;;  %vm1342_vm11 = vcmp.eq.f32.partialorder %v3371_v1, 0.0 }
 0x19f   :  { %v1459_v36 = vpack.c.bf16 %v1295_v57, %v1288_v26  ;;  %v1297_v39 = vmul.f32 %v2597_v21, %v3442_v5  ;;  %2608 = vrsqrt.f32 %v3495_v47  ;;  %v1346_v3 = vmul.f32 %v3477_v28, %v3373_v30 }
 0x1a0   :  { %2610 = vrsqrt.f32 %v3501_v56  ;;  %vm1347_vm12 = vcmp.eq.f32.partialorder %v3373_v30, inf  ;;  %vm1319_vm13 = vcmp.eq.f32.partialorder %v3509_v11, inf  ;;  %v1322_v6 = vand.u32 2147483648, %v3509_v11 }
 0x1a1   :  { %2410 = vmatmul.mubr.bf16.gmra.mxu1 %v1459_v36  ;;  %v1299_v17 = vsel %vm1298_vm5, %v3442_v5, %v1297_v39  ;;  %2612 = vrsqrt.f32 %v3541_v38  ;;  %v1462_v5 = vpack.c.bf16 %v3546_v40, %v3538_v4  ;;  %v1353_v7 = vmul.f32 %v3507_v9, %v3411_v27 }
 0x1a2   :  { %v2599_v53 = vpop.eup %2598  ;;  %v1302_v55 = vsel %vm1300_vm7, %v1301_v58, %v1299_v17  ;;  %2614 = vrsqrt.f32 %v3548_v35  ;;  %vm1314_vm14 = vcmp.eq.f32.partialorder %v3488_v48, 0.0  ;;  %vm1321_vm15 = vcmp.eq.f32.partialorder %v3509_v11, 0.0 }
 0x1a3   :  { %v1304_v0 = vmul.f32 %v2599_v53, %v3466_v32  ;;  %v3557_v46 = vpop.eup %2600  ;;  %2616 = vrsqrt.f32 %v3550_v10  ;;  %v1360_v28 = vmul.f32 %v3514_v18, %v3413_v44  ;;  %vm1354_vm0 = vcmp.eq.f32.partialorder %v3411_v27, inf }
 0x1a4   :  { %vm1361_vm1 = vcmp.eq.f32.partialorder %v3413_v44, inf  ;;  %v1343_v9 = vand.u32 2147483648, %v3371_v1  ;;  %vm1349_vm2 = vcmp.eq.f32.partialorder %v3373_v30, 0.0  ;;  %v1350_v18 = vand.u32 2147483648, %v3373_v30 }
 0x1a5   :  { %v1306_v63 = vsel %vm1305_vm6, %v3466_v32, %v1304_v0  ;;  %v1339_v32 = vmul.f32 %v3471_v34, %v3371_v1  ;;  %v1315_v34 = vand.u32 2147483648, %v3488_v48  ;;  %v1357_v23 = vand.u32 2147483648, %v3411_v27 }
 0x1a6   :  { %v2603_v15 = vpop.eup %2602  ;;  %v1309_v60 = vsel %vm1307_vm8, %v1308_v54, %v1306_v63  ;;  %v1364_v25 = vand.u32 2147483648, %v3413_v44  ;;  %v1355_v26 = vsel %vm1354_vm0, %v3411_v27, %v1353_v7  ;;  %vm1356_vm3 = vcmp.eq.f32.partialorder %v3411_v27, 0.0 }
 0x1a7   :  { %v1460_v16 = vpack.c.bf16 %v1309_v60, %v1302_v55  ;;  %v1311_v62 = vmul.f32 %v2603_v15, %v3488_v48  ;;  %v1362_v57 = vsel %vm1361_vm1, %v3413_v44, %v1360_v28  ;;  %vm1363_vm4 = vcmp.eq.f32.partialorder %v3413_v44, 0.0 }
 0x1a8   :  { %2618 = vrsqrt.f32 %v3566_v14  ;;  %v1358_v61 = vsel %vm1356_vm3, %v1357_v23, %v1355_v26  ;;  %v1365_v36 = vsel %vm1363_vm4, %v1364_v25, %v1362_v57  ;;  %v1367_v39 = vmul.f32 %v3520_v2, %v3418_v51 }
 0x1a9   :  { %2413 = vmatprep.mubr.bf16.mxu1 %v1460_v16  ;;  %v1313_v22 = vsel %vm1312_vm9, %v3488_v48, %v1311_v62  ;;  %v1341_v48 = vsel %vm1340_vm10, %v3371_v1, %v1339_v32  ;;  %2620 = vrsqrt.f32 %v3572_v8  ;;  %vm1368_vm5 = vcmp.eq.f32.partialorder %v3418_v51, inf }
 0x1aa   :  { %v2605_v59 = vpop.eup %2604  ;;  %v1316_v19 = vsel %vm1314_vm14, %v1315_v34, %v1313_v22  ;;  %v1344_v37 = vsel %vm1342_vm11, %v1343_v9, %v1341_v48  ;;  %v1374_v27 = vmul.f32 %v3557_v46, %v3448_v45  ;;  %vm1375_vm6 = vcmp.eq.f32.partialorder %v3448_v45, inf }
 0x1ab   :  { %v1318_v52 = vmul.f32 %v2605_v59, %v3509_v11  ;;  %v2607_v31 = vpop.eup %2606  ;;  %v1464_v43 = vpack.c.bf16 %v1365_v36, %v1358_v61  ;;  %vm1382_vm7 = vcmp.eq.f32.partialorder %v3493_v29, inf  ;;  %vm1389_vm8 = vcmp.eq.f32.partialorder %v3495_v47, inf }
 0x1ac   :  { %v2609_v49 = vpop.eup %2608  ;;  %v1381_v1 = vmul.f32 %v2607_v31, %v3493_v29  ;;  %v1369_v2 = vsel %vm1368_vm5, %v3418_v51, %v1367_v39  ;;  %vm1370_vm9 = vcmp.eq.f32.partialorder %v3418_v51, 0.0  ;;  %v1371_v17 = vand.u32 2147483648, %v3418_v51 }
 0x1ad   :  { %v1320_v41 = vsel %vm1319_vm13, %v3509_v11, %v1318_v52  ;;  %v2611_v13 = vpop.eup %2610  ;;  %v1348_v11 = vsel %vm1347_vm12, %v3373_v30, %v1346_v3  ;;  %v1388_v53 = vmul.f32 %v2609_v49, %v3495_v47  ;;  %v1378_v0 = vand.u32 2147483648, %v3448_v45 }
 0x1ae   :  { %v1323_v20 = vsel %vm1321_vm15, %v1322_v6, %v1320_v41  ;;  %v2613_v30 = vpop.eup %2612  ;;  %v1351_v33 = vsel %vm1349_vm2, %v1350_v18, %v1348_v11  ;;  %v1376_v42 = vsel %vm1375_vm6, %v3448_v45, %v1374_v27  ;;  %vm1377_vm10 = vcmp.eq.f32.partialorder %v3448_v45, 0.0 }
 0x1af   :  { %v1461_v21 = vpack.c.bf16 %v1323_v20, %v1316_v19  ;;  %v2615_v4 = vpop.eup %2614  ;;  %v1463_v40 = vpack.c.bf16 %v1351_v33, %v1344_v37  ;;  %v1385_v58 = vand.u32 2147483648, %v3493_v29  ;;  %v1392_v54 = vand.u32 2147483648, %v3495_v47 }
 0x1b0   :  { %v2617_v44 = vpop.eup %2616  ;;  %v1383_v46 = vsel %vm1382_vm7, %v3493_v29, %v1381_v1  ;;  %vm1384_vm11 = vcmp.eq.f32.partialorder %v3493_v29, 0.0  ;;  %v1390_v12 = vsel %vm1389_vm8, %v3495_v47, %v1388_v53  ;;  %vm1391_vm12 = vcmp.eq.f32.partialorder %v3495_v47, 0.0 }
 0x1b1   :  { %2414 = vmatmul.mubr.bf16.gmra.mxu1 %v1461_v21  ;;  %v1372_v51 = vsel %vm1370_vm9, %v1371_v17, %v1369_v2  ;;  %v1379_v63 = vsel %vm1377_vm10, %v1378_v0, %v1376_v42  ;;  %v1395_v15 = vmul.f32 %v2611_v13, %v3501_v56  ;;  %v1386_v24 = vsel %vm1384_vm11, %v1385_v58, %v1383_v46  ;;  %v3647_v59 = vpop.f32.mrf.mxu1 }
 0x1b2   :  { %2417 = vmatprep.mubr.bf16.mxu1 %v1462_v5  ;;  %v1393_v50 = vsel %vm1391_vm12, %v1392_v54, %v1390_v12  ;;  %vm1396_vm13 = vcmp.eq.f32.partialorder %v3501_v56, inf  ;;  %v1402_v45 = vmul.f32 %v2613_v30, %v3541_v38  ;;  %vm1403_vm14 = vcmp.eq.f32.partialorder %v3541_v38, inf }
 0x1b3   :  { %v1409_v55 = vmul.f32 %v2615_v4, %v3548_v35  ;;  %v1416_v29 = vmul.f32 %v2617_v44, %v3550_v10  ;;  %v1465_v60 = vpack.c.bf16 %v1379_v63, %v1372_v51  ;;  %vm1398_vm15 = vcmp.eq.f32.partialorder %v3501_v56, 0.0  ;;  %v1568_v41 = vpop.f32.mrf.mxu1 }
 0x1b4   :  { %vm1410_vm0 = vcmp.eq.f32.partialorder %v3548_v35, inf  ;;  %vm1417_vm1 = vcmp.eq.f32.partialorder %v3550_v10, inf  ;;  %v1466_v16 = vpack.c.bf16 %v1393_v50, %v1386_v24  ;;  %v1397_v62 = vsel %vm1396_vm13, %v3501_v56, %v1395_v15 }
 0x1b5   :  { %v2619_v47 = vpop.eup %2618  ;;  %v1399_v5 = vand.u32 2147483648, %v3501_v56  ;;  %v1406_v32 = vand.u32 2147483648, %v3541_v38  ;;  %v1404_v22 = vsel %vm1403_vm14, %v3541_v38, %v1402_v45  ;;  %vm1405_vm2 = vcmp.eq.f32.partialorder %v3541_v38, 0.0  ;;  %v3667_v56 = vpop.f32.mrf.mxu1 }
 0x1b6   :  { %v1413_v52 = vand.u32 2147483648, %v3548_v35  ;;  %v1420_v3 = vand.u32 2147483648, %v3550_v10  ;;  %v2621_v34 = vpop.eup %2620  ;;  %v1411_v6 = vsel %vm1410_vm0, %v3548_v35, %v1409_v55  ;;  %vm1412_vm3 = vcmp.eq.f32.partialorder %v3548_v35, 0.0 }
 0x1b7   :  { %v1418_v7 = vsel %vm1417_vm1, %v3550_v10, %v1416_v29  ;;  %vm1419_vm4 = vcmp.eq.f32.partialorder %v3550_v10, 0.0  ;;  %v1400_v31 = vsel %vm1398_vm15, %v1399_v5, %v1397_v62  ;;  %v1407_v38 = vsel %vm1405_vm2, %v1406_v32, %v1404_v22  ;;  %v1571_v23 = vpop.f32.mrf.mxu1 }
 0x1b8   :  { %v1414_v28 = vsel %vm1412_vm3, %v1413_v52, %v1411_v6  ;;  %v1421_v49 = vsel %vm1419_vm4, %v1420_v3, %v1418_v7  ;;  %v1423_v19 = vmul.f32 %v2619_v47, %v3566_v14  ;;  %v1430_v20 = vmul.f32 %v2621_v34, %v3572_v8 }
 0x1b9   :  { %2418 = vmatmul.mubr.bf16.gmra.mxu1 %v1463_v40  ;;  %vm1424_vm5 = vcmp.eq.f32.partialorder %v3566_v14, inf  ;;  %vm1431_vm6 = vcmp.eq.f32.partialorder %v3572_v8, inf  ;;  %v1467_v35 = vpack.c.bf16 %v1407_v38, %v1400_v31  ;;  %v1468_v13 = vpack.c.bf16 %v1421_v49, %v1414_v28 }
 0x1ba   :  { %2421 = vmatprep.mubr.bf16.mxu1 %v1464_v43  ;;  %v1427_v21 = vand.u32 2147483648, %v3566_v14  ;;  %v1434_v10 = vand.u32 2147483648, %v3572_v8  ;;  %v1425_v48 = vsel %vm1424_vm5, %v3566_v14, %v1423_v19  ;;  %vm1426_vm7 = vcmp.eq.f32.partialorder %v3566_v14, 0.0 }
 0x1bb   :  { %v1432_v9 = vsel %vm1431_vm6, %v3572_v8, %v1430_v20  ;;  %vm1433_vm8 = vcmp.eq.f32.partialorder %v3572_v8, 0.0  ;;  %v1839_v15 = vmax.f32 %v1568_v41, 1e-05  ;;  %v1840_v24 = vmax.f32 %v1571_v23, 1e-05 }
 0x1bc   :  { %v1428_v11 = vsel %vm1426_vm7, %v1427_v21, %v1425_v48  ;;  %v1435_v18 = vsel %vm1433_vm8, %v1434_v10, %v1432_v9  ;;  %v1842_v5 = vmax.f32 %v3667_v56, 1e-05 }
 0x1bd   :  { %v1469_v26 = vpack.c.bf16 %v1435_v18, %v1428_v11  ;;  %2622 = vlog2.f32 %v1839_v15 }
 0x1be   :  { %2624 = vlog2.f32 %v1840_v24 }
 0x1c1   :  { %2422 = vmatmul.mubr.bf16.gmra.mxu1 %v1465_v60  ;;  %v3673_v25 = vpop.f32.mrf.mxu1 }
 0x1c2   :  { %2425 = vmatprep.mubr.bf16.mxu1 %v1466_v16  ;;  %v1841_v16 = vmax.f32 %v3647_v59, 1e-05  ;;  %v1845_v18 = vmax.f32 %v3673_v25, 1e-05 }
 0x1c3   :  { %v1584_v57 = vpop.f32.mrf.mxu1 }
 0x1c4   :  { %v1843_v52 = vmax.f32 %v1584_v57, 1e-05 }
 0x1c5   :  { %v3675_v37 = vpop.f32.mrf.mxu1 }
 0x1c6   :  { %v1846_v24 = vmax.f32 %v3675_v37, 1e-05 }
 0x1c7   :  { %v3677_v30 = vpop.f32.mrf.mxu1 }
 0x1c8   :  { %v1844_v28 = vmax.f32 %v3677_v30, 1e-05 }
 0x1c9   :  { %2426 = vmatmul.mubr.bf16.gmra.mxu1 %v1467_v35 }
 0x1ca   :  { %2429 = vmatprep.mubr.bf16.mxu1 %v1468_v13  ;;  %v2623_v62 = vpop.eup %2622 }
 0x1cb   :  { %v2625_v22 = vpop.eup %2624  ;;  %v1908_v6 = vmul.f32 0.6931472, %v2623_v62 }
 0x1cc   :  { %v1910_v38 = vmul.f32 0.6931472, %v2625_v22 }
 0x1cd   :  { %v2043_v35 = vmul.f32 0.4342945, %v1908_v6 }
 0x1ce   :  { %v2044_v56 = vmul.f32 0.4342945, %v1910_v38 }
 0x1d1   :  { %2430 = vmatmul.mubr.bf16.gmra.mxu1 %v1469_v26  ;;  %v3679_v33 = vpop.f32.mrf.mxu1 }
 0x1d3   :  { %v3681_v14 = vpop.f32.mrf.mxu1 }
 0x1d5   :  { %v3683_v61 = vpop.f32.mrf.mxu1 }
 0x1d7   :  { %v3685_v8 = vpop.f32.mrf.mxu1 }
 0x1d8   :  { %v1848_v25 = vmax.f32 %v3685_v8, 1e-05 }
 0x1e1   :  { %v3687_v36 = vpop.f32.mrf.mxu1 }
 0x1e3   :  { %v3689_v39 = vpop.f32.mrf.mxu1 }
 0x1e5   :  { %v3691_v4 = vpop.f32.mrf.mxu1 }
 0x1e7   :  { %v3693_v27 = vpop.f32.mrf.mxu1 }
 0x1f1   :  { %v3695_v44 = vpop.f32.mrf.mxu1 }
 0x1f3   :  { %v3697_v1 = vpop.f32.mrf.mxu1 }
 0x1f5   :  { %v3699_v53 = vpop.f32.mrf.mxu1 }
 0x1f7   :  { %v3701_v40 = vpop.f32.mrf.mxu1 }
 0x201   :  { %v3703_v43 = vpop.f32.mrf.mxu1 }
 0x203   :  { %v3705_v2 = vpop.f32.mrf.mxu1 }
 0x205   :  { %v3707_v17 = vpop.f32.mrf.mxu1 }
 0x207   :  { %v3709_v0 = vpop.f32.mrf.mxu1 }
 0x211   :  { %v3711_v42 = vpop.f32.mrf.mxu1 }
 0x213   :  { %v3713_v58 = vpop.f32.mrf.mxu1 }
 0x215   :  { %v3715_v54 = vpop.f32.mrf.mxu1 }
 0x217   :  { %v3717_v46 = vpop.f32.mrf.mxu1 }
 0x221   :  { %v3719_v12 = vpop.f32.mrf.mxu1 }
 0x223   :  { %v3721_v51 = vpop.f32.mrf.mxu1 }
 0x225   :  { %v3723_v63 = vpop.f32.mrf.mxu1 }
 0x227   :  { %v3725_v50 = vpop.f32.mrf.mxu1 }
 0x231   :  { %v2399_v45 = vpop.f32.mrf.mxu1 }
 0x232   :  { %v1873_v55 = vmax.f32 %v2399_v45, 1e-05 }
 0x233   :  { %v3727_v29 = vpop.f32.mrf.mxu1 }
 0x234   :  { %2626 = vlog2.f32 %v1873_v55 }
 0x235   :  { %v2400_v60 = vpop.f32.mrf.mxu1 }
 0x236   :  { %v1874_v47 = vmax.f32 %v2400_v60, 1e-05 }
 0x237   :  { %v3731_v32 = vpop.f32.mrf.mxu1 }
 0x238   :  { %2628 = vlog2.f32 %v1874_v47  ;;  %v1847_v47 = vmax.f32 %v3681_v14, 1e-05 }
 0x239   :  { %2630 = vlog2.f32 %v1841_v16 }
 0x23a   :  { %2632 = vlog2.f32 %v1842_v5 }
 0x23b   :  { %2634 = vlog2.f32 %v1843_v52 }
 0x241   :  { %v2627_v3 = vpop.eup %2626  ;;  %v2403_v34 = vpop.f32.mrf.mxu1 }
 0x242   :  { %v1976_v7 = vmul.f32 0.6931472, %v2627_v3  ;;  %v1877_v31 = vmax.f32 %v2403_v34, 1e-05 }
 0x243   :  { %v1712_v41 = vpop.f32.mrf.mxu1 }
 0x244   :  { %v2077_v59 = vmul.f32 0.4342945, %v1976_v7  ;;  %v1875_v49 = vmax.f32 %v1712_v41, 1e-05  ;;  %2636 = vlog2.f32 %v1877_v31 }
 0x245   :  { %v2629_v19 = vpop.eup %2628  ;;  %v2404_v20 = vpop.f32.mrf.mxu1 }
 0x246   :  { %v1978_v13 = vmul.f32 0.6931472, %v2629_v19  ;;  %2638 = vlog2.f32 %v1875_v49  ;;  %v1878_v21 = vmax.f32 %v2404_v20, 1e-05  ;;  %v2111_v48 = vsub.f32 %v2043_v35, %v2077_v59  ;;  %v2631_v30 = vpop.eup %2630 }
 0x247   :  { %v1715_v10 = vpop.f32.mrf.mxu1  ;;  %2640 = vlog2.f32 %v1844_v28  ;;  %v2633_v45 = vpop.eup %2632  ;;  %v1912_v60 = vmul.f32 0.6931472, %v2631_v30  ;;  %v1853_v30 = vmax.f32 %v3687_v36, 1e-05 }
 0x248   :  { %v2078_v9 = vmul.f32 0.4342945, %v1978_v13  ;;  %2642 = vlog2.f32 %v1878_v21  ;;  %v1876_v11 = vmax.f32 %v1715_v10, 1e-05  ;;  %v2145_v26 = vand.u32 2147483647, %v2111_v48  ;;  %v2635_v55 = vpop.eup %2634 }
 0x249   :  { %v1914_v3 = vmul.f32 0.6931472, %v2633_v45  ;;  %v2045_v31 = vmul.f32 0.4342945, %v1912_v60  ;;  %v1916_v28 = vmul.f32 0.6931472, %v2635_v55 }
 0x24a   :  { %v2112_v23 = vsub.f32 %v2044_v56, %v2078_v9  ;;  %2644 = vlog2.f32 %v1876_v11  ;;  %v1849_v9 = vmax.f32 %v3679_v33, 1e-05  ;;  %v1851_v55 = vmax.f32 %v3689_v39, 1e-05 }
 0x24b   :  { %2646 = vlog2.f32 %v1845_v18  ;;  %v2046_v8 = vmul.f32 0.4342945, %v1914_v3  ;;  %v2047_v48 = vmul.f32 0.4342945, %v1916_v28  ;;  %v1854_v33 = vmax.f32 %v3691_v4, 1e-05 }
 0x24c   :  { %v2146_v57 = vand.u32 2147483647, %v2112_v23  ;;  %2648 = vlog2.f32 %v1846_v24  ;;  %v1850_v23 = vmax.f32 %v3683_v61, 1e-05  ;;  %v1852_v61 = vmax.f32 %v3693_v27, 1e-05 }
 0x24e   :  { %v2179_v15 = vadd.f32 %v2146_v57, %v2145_v26 }
 0x251   :  { %v2407_v16 = vpop.f32.mrf.mxu1  ;;  %v2637_v62 = vpop.eup %2636 }
 0x252   :  { %v1881_v5 = vmax.f32 %v2407_v16, 1e-05  ;;  %v1984_v37 = vmul.f32 0.6931472, %v2637_v62 }
 0x253   :  { %v2639_v22 = vpop.eup %2638  ;;  %v1728_v52 = vpop.f32.mrf.mxu1 }
 0x254   :  { %v1980_v34 = vmul.f32 0.6931472, %v2639_v22  ;;  %2650 = vlog2.f32 %v1881_v5  ;;  %v1879_v6 = vmax.f32 %v1728_v52, 1e-05  ;;  %v2641_v7 = vpop.eup %2640  ;;  %v2081_v10 = vmul.f32 0.4342945, %v1984_v37 }
 0x255   :  { %2652 = vlog2.f32 %v1847_v47  ;;  %v2408_v38 = vpop.f32.mrf.mxu1  ;;  %v2643_v41 = vpop.eup %2642  ;;  %v1918_v21 = vmul.f32 0.6931472, %v2641_v7  ;;  %v1857_v7 = vmax.f32 %v3695_v44, 1e-05 }
 0x256   :  { %v2079_v14 = vmul.f32 0.4342945, %v1980_v34  ;;  %2654 = vlog2.f32 %v1879_v6  ;;  %v1882_v59 = vmax.f32 %v2408_v38, 1e-05  ;;  %v1986_v49 = vmul.f32 0.6931472, %v2643_v41 }
 0x257   :  { %2656 = vlog2.f32 %v1848_v25  ;;  %v1731_v19 = vpop.f32.mrf.mxu1  ;;  %v2645_v20 = vpop.eup %2644  ;;  %v2048_v45 = vmul.f32 0.4342945, %v1918_v21  ;;  %v2115_v60 = vsub.f32 %v2047_v48, %v2081_v10  ;;  %v1858_v48 = vmax.f32 %v3699_v53, 1e-05 }
 0x258   :  { %v2113_v35 = vsub.f32 %v2045_v31, %v2079_v14  ;;  %2658 = vlog2.f32 %v1882_v59  ;;  %v1880_v13 = vmax.f32 %v1731_v19, 1e-05  ;;  %v1982_v56 = vmul.f32 0.6931472, %v2645_v20  ;;  %v2647_v18 = vpop.eup %2646 }
 0x259   :  { %v2082_v26 = vmul.f32 0.4342945, %v1986_v49  ;;  %v1920_v16 = vmul.f32 0.6931472, %v2647_v18  ;;  %v2649_v22 = vpop.eup %2648  ;;  %v2149_v36 = vand.u32 2147483647, %v2115_v60 }
 0x25a   :  { %v2147_v11 = vand.u32 2147483647, %v2113_v35  ;;  %2660 = vlog2.f32 %v1880_v13  ;;  %v2080_v57 = vmul.f32 0.4342945, %v1982_v56  ;;  %v1922_v59 = vmul.f32 0.6931472, %v2649_v22 }
 0x25b   :  { %2662 = vlog2.f32 %v1849_v9  ;;  %v2116_v62 = vsub.f32 %v2048_v45, %v2082_v26  ;;  %v2049_v39 = vmul.f32 0.4342945, %v1920_v16  ;;  %v1861_v22 = vmax.f32 %v3703_v43, 1e-05 }
 0x25c   :  { %v2180_v24 = vadd.f32 %v2179_v15, %v2147_v11  ;;  %v2114_v47 = vsub.f32 %v2046_v8, %v2080_v57  ;;  %2664 = vlog2.f32 %v1850_v23  ;;  %v1855_v8 = vmax.f32 %v3697_v1, 1e-05 }
 0x25d   :  { %2666 = vlog2.f32 %v1853_v30  ;;  %v2150_v31 = vand.u32 2147483647, %v2116_v62  ;;  %v2050_v23 = vmul.f32 0.4342945, %v1922_v59  ;;  %v1856_v62 = vmax.f32 %v3701_v40, 1e-05 }
 0x25e   :  { %v2148_v5 = vand.u32 2147483647, %v2114_v47  ;;  %2668 = vlog2.f32 %v1851_v55 }
 0x25f   :  { %2670 = vlog2.f32 %v1854_v33 }
 0x260   :  { %v2181_v15 = vadd.f32 %v2180_v24, %v2148_v5  ;;  %2672 = vlog2.f32 %v1852_v61 }
 0x261   :  { %v2651_v25 = vpop.eup %2650  ;;  %v2411_v52 = vpop.f32.mrf.mxu1 }
 0x262   :  { %v2653_v3 = vpop.eup %2652  ;;  %v1885_v34 = vmax.f32 %v2411_v52, 1e-05  ;;  %v2182_v4 = vadd.f32 %v2181_v15, %v2149_v36  ;;  %v1992_v41 = vmul.f32 0.6931472, %v2651_v25  ;;  %v1859_v52 = vmax.f32 %v3705_v2, 1e-05 }
 0x263   :  { %v2655_v6 = vpop.eup %2654  ;;  %v1744_v37 = vpop.f32.mrf.mxu1  ;;  %v1924_v49 = vmul.f32 0.6931472, %v2653_v3 }
 0x264   :  { %v2657_v38 = vpop.eup %2656  ;;  %v1988_v28 = vmul.f32 0.6931472, %v2655_v6  ;;  %v1883_v27 = vmax.f32 %v1744_v37, 1e-05  ;;  %v2183_v19 = vadd.f32 %v2182_v4, %v2150_v31  ;;  %2674 = vlog2.f32 %v1885_v34 }
 0x265   :  { %v2659_v14 = vpop.eup %2658  ;;  %v2412_v20 = vpop.f32.mrf.mxu1  ;;  %v1926_v21 = vmul.f32 0.6931472, %v2657_v38  ;;  %v2085_v9 = vmul.f32 0.4342945, %v1992_v41  ;;  %v2051_v26 = vmul.f32 0.4342945, %v1924_v49 }
 0x266   :  { %v2083_v35 = vmul.f32 0.4342945, %v1988_v28  ;;  %v1994_v13 = vmul.f32 0.6931472, %v2659_v14  ;;  %2676 = vlog2.f32 %v1883_v27  ;;  %v1886_v10 = vmax.f32 %v2412_v20, 1e-05 }
 0x267   :  { %v2661_v44 = vpop.eup %2660  ;;  %2678 = vlog2.f32 %v1857_v7  ;;  %v1747_v56 = vpop.f32.mrf.mxu1  ;;  %v2052_v55 = vmul.f32 0.4342945, %v1926_v21  ;;  %v2119_v47 = vsub.f32 %v2051_v26, %v2085_v9  ;;  %v1860_v20 = vmax.f32 %v3709_v0, 1e-05 }
 0x268   :  { %v2117_v11 = vsub.f32 %v2049_v39, %v2083_v35  ;;  %v1990_v18 = vmul.f32 0.6931472, %v2661_v44  ;;  %2680 = vlog2.f32 %v1886_v10  ;;  %v1884_v57 = vmax.f32 %v1747_v56, 1e-05  ;;  %v2663_v45 = vpop.eup %2662 }
 0x269   :  { %2682 = vlog2.f32 %v1855_v8  ;;  %v2086_v1 = vmul.f32 0.4342945, %v1994_v13  ;;  %v2665_v60 = vpop.eup %2664  ;;  %v1928_v36 = vmul.f32 0.6931472, %v2663_v45  ;;  %v2153_v34 = vand.u32 2147483647, %v2119_v47 }
 0x26a   :  { %v2151_v30 = vand.u32 2147483647, %v2117_v11  ;;  %v2084_v24 = vmul.f32 0.4342945, %v1990_v18  ;;  %2684 = vlog2.f32 %v1884_v57  ;;  %v2667_v53 = vpop.eup %2666  ;;  %v1930_v15 = vmul.f32 0.6931472, %v2665_v60 }
 0x26b   :  { %2686 = vlog2.f32 %v1858_v48  ;;  %v2669_v5 = vpop.eup %2668  ;;  %v2120_v61 = vsub.f32 %v2052_v55, %v2086_v1  ;;  %v1936_v39 = vmul.f32 0.6931472, %v2667_v53  ;;  %v2053_v28 = vmul.f32 0.4342945, %v1928_v36 }
 0x26c   :  { %v2184_v16 = vadd.f32 %v2183_v19, %v2151_v30  ;;  %v2118_v33 = vsub.f32 %v2050_v23, %v2084_v24  ;;  %v2671_v3 = vpop.eup %2670  ;;  %v1932_v31 = vmul.f32 0.6931472, %v2669_v5  ;;  %2688 = vlog2.f32 %v1856_v62 }
 0x26d   :  { %v2673_v7 = vpop.eup %2672  ;;  %2690 = vlog2.f32 %v1861_v22  ;;  %v2154_v40 = vand.u32 2147483647, %v2120_v61  ;;  %v2054_v27 = vmul.f32 0.4342945, %v1930_v15  ;;  %v3750_v2 = vmul.f32 0.4342945, %v1936_v39 }
 0x26e   :  { %v2152_v25 = vand.u32 2147483647, %v2118_v33  ;;  %2692 = vlog2.f32 %v1859_v52  ;;  %v2055_v21 = vmul.f32 0.4342945, %v1932_v31  ;;  %v1938_v9 = vmul.f32 0.6931472, %v2671_v3 }
 0x26f   :  { %v1862_v11 = vmax.f32 %v3707_v17, 1e-05  ;;  %v1934_v57 = vmul.f32 0.6931472, %v2673_v7  ;;  %v1863_v17 = vmax.f32 %v3713_v58, 1e-05 }
 0x270   :  { %v2185_v6 = vadd.f32 %v2184_v16, %v2152_v25  ;;  %v1865_v15 = vmax.f32 %v3711_v42, 1e-05 }
 0x271   :  { %v2415_v4 = vpop.f32.mrf.mxu1  ;;  %v2675_v37 = vpop.eup %2674  ;;  %v2056_v36 = vmul.f32 0.4342945, %v1934_v57 }
 0x272   :  { %v2186_v38 = vadd.f32 %v2185_v6, %v2153_v34  ;;  %v1889_v41 = vmax.f32 %v2415_v4, 1e-05  ;;  %v2000_v8 = vmul.f32 0.6931472, %v2675_v37  ;;  %v3756_v6 = vmul.f32 0.4342945, %v1938_v9 }
 0x273   :  { %v2677_v43 = vpop.eup %2676  ;;  %v1760_v14 = vpop.f32.mrf.mxu1  ;;  %v1866_v4 = vmax.f32 %v3715_v54, 1e-05 }
 0x274   :  { %v2679_v59 = vpop.eup %2678  ;;  %v1996_v49 = vmul.f32 0.6931472, %v2677_v43  ;;  %v2187_v19 = vadd.f32 %v2186_v38, %v2154_v40  ;;  %2694 = vlog2.f32 %v1889_v41  ;;  %v1887_v35 = vmax.f32 %v1760_v14, 1e-05 }
 0x275   :  { %v2416_v13 = vpop.f32.mrf.mxu1  ;;  %v2681_v44 = vpop.eup %2680  ;;  %v1944_v24 = vmul.f32 0.6931472, %v2679_v59  ;;  %v2089_v45 = vmul.f32 0.4342945, %v2000_v8  ;;  %v1864_v14 = vmax.f32 %v3717_v46, 1e-05 }
 0x276   :  { %v2087_v10 = vmul.f32 0.4342945, %v1996_v49  ;;  %v1890_v56 = vmax.f32 %v2416_v13, 1e-05  ;;  %v2683_v48 = vpop.eup %2682  ;;  %v2002_v18 = vmul.f32 0.6931472, %v2681_v44  ;;  %2696 = vlog2.f32 %v1887_v35 }
 0x277   :  { %v1763_v23 = vpop.f32.mrf.mxu1  ;;  %v2685_v26 = vpop.eup %2684  ;;  %v1940_v47 = vmul.f32 0.6931472, %v2683_v48  ;;  %v2123_v52 = vsub.f32 %v2055_v21, %v2089_v45  ;;  %v3758_v7 = vmul.f32 0.4342945, %v1944_v24  ;;  %v1869_v35 = vmax.f32 %v3719_v12, 1e-05 }
 0x278   :  { %v2121_v30 = vsub.f32 %v2053_v28, %v2087_v10  ;;  %2698 = vlog2.f32 %v1890_v56  ;;  %v1888_v1 = vmax.f32 %v1763_v23, 1e-05  ;;  %v2687_v0 = vpop.eup %2686  ;;  %v1998_v55 = vmul.f32 0.6931472, %v2685_v26 }
 0x279   :  { %2700 = vlog2.f32 %v1860_v20  ;;  %v2419_v60 = vpop.f32.mrf.mxu1  ;;  %v2090_v53 = vmul.f32 0.4342945, %v2002_v18  ;;  %v1946_v22 = vmul.f32 0.6931472, %v2687_v0  ;;  %v2689_v34 = vpop.eup %2688  ;;  %v3761_v43 = vmul.f32 0.4342945, %v1940_v47 }
 0x27a   :  { %v2155_v16 = vand.u32 2147483647, %v2121_v30  ;;  %2702 = vlog2.f32 %v1888_v1  ;;  %v1893_v33 = vmax.f32 %v2419_v60, 1e-05  ;;  %v2088_v62 = vmul.f32 0.4342945, %v1998_v55  ;;  %v2691_v31 = vpop.eup %2690 }
 0x27b   :  { %2704 = vlog2.f32 %v1862_v11  ;;  %v1776_v5 = vpop.f32.mrf.mxu1  ;;  %v2124_v37 = vsub.f32 %v2056_v36, %v2090_v53  ;;  %v2693_v41 = vpop.eup %2692  ;;  %v3763_v42 = vmul.f32 0.4342945, %v1946_v22  ;;  %v2157_v59 = vand.u32 2147483647, %v2123_v52 }
 0x27c   :  { %v2188_v61 = vadd.f32 %v2187_v19, %v2155_v16  ;;  %2706 = vlog2.f32 %v1893_v33  ;;  %v1891_v25 = vmax.f32 %v1776_v5, 1e-05  ;;  %v2122_v3 = vsub.f32 %v2054_v27, %v2088_v62 }
 0x27d   :  { %v2420_v39 = vpop.f32.mrf.mxu1  ;;  %v1942_v20 = vmul.f32 0.6931472, %v2689_v34  ;;  %v1952_v8 = vmul.f32 0.6931472, %v2691_v31  ;;  %v2158_v13 = vand.u32 2147483647, %v2124_v37 }
 0x27e   :  { %2708 = vlog2.f32 %v1891_v25  ;;  %v1894_v58 = vmax.f32 %v2420_v39, 1e-05  ;;  %v2156_v40 = vand.u32 2147483647, %v2122_v3  ;;  %v1948_v56 = vmul.f32 0.6931472, %v2693_v41 }
 0x27f   :  { %2710 = vlog2.f32 %v1863_v17  ;;  %v1779_v38 = vpop.f32.mrf.mxu1  ;;  %v1867_v46 = vmax.f32 %v3721_v51, 1e-05  ;;  %v1870_v30 = vmax.f32 %v3723_v63, 1e-05  ;;  %v2060_v24 = vmul.f32 0.4342945, %v1942_v20 }
 0x280   :  { %2712 = vlog2.f32 %v1894_v58  ;;  %v1892_v28 = vmax.f32 %v1779_v38, 1e-05  ;;  %v2189_v49 = vadd.f32 %v2188_v61, %v2156_v40  ;;  %v3769_v45 = vmul.f32 0.4342945, %v1952_v8 }
 0x281   :  { %v2695_v27 = vpop.eup %2694  ;;  %2714 = vlog2.f32 %v1865_v15  ;;  %v2423_v19 = vpop.f32.mrf.mxu1  ;;  %v3771_v16 = vmul.f32 0.4342945, %v1948_v56  ;;  %v1868_v58 = vmax.f32 %v3725_v50, 1e-05 }
 0x282   :  { %2716 = vlog2.f32 %v1892_v28  ;;  %v1897_v54 = vmax.f32 %v2423_v19, 1e-05  ;;  %v2190_v44 = vadd.f32 %v2189_v49, %v2157_v59  ;;  %v2008_v48 = vmul.f32 0.6931472, %v2695_v27 }
 0x283   :  { %2718 = vlog2.f32 %v1866_v4  ;;  %v1792_v21 = vpop.f32.mrf.mxu1  ;;  %v2697_v10 = vpop.eup %2696 }
 0x284   :  { %2720 = vlog2.f32 %v1897_v54  ;;  %v1895_v9 = vmax.f32 %v1792_v21, 1e-05  ;;  %v2004_v18 = vmul.f32 0.6931472, %v2697_v10  ;;  %v2191_v23 = vadd.f32 %v2190_v44, %v2158_v13 }
 0x285   :  { %v2699_v11 = vpop.eup %2698  ;;  %2722 = vlog2.f32 %v1864_v14  ;;  %v2424_v26 = vpop.f32.mrf.mxu1  ;;  %v2093_v51 = vmul.f32 0.4342945, %v2008_v48  ;;  %v1871_v10 = vmax.f32 %v3727_v29, 1e-05 }
 0x286   :  { %v2701_v57 = vpop.eup %2700  ;;  %v2010_v1 = vmul.f32 0.6931472, %v2699_v11  ;;  %2724 = vlog2.f32 %v1895_v9  ;;  %v1898_v12 = vmax.f32 %v2424_v26, 1e-05  ;;  %v2091_v55 = vmul.f32 0.4342945, %v2004_v18 }
 0x287   :  { %v2703_v0 = vpop.eup %2702  ;;  %2726 = vlog2.f32 %v1869_v35  ;;  %v1795_v60 = vpop.f32.mrf.mxu1  ;;  %v1950_v53 = vmul.f32 0.6931472, %v2701_v57  ;;  %v2127_v31 = vsub.f32 %v3761_v43, %v2093_v51 }
 0x288   :  { %v2705_v47 = vpop.eup %2704  ;;  %v2006_v33 = vmul.f32 0.6931472, %v2703_v0  ;;  %2728 = vlog2.f32 %v1898_v12  ;;  %v2125_v63 = vsub.f32 %v3750_v2, %v2091_v55  ;;  %v1896_v62 = vmax.f32 %v1795_v60, 1e-05 }
 0x289   :  { %v2707_v17 = vpop.eup %2706  ;;  %2730 = vlog2.f32 %v1867_v46  ;;  %v2427_v5 = vpop.f32.mrf.mxu1  ;;  %v2094_v22 = vmul.f32 0.4342945, %v2010_v1  ;;  %v3774_v15 = vmul.f32 0.6931472, %v2705_v47  ;;  %v3779_v40 = vmul.f32 0.4342945, %v1950_v53 }
 0x28a   :  { %2732 = vlog2.f32 %v1870_v30  ;;  %v2092_v61 = vmul.f32 0.4342945, %v2006_v33  ;;  %v1901_v25 = vmax.f32 %v2427_v5, 1e-05  ;;  %v2159_v52 = vand.u32 2147483647, %v2125_v63 }
 0x28b   :  { %v2709_v36 = vpop.eup %2708  ;;  %v2016_v3 = vmul.f32 0.6931472, %v2707_v17  ;;  %2734 = vlog2.f32 %v1896_v62  ;;  %v1808_v39 = vpop.f32.mrf.mxu1  ;;  %v2128_v14 = vsub.f32 %v2060_v24, %v2094_v22  ;;  %v2161_v35 = vand.u32 2147483647, %v2127_v31 }
 0x28c   :  { %v2711_v34 = vpop.eup %2710  ;;  %v2126_v2 = vsub.f32 %v3756_v6, %v2092_v61  ;;  %v2012_v4 = vmul.f32 0.6931472, %v2709_v36  ;;  %v2192_v38 = vadd.f32 %v2191_v23, %v2159_v52  ;;  %2736 = vlog2.f32 %v1901_v25 }
 0x28d   :  { %v2713_v37 = vpop.eup %2712  ;;  %v1899_v41 = vmax.f32 %v1808_v39, 1e-05  ;;  %v2428_v28 = vpop.f32.mrf.mxu1  ;;  %v1956_v50 = vmul.f32 0.6931472, %v2711_v34  ;;  %v2097_v8 = vmul.f32 0.4342945, %v2016_v3 }
 0x28e   :  { %v3781_v27 = vpop.eup %2714  ;;  %v2160_v59 = vand.u32 2147483647, %v2126_v2  ;;  %v2095_v49 = vmul.f32 0.4342945, %v2012_v4  ;;  %v2018_v19 = vmul.f32 0.6931472, %v2713_v37 }
 0x28f   :  { %v2717_v20 = vpop.eup %2716  ;;  %2738 = vlog2.f32 %v1899_v41  ;;  %v1902_v43 = vmax.f32 %v2428_v28, 1e-05  ;;  %v1811_v6 = vpop.f32.mrf.mxu1  ;;  %v1872_v46 = vmax.f32 %v3731_v32, 1e-05  ;;  %v2162_v18 = vand.u32 2147483647, %v2128_v14 }
 0x290   :  { %v3783_v54 = vpop.eup %2718  ;;  %2740 = vlog2.f32 %v1868_v58  ;;  %v2193_v13 = vadd.f32 %v2192_v38, %v2160_v59  ;;  %v2129_v44 = vsub.f32 %v3758_v7, %v2095_v49  ;;  %v2014_v56 = vmul.f32 0.6931472, %v2717_v20 }
 0x291   :  { %v2721_v21 = vpop.eup %2720  ;;  %2742 = vlog2.f32 %v1902_v43  ;;  %v1900_v48 = vmax.f32 %v1811_v6, 1e-05  ;;  %v2431_v9 = vpop.f32.mrf.mxu1  ;;  %v2098_v26 = vmul.f32 0.4342945, %v2018_v19  ;;  %v2131_v30 = vsub.f32 %v3771_v16, %v2097_v8 }
 0x292   :  { %v2723_v11 = vpop.eup %2722  ;;  %v2194_v23 = vadd.f32 %v2193_v13, %v2161_v35  ;;  %v2096_v1 = vmul.f32 0.4342945, %v2014_v56  ;;  %v1905_v12 = vmax.f32 %v2431_v9, 1e-05  ;;  %v2163_v29 = vand.u32 2147483647, %v2129_v44 }
 0x293   :  { %v2725_v57 = vpop.eup %2724  ;;  %2744 = vlog2.f32 %v1900_v48  ;;  %v1824_v7 = vpop.f32.mrf.mxu1  ;;  %v2024_v55 = vmul.f32 0.6931472, %v2721_v21  ;;  %v1958_v51 = vmul.f32 0.6931472, %v2723_v11  ;;  %v2132_v63 = vsub.f32 %v3779_v40, %v2098_v26 }
 0x294   :  { %v3789_v0 = vpop.eup %2726  ;;  %v2195_v24 = vadd.f32 %v2194_v23, %v2162_v18  ;;  %v2020_v60 = vmul.f32 0.6931472, %v2725_v57  ;;  %v2130_v32 = vsub.f32 %v3763_v42, %v2096_v1  ;;  %2746 = vlog2.f32 %v1905_v12 }
 0x295   :  { %v2729_v47 = vpop.eup %2728  ;;  %v1903_v33 = vmax.f32 %v1824_v7, 1e-05  ;;  %v2432_v17 = vpop.f32.mrf.mxu1  ;;  %2748 = vlog2.f32 %v1871_v10  ;;  %v2165_v3 = vand.u32 2147483647, %v2131_v30  ;;  %v2101_v42 = vmul.f32 0.4342945, %v2024_v55 }
 0x296   :  { %v2731_v53 = vpop.eup %2730  ;;  %v2196_v16 = vadd.f32 %v2195_v24, %v2163_v29  ;;  %v2099_v62 = vmul.f32 0.4342945, %v2020_v60  ;;  %v2164_v22 = vand.u32 2147483647, %v2130_v32  ;;  %v2026_v61 = vmul.f32 0.6931472, %v2729_v47 }
 0x297   :  { %v3793_v5 = vpop.eup %2732  ;;  %2750 = vlog2.f32 %v1903_v33  ;;  %v1906_v25 = vmax.f32 %v2432_v17, 1e-05  ;;  %v1827_v36 = vpop.f32.mrf.mxu1  ;;  %v2066_v4 = vmul.f32 0.4342945, %v3774_v15  ;;  %v1960_v37 = vmul.f32 0.6931472, %v3781_v27 }
 0x298   :  { %v2735_v52 = vpop.eup %2734  ;;  %2752 = vlog2.f32 %v1872_v46  ;;  %v1904_v39 = vmax.f32 %v1827_v36, 1e-05  ;;  %v2197_v34 = vadd.f32 %v2196_v16, %v2164_v22  ;;  %v2133_v58 = vsub.f32 %v3769_v45, %v2099_v62 }
 0x299   :  { %v2022_v31 = vmul.f32 0.6931472, %v2735_v52  ;;  %2754 = vlog2.f32 %v1906_v25  ;;  %v2737_v2 = vpop.eup %2736  ;;  %v2067_v40 = vmul.f32 0.4342945, %v1956_v50  ;;  %v2166_v38 = vand.u32 2147483647, %v2132_v63 }
 0x29a   :  { %2756 = vlog2.f32 %v1904_v39  ;;  %v2198_v41 = vadd.f32 %v2197_v34, %v2165_v3  ;;  %v2102_v28 = vmul.f32 0.4342945, %v2026_v61  ;;  %v2068_v49 = vmul.f32 0.4342945, %v1958_v51 }
 0x29b   :  { %v2100_v14 = vmul.f32 0.4342945, %v2022_v31  ;;  %v2135_v19 = vsub.f32 %v2067_v40, %v2101_v42  ;;  %v2032_v20 = vmul.f32 0.6931472, %v2737_v2  ;;  %v2167_v43 = vand.u32 2147483647, %v2133_v58 }
 0x29c   :  { %v2739_v59 = vpop.eup %2738  ;;  %v2199_v45 = vadd.f32 %v2198_v41, %v2166_v38  ;;  %v2069_v44 = vmul.f32 0.4342945, %v1960_v37  ;;  %v1962_v15 = vmul.f32 0.6931472, %v3783_v54  ;;  %v1964_v27 = vmul.f32 0.6931472, %v2731_v53 }
 0x29d   :  { %v2741_v8 = vpop.eup %2740  ;;  %v2134_v6 = vsub.f32 %v2066_v4, %v2100_v14  ;;  %v2028_v35 = vmul.f32 0.6931472, %v2739_v59  ;;  %v2136_v21 = vsub.f32 %v2068_v49, %v2102_v28  ;;  %v2105_v11 = vmul.f32 0.4342945, %v2032_v20 }
 0x29e   :  { %v2743_v13 = vpop.eup %2742  ;;  %v2200_v50 = vadd.f32 %v2199_v45, %v2167_v43  ;;  %v1966_v9 = vmul.f32 0.6931472, %v2741_v8  ;;  %v2169_v18 = vand.u32 2147483647, %v2135_v19  ;;  %v2070_v1 = vmul.f32 0.4342945, %v1962_v15 }
 0x29f   :  { %v2168_v10 = vand.u32 2147483647, %v2134_v6  ;;  %v2103_v56 = vmul.f32 0.4342945, %v2028_v35  ;;  %v2034_v46 = vmul.f32 0.6931472, %v2743_v13 }
 0x2a0   :  { %v2745_v48 = vpop.eup %2744  ;;  %v1968_v12 = vmul.f32 0.6931472, %v3789_v0  ;;  %v2071_v7 = vmul.f32 0.4342945, %v1964_v27  ;;  %v2170_v54 = vand.u32 2147483647, %v2136_v21 }
 0x2a1   :  { %v2201_v23 = vadd.f32 %v2200_v50, %v2168_v10  ;;  %v2137_v26 = vsub.f32 %v2069_v44, %v2103_v56  ;;  %v2030_v57 = vmul.f32 0.6931472, %v2745_v48  ;;  %v2747_v30 = vpop.eup %2746  ;;  %v2106_v55 = vmul.f32 0.4342945, %v2034_v46 }
 0x2a2   :  { %v2749_v29 = vpop.eup %2748  ;;  %v2072_v51 = vmul.f32 0.4342945, %v1966_v9  ;;  %v2139_v32 = vsub.f32 %v2071_v7, %v2105_v11  ;;  %v2040_v63 = vmul.f32 0.6931472, %v2747_v30  ;;  %v2073_v61 = vmul.f32 0.4342945, %v1968_v12 }
 0x2a3   :  { %v2202_v24 = vadd.f32 %v2201_v23, %v2169_v18  ;;  %v2104_v60 = vmul.f32 0.4342945, %v2030_v57  ;;  %v2171_v33 = vand.u32 2147483647, %v2137_v26  ;;  %v1970_v25 = vmul.f32 0.6931472, %v3793_v5 }
 0x2a4   :  { %v2751_v47 = vpop.eup %2750  ;;  %v1972_v0 = vmul.f32 0.6931472, %v2749_v29  ;;  %v2140_v3 = vsub.f32 %v2072_v51, %v2106_v55  ;;  %v2173_v2 = vand.u32 2147483647, %v2139_v32  ;;  %v2109_v37 = vmul.f32 0.4342945, %v2040_v63 }
 0x2a5   :  { %v2753_v17 = vpop.eup %2752  ;;  %v2203_v53 = vadd.f32 %v2202_v24, %v2170_v54  ;;  %v2138_v16 = vsub.f32 %v2070_v1, %v2104_v60  ;;  %v2036_v62 = vmul.f32 0.6931472, %v2751_v47  ;;  %v2074_v38 = vmul.f32 0.4342945, %v1970_v25 }
 0x2a6   :  { %v2755_v22 = vpop.eup %2754  ;;  %v1974_v34 = vmul.f32 0.6931472, %v2753_v17  ;;  %v2075_v28 = vmul.f32 0.4342945, %v1972_v0  ;;  %v2174_v14 = vand.u32 2147483647, %v2140_v3  ;;  %v2218_v10 = vlaneseq }
 0x2a7   :  { %v2757_v36 = vpop.eup %2756  ;;  %v2204_v52 = vadd.f32 %v2203_v53, %v2171_v33  ;;  %v2172_v42 = vand.u32 2147483647, %v2138_v16  ;;  %v2107_v39 = vmul.f32 0.4342945, %v2036_v62  ;;  %v2042_v58 = vmul.f32 0.6931472, %v2755_v22 }
 0x2a8   :  { %v2038_v31 = vmul.f32 0.6931472, %v2757_v36  ;;  %v2076_v19 = vmul.f32 0.4342945, %v1974_v34  ;;  %v2143_v20 = vsub.f32 %v2075_v28, %v2109_v37  ;;  %v2219_v9 = vshrl.u32 %v2218_v10, 7 }
 0x2a9   :  { %v2205_v4 = vadd.f32 %v2204_v52, %v2172_v42  ;;  %v2141_v40 = vsub.f32 %v2073_v61, %v2107_v39  ;;  %v2110_v49 = vmul.f32 0.4342945, %v2042_v58 }
 0x2aa   :  { %v2108_v41 = vmul.f32 0.4342945, %v2038_v31  ;;  %v2177_v13 = vand.u32 2147483647, %v2143_v20  ;;  %vm2220_vm9 = vcmp.eq.s32.totalorder %v2219_v9, 0 }
 0x2ab   :  { %v2206_v59 = vadd.f32 %v2205_v4, %v2173_v2  ;;  %v2175_v8 = vand.u32 2147483647, %v2141_v40  ;;  %v2144_v35 = vsub.f32 %v2076_v19, %v2110_v49 }
 0x2ac   :  { %v2142_v5 = vsub.f32 %v2074_v38, %v2108_v41 }
 0x2ad   :  { %v2207_v43 = vadd.f32 %v2206_v59, %v2174_v14  ;;  %v2178_v15 = vand.u32 2147483647, %v2144_v35 }
 0x2ae   :  { %v2176_v45 = vand.u32 2147483647, %v2142_v5 }
 0x2af   :  { %v2208_v6 = vadd.f32 %v2207_v43, %v2175_v8 }
 0x2b1   :  { %v2209_v44 = vadd.f32 %v2208_v6, %v2176_v45 }
 0x2b3   :  { %v2210_v27 = vadd.f32 %v2209_v44, %v2177_v13 }
 0x2b5   :  { %v2211_v50 = vadd.f32 %v2210_v27, %v2178_v15 }
 0x2b7   :  { %v2212_v21 = vrot.slane %v2211_v50, 4 }
 0x2b9   :  { %v2213_v56 = vadd.f32 %v2212_v21, %v2211_v50 }
 0x2bb   :  { %v2214_v48 = vrot.slane %v2213_v56, 2 }
 0x2bd   :  { %v2215_v11 = vadd.f32 %v2214_v48, %v2213_v56 }
 0x2bf   :  { %v2216_v46 = vrot.slane %v2215_v11, 1 }
 0x2c1   :  { %v2217_v18 = vadd.f32 %v2216_v46, %v2215_v11 }
 0x2c3   :  { %v2221_v23 = vsel %vm2220_vm9, %v2217_v18, 0.0 }
 0x2c4   :  { %2222 = vst [vmem:[%s3808_s4] sm:$0xff] %v2221_v23 }

// kernel: _forward.5
= control target key start
LH: loop header
LB: loop body
LE: loop exit
PB: predicated region body
PF: predicated region fallthrough
CT: control target
= control target key end

     0   :  { %v1612_v1 = vmov 0   ;;  %vm192_vm0 = vcmask 523264   ;;  %s2123_s2 = inlined_call_operand.vmem [shape: bf16[64,256], index: 2, kind: input, shape index: {}]   ;;  %s2124_s0 = inlined_call_operand.vmem [shape: bf16[144,64], index: 0, kind: input, shape index: {}]   ;;  %s2125_s1 = inlined_call_operand.vmem [shape: bf16[144,64], index: 1, kind: input, shape index: {}]   ;;  %s2126_s3 = inlined_call_operand.vmem [shape: bf16[128,128], index: 3, kind: input, shape index: {}]   ;;  %s2127_s4 = inlined_call_operand.vmem [shape: f32[8,128], index: 4, kind: output, shape index: {}]  }
   0x1   :  { %v1430_v0 = vld [vmem:[%s2123_s2 + $0x34] ss:$8 sps:$4 sm:$0xff]   ;;  %279 = vmatprep.mubr.bf16.mxu0 %v1612_v1  ;;  %419 = vmatprep.mubr.bf16.mxu1 %v1612_v1  ;;  %v1432_v2 = vld [vmem:[%s2123_s2 + $0x30] ss:$8 sps:$4 sm:$0xff]   ;;  %v1433_v3 = vld [vmem:[%s2123_s2 + $0x24] ss:$8 sps:$4 sm:$0xff]  }
   0x2   :  { %255 = vmatprep.subr.bf16.mxu0 %v1430_v0  ;;  %1421 = vmatprep.subr.bf16.mxu1 %v1430_v0  ;;  %v1435_v4 = vld [vmem:[%s2123_s2 + $0x20] ss:$8 sps:$4 sm:$0xff]   ;;  %v1436_v5 = vld [vmem:[%s2123_s2 + $0x14] ss:$8 sps:$4 sm:$0xff]   ;;  %v1438_v6 = vld [vmem:[%s2123_s2 + $0x10] ss:$8 sps:$4 sm:$0xff]  }
   0x3   :  { %256 = vmatpush1.bf16.msra.mxu0 %v1432_v2  ;;  %1425 = vmatpush1.bf16.msra.mxu1 %v1432_v2  ;;  %v1439_v7 = vld [vmem:[%s2123_s2 + $0x4] ss:$8 sps:$4 sm:$0xff]   ;;  %v1441_v8 = vld [vmem:[%s2123_s2] ss:$8 sps:$4 sm:$0xff]   ;;  %v1454_v12 = vld [vmem:[%s2125_s1 + $0x30] sm:$0xff]  }
   0x4   :  { %257 = vmatprep.subr.bf16.mxu0 %v1433_v3  ;;  %1422 = vmatprep.subr.bf16.mxu1 %v1433_v3  ;;  %v1442_v9 = vld [vmem:[%s2124_s0] sm:$0xff]   ;;  %v1452_v10 = vld [vmem:[%s2125_s1 + $0x28] sm:$0xff]   ;;  %v1444_v13 = vld [vmem:[%s2124_s0 + $0x10] sm:$0xff]  }
   0x5   :  { %v1443_v11 = vld [vmem:[%s2124_s0 + $0x8] sm:$0xff]   ;;  %v1456_v14 = vld [vmem:[%s2125_s1 + $0x38] sm:$0xff]   ;;  %v1458_v16 = vld [vmem:[%s2125_s1 + $0x40] sm:$0xff]  }
   0x6   :  { %v1445_v15 = vld [vmem:[%s2124_s0 + $0x18] sm:$0xff]   ;;  %v1446_v17 = vld [vmem:[%s2124_s0 + $0x20] sm:$0xff]   ;;  %v1447_v18 = vld [vmem:[%s2124_s0 + $0x28] sm:$0xff]  }
   0x7   :  { %258 = vmatpush1.bf16.msra.mxu0 %v1435_v4  ;;  %1426 = vmatpush1.bf16.msra.mxu1 %v1435_v4  ;;  %v1448_v19 = vld [vmem:[%s2124_s0 + $0x30] sm:$0xff]   ;;  %v1449_v20 = vld [vmem:[%s2124_s0 + $0x38] sm:$0xff]   ;;  %v1450_v21 = vld [vmem:[%s2124_s0 + $0x40] sm:$0xff]  }
   0x8   :  { %259 = vmatprep.subr.bf16.mxu0 %v1436_v5  ;;  %1423 = vmatprep.subr.bf16.mxu1 %v1436_v5  ;;  %v1451_v22 = vld [vmem:[%s2125_s1] sm:$0xff]   ;;  %v1460_v23 = vld [vmem:[%s2126_s3 + $0x38] sm:$0xff]   ;;  %v1461_v24 = vld [vmem:[%s2126_s3 + $0x30] sm:$0xff]  }
   0x9   :  { %v1453_v25 = vld [vmem:[%s2125_s1 + $0x8] sm:$0xff]   ;;  %v1463_v27 = vld [vmem:[%s2126_s3 + $0x20] sm:$0xff]   ;;  %v1455_v28 = vld [vmem:[%s2125_s1 + $0x10] sm:$0xff]  }
   0xa   :  { %v1462_v26 = vld [vmem:[%s2126_s3 + $0x28] sm:$0xff]   ;;  %v1464_v29 = vld [vmem:[%s2126_s3 + $0x18] sm:$0xff]   ;;  %v1465_v30 = vld [vmem:[%s2126_s3 + $0x10] sm:$0xff]  }
   0xb   :  { %260 = vmatpush1.bf16.msra.mxu0 %v1438_v6  ;;  %1427 = vmatpush1.bf16.msra.mxu1 %v1438_v6  ;;  %v1457_v31 = vld [vmem:[%s2125_s1 + $0x18] sm:$0xff]   ;;  %v1466_v32 = vld [vmem:[%s2126_s3 + $0x8] sm:$0xff]   ;;  %v1467_v33 = vld [vmem:[%s2126_s3] sm:$0xff]  }
   0xc   :  { %261 = vmatprep.subr.bf16.mxu0 %v1439_v7  ;;  %1424 = vmatprep.subr.bf16.mxu1 %v1439_v7  ;;  %v1459_v34 = vld [vmem:[%s2125_s1 + $0x20] sm:$0xff]  }
   0xf   :  { %262 = vmatpush1.bf16.msra.mxu0 %v1441_v8  ;;  %1428 = vmatpush1.bf16.msra.mxu1 %v1441_v8 }
  0x10   :  { %1369 = vmatprep.subr.bf16.mxu1 %v1460_v23 }
  0x12   :  { %1317 = vmatmul.mubr.msk.bf16.vlgmr.msra.gmra.mxu0 %vm192_vm0, %v1442_v9  ;;  %1331 = vmatmul.mubr.msk.bf16.vlgmr.msra.gmra.mxu1 %vm192_vm0, %v1452_v10 }
  0x13   :  { %289 = vmatprep.mubr.bf16.mxu0 %v1612_v1  ;;  %429 = vmatprep.mubr.bf16.mxu1 %v1612_v1 }
  0x14   :  { %1370 = vmatpush3.bf16.msra.mxu1 %v1460_v23 }
  0x15   :  { %1371 = vmatprep.subr.bf16.mxu1 %v1461_v24 }
  0x18   :  { %1372 = vmatpush3.bf16.msra.mxu1 %v1461_v24 }
  0x19   :  { %1373 = vmatprep.subr.bf16.mxu1 %v1462_v26 }
  0x1a   :  { %1318 = vmatmul.mubr.msk.bf16.gmra.mxu0 %vm192_vm0, %v1443_v11  ;;  %1332 = vmatmul.mubr.msk.bf16.gmra.mxu1 %vm192_vm0, %v1454_v12 }
  0x1b   :  { %299 = vmatprep.mubr.bf16.mxu0 %v1612_v1  ;;  %439 = vmatprep.mubr.bf16.mxu1 %v1612_v1 }
  0x1c   :  { %1374 = vmatpush3.bf16.msra.mxu1 %v1462_v26 }
  0x1d   :  { %1375 = vmatprep.subr.bf16.mxu1 %v1463_v27 }
  0x20   :  { %1376 = vmatpush3.bf16.msra.mxu1 %v1463_v27 }
  0x21   :  { %1377 = vmatprep.subr.bf16.mxu1 %v1464_v29 }
  0x22   :  { %1319 = vmatmul.mubr.msk.bf16.gmra.mxu0 %vm192_vm0, %v1444_v13  ;;  %1333 = vmatmul.mubr.msk.bf16.gmra.mxu1 %vm192_vm0, %v1456_v14 }
  0x23   :  { %309 = vmatprep.mubr.bf16.mxu0 %v1612_v1  ;;  %449 = vmatprep.mubr.bf16.mxu1 %v1612_v1 }
  0x24   :  { %1378 = vmatpush3.bf16.msra.mxu1 %v1464_v29 }
  0x25   :  { %1379 = vmatprep.subr.bf16.mxu1 %v1465_v30 }
  0x28   :  { %1380 = vmatpush3.bf16.msra.mxu1 %v1465_v30 }
  0x29   :  { %1381 = vmatprep.subr.bf16.mxu1 %v1466_v32 }
  0x2a   :  { %1320 = vmatmul.mubr.msk.bf16.gmra.mxu0 %vm192_vm0, %v1445_v15  ;;  %1334 = vmatmul.mubr.msk.bf16.gmra.mxu1 %vm192_vm0, %v1458_v16 }
  0x2b   :  { %319 = vmatprep.mubr.bf16.mxu0 %v1612_v1 }
  0x2c   :  { %1382 = vmatpush3.bf16.msra.mxu1 %v1466_v32 }
  0x2d   :  { %1383 = vmatprep.subr.bf16.mxu1 %v1467_v33 }
  0x30   :  { %1384 = vmatpush3.bf16.msra.mxu1 %v1467_v33 }
  0x32   :  { %1321 = vmatmul.mubr.msk.bf16.gmra.mxu0 %vm192_vm0, %v1446_v17 }
  0x33   :  { %329 = vmatprep.mubr.bf16.mxu0 %v1612_v1 }
  0x3a   :  { %1322 = vmatmul.mubr.msk.bf16.gmra.mxu0 %vm192_vm0, %v1447_v18 }
  0x3b   :  { %339 = vmatprep.mubr.bf16.mxu0 %v1612_v1 }
  0x42   :  { %1323 = vmatmul.mubr.msk.bf16.gmra.mxu0 %vm192_vm0, %v1448_v19 }
  0x43   :  { %349 = vmatprep.mubr.bf16.mxu0 %v1612_v1 }
  0x4a   :  { %1324 = vmatmul.mubr.msk.bf16.gmra.mxu0 %vm192_vm0, %v1449_v20 }
  0x4b   :  { %359 = vmatprep.mubr.bf16.mxu0 %v1612_v1 }
  0x52   :  { %1325 = vmatmul.mubr.msk.bf16.gmra.mxu0 %vm192_vm0, %v1450_v21 }
  0x53   :  { %369 = vmatprep.mubr.bf16.mxu0 %v1612_v1 }
  0x5a   :  { %1326 = vmatmul.mubr.msk.bf16.gmra.mxu0 %vm192_vm0, %v1451_v22 }
  0x5b   :  { %379 = vmatprep.mubr.bf16.mxu0 %v1612_v1 }
  0x62   :  { %1327 = vmatmul.mubr.msk.bf16.gmra.mxu0 %vm192_vm0, %v1453_v25 }
  0x63   :  { %389 = vmatprep.mubr.bf16.mxu0 %v1612_v1 }
  0x6a   :  { %1328 = vmatmul.mubr.msk.bf16.gmra.mxu0 %vm192_vm0, %v1455_v28 }
  0x6b   :  { %399 = vmatprep.mubr.bf16.mxu0 %v1612_v1 }
  0x72   :  { %1329 = vmatmul.mubr.msk.bf16.gmra.mxu0 %vm192_vm0, %v1457_v31 }
  0x73   :  { %409 = vmatprep.mubr.bf16.mxu0 %v1612_v1 }
  0x7a   :  { %1330 = vmatmul.mubr.msk.bf16.gmra.mxu0 %vm192_vm0, %v1459_v34 }
  0xd2   :  { %v281_v35 = vpop.f32.mrf.mxu0 }
  0xd3   :  { %v460_v37 = vmul.f32 %v281_v35, %v281_v35 }
  0xd4   :  { %v283_v36 = vpop.f32.mrf.mxu0 }
  0xd5   :  { %v496_v38 = vmul.f32 %v283_v36, %v283_v36 }
  0xd6   :  { %v285_v39 = vpop.f32.mrf.mxu0 }
  0xd7   :  { %v532_v40 = vadd.f32 %v496_v38, %v460_v37  ;;  %v461_v42 = vmul.f32 %v285_v39, %v285_v39 }
  0xd8   :  { %v287_v41 = vpop.f32.mrf.mxu0 }
  0xd9   :  { %1468 = vrsqrt.f32 %v532_v40  ;;  %v497_v43 = vmul.f32 %v287_v41, %v287_v41  ;;  %vm570_vm1 = vcmp.eq.f32.partialorder %v532_v40, inf  ;;  %vm572_vm2 = vcmp.eq.f32.partialorder %v532_v40, 0.0 }
  0xda   :  { %v291_v44 = vpop.f32.mrf.mxu0  ;;  %v573_v8 = vand.u32 2147483648, %v532_v40 }
  0xdb   :  { %v533_v45 = vadd.f32 %v497_v43, %v461_v42  ;;  %v462_v47 = vmul.f32 %v291_v44, %v291_v44 }
  0xdc   :  { %v293_v46 = vpop.f32.mrf.mxu0 }
  0xdd   :  { %1470 = vrsqrt.f32 %v533_v45  ;;  %v498_v48 = vmul.f32 %v293_v46, %v293_v46  ;;  %vm577_vm3 = vcmp.eq.f32.partialorder %v533_v45, inf  ;;  %vm579_vm4 = vcmp.eq.f32.partialorder %v533_v45, 0.0 }
  0xde   :  { %v295_v49 = vpop.f32.mrf.mxu0  ;;  %v580_v9 = vand.u32 2147483648, %v533_v45 }
  0xdf   :  { %v1776_v50 = vadd.f32 %v498_v48, %v462_v47  ;;  %v463_v52 = vmul.f32 %v295_v49, %v295_v49 }
  0xe0   :  { %v297_v51 = vpop.f32.mrf.mxu0 }
  0xe1   :  { %1472 = vrsqrt.f32 %v1776_v50  ;;  %v499_v53 = vmul.f32 %v297_v51, %v297_v51  ;;  %vm584_vm5 = vcmp.eq.f32.partialorder %v1776_v50, inf  ;;  %vm586_vm6 = vcmp.eq.f32.partialorder %v1776_v50, 0.0 }
  0xe2   :  { %v301_v54 = vpop.f32.mrf.mxu0  ;;  %v587_v29 = vand.u32 2147483648, %v1776_v50 }
  0xe3   :  { %v535_v55 = vadd.f32 %v499_v53, %v463_v52  ;;  %v464_v57 = vmul.f32 %v301_v54, %v301_v54 }
  0xe4   :  { %v303_v56 = vpop.f32.mrf.mxu0 }
  0xe5   :  { %1474 = vrsqrt.f32 %v535_v55  ;;  %v500_v58 = vmul.f32 %v303_v56, %v303_v56  ;;  %vm591_vm7 = vcmp.eq.f32.partialorder %v535_v55, inf  ;;  %vm593_vm8 = vcmp.eq.f32.partialorder %v535_v55, 0.0 }
  0xe6   :  { %v1469_v59 = vpop.eup %1468  ;;  %v305_v60 = vpop.f32.mrf.mxu0  ;;  %v594_v30 = vand.u32 2147483648, %v535_v55 }
  0xe7   :  { %v1779_v61 = vadd.f32 %v500_v58, %v464_v57  ;;  %v569_v62 = vmul.f32 %v1469_v59, %v532_v40  ;;  %v465_v0 = vmul.f32 %v305_v60, %v305_v60 }
  0xe8   :  { %v307_v63 = vpop.f32.mrf.mxu0 }
  0xe9   :  { %1476 = vrsqrt.f32 %v1779_v61  ;;  %v501_v1 = vmul.f32 %v307_v63, %v307_v63  ;;  %v571_v5 = vsel %vm570_vm1, %v532_v40, %v569_v62  ;;  %vm598_vm9 = vcmp.eq.f32.partialorder %v1779_v61, inf }
  0xea   :  { %v1471_v2 = vpop.eup %1470  ;;  %v311_v3 = vpop.f32.mrf.mxu0  ;;  %v574_v15 = vsel %vm572_vm2, %v573_v8, %v571_v5  ;;  %vm600_vm10 = vcmp.eq.f32.partialorder %v1779_v61, 0.0 }
  0xeb   :  { %v1782_v4 = vadd.f32 %v501_v1, %v465_v0  ;;  %v576_v6 = vmul.f32 %v1471_v2, %v533_v45  ;;  %v466_v10 = vmul.f32 %v311_v3, %v311_v3 }
  0xec   :  { %v313_v7 = vpop.f32.mrf.mxu0 }
  0xed   :  { %1478 = vrsqrt.f32 %v1782_v4  ;;  %v502_v11 = vmul.f32 %v313_v7, %v313_v7  ;;  %v578_v12 = vsel %vm577_vm3, %v533_v45, %v576_v6  ;;  %vm605_vm11 = vcmp.eq.f32.partialorder %v1782_v4, inf }
  0xee   :  { %v1473_v13 = vpop.eup %1472  ;;  %v315_v14 = vpop.f32.mrf.mxu0  ;;  %v581_v16 = vsel %vm579_vm4, %v580_v9, %v578_v12  ;;  %vm607_vm12 = vcmp.eq.f32.partialorder %v1782_v4, 0.0  ;;  %v608_v51 = vand.u32 2147483648, %v1782_v4 }
  0xef   :  { %v1785_v17 = vadd.f32 %v502_v11, %v466_v10  ;;  %v820_v18 = vpack.c.bf16 %v581_v16, %v574_v15  ;;  %v583_v19 = vmul.f32 %v1473_v13, %v1776_v50  ;;  %v467_v21 = vmul.f32 %v315_v14, %v315_v14  ;;  %v1828_v12 = vpop.f32.mrf.mxu1 }
  0xf0   :  { %v317_v20 = vpop.f32.mrf.mxu0 }
  0xf1   :  { %1480 = vrsqrt.f32 %v1785_v17  ;;  %v503_v22 = vmul.f32 %v317_v20, %v317_v20  ;;  %1385 = vmatprep.mubr.bf16.mxu1 %v820_v18  ;;  %v585_v26 = vsel %vm584_vm5, %v1776_v50, %v583_v19  ;;  %v601_v50 = vand.u32 2147483648, %v1779_v61 }
  0xf2   :  { %v1475_v23 = vpop.eup %1474  ;;  %v321_v24 = vpop.f32.mrf.mxu0  ;;  %v588_v36 = vsel %vm586_vm6, %v587_v29, %v585_v26  ;;  %vm612_vm13 = vcmp.eq.f32.partialorder %v1785_v17, inf  ;;  %vm614_vm14 = vcmp.eq.f32.partialorder %v1785_v17, 0.0  ;;  %v615_v7 = vand.u32 2147483648, %v1785_v17 }
  0xf3   :  { %v1790_v25 = vadd.f32 %v503_v22, %v467_v21  ;;  %v590_v27 = vmul.f32 %v1475_v23, %v535_v55  ;;  %v468_v31 = vmul.f32 %v321_v24, %v321_v24  ;;  %v1834_v23 = vpop.f32.mrf.mxu1 }
  0xf4   :  { %v323_v28 = vpop.f32.mrf.mxu0 }
  0xf5   :  { %1482 = vrsqrt.f32 %v1790_v25  ;;  %v504_v32 = vmul.f32 %v323_v28, %v323_v28  ;;  %v592_v33 = vsel %vm591_vm7, %v535_v55, %v590_v27  ;;  %vm619_vm15 = vcmp.eq.f32.partialorder %v1790_v25, inf }
  0xf6   :  { %v1477_v34 = vpop.eup %1476  ;;  %v325_v35 = vpop.f32.mrf.mxu0  ;;  %v595_v37 = vsel %vm593_vm8, %v594_v30, %v592_v33  ;;  %vm621_vm0 = vcmp.eq.f32.partialorder %v1790_v25, 0.0  ;;  %v622_v8 = vand.u32 2147483648, %v1790_v25 }
  0xf7   :  { %v1796_v38 = vadd.f32 %v504_v32, %v468_v31  ;;  %v821_v39 = vpack.c.bf16 %v595_v37, %v588_v36  ;;  %v597_v40 = vmul.f32 %v1477_v34, %v1779_v61  ;;  %v469_v42 = vmul.f32 %v325_v35, %v325_v35  ;;  %v1848_v35 = vpop.f32.mrf.mxu1 }
  0xf8   :  { %v327_v41 = vpop.f32.mrf.mxu0 }
  0xf9   :  { %1484 = vrsqrt.f32 %v1796_v38  ;;  %v505_v43 = vmul.f32 %v327_v41, %v327_v41  ;;  %1386 = vmatmul.mubr.bf16.vlgmr.msra.gmra.mxu1 %v821_v39  ;;  %v599_v47 = vsel %vm598_vm9, %v1779_v61, %v597_v40  ;;  %vm626_vm1 = vcmp.eq.f32.partialorder %v1796_v38, inf }
  0xfa   :  { %v1479_v44 = vpop.eup %1478  ;;  %v331_v45 = vpop.f32.mrf.mxu0  ;;  %v602_v57 = vsel %vm600_vm10, %v601_v50, %v599_v47  ;;  %vm628_vm2 = vcmp.eq.f32.partialorder %v1796_v38, 0.0  ;;  %v629_v30 = vand.u32 2147483648, %v1796_v38 }
  0xfb   :  { %v1801_v46 = vadd.f32 %v505_v43, %v469_v42  ;;  %v604_v48 = vmul.f32 %v1479_v44, %v1782_v4  ;;  %v470_v52 = vmul.f32 %v331_v45, %v331_v45  ;;  %v1854_v47 = vpop.f32.mrf.mxu1 }
  0xfc   :  { %v333_v49 = vpop.f32.mrf.mxu0 }
  0xfd   :  { %1486 = vrsqrt.f32 %v1801_v46  ;;  %v506_v53 = vmul.f32 %v333_v49, %v333_v49  ;;  %v606_v54 = vsel %vm605_vm11, %v1782_v4, %v604_v48  ;;  %vm633_vm3 = vcmp.eq.f32.partialorder %v1801_v46, inf }
  0xfe   :  { %v1481_v55 = vpop.eup %1480  ;;  %v335_v56 = vpop.f32.mrf.mxu0  ;;  %v609_v58 = vsel %vm607_vm12, %v608_v51, %v606_v54  ;;  %vm635_vm4 = vcmp.eq.f32.partialorder %v1801_v46, 0.0  ;;  %v636_v31 = vand.u32 2147483648, %v1801_v46 }
  0xff   :  { %v1812_v59 = vadd.f32 %v506_v53, %v470_v52  ;;  %v822_v60 = vpack.c.bf16 %v609_v58, %v602_v57  ;;  %v611_v61 = vmul.f32 %v1481_v55, %v1785_v17  ;;  %v471_v63 = vmul.f32 %v335_v56, %v335_v56  ;;  %v1868_v58 = vpop.f32.mrf.mxu1 }
 0x100   :  { %v337_v62 = vpop.f32.mrf.mxu0 }
 0x101   :  { %1488 = vrsqrt.f32 %v1812_v59  ;;  %v507_v0 = vmul.f32 %v337_v62, %v337_v62  ;;  %1389 = vmatprep.mubr.bf16.mxu1 %v822_v60  ;;  %v613_v4 = vsel %vm612_vm13, %v1785_v17, %v611_v61  ;;  %vm640_vm5 = vcmp.eq.f32.partialorder %v1812_v59, inf }
 0x102   :  { %v1483_v1 = vpop.eup %1482  ;;  %v341_v2 = vpop.f32.mrf.mxu0  ;;  %v616_v15 = vsel %vm614_vm14, %v615_v7, %v613_v4  ;;  %vm642_vm6 = vcmp.eq.f32.partialorder %v1812_v59, 0.0  ;;  %v643_v53 = vand.u32 2147483648, %v1812_v59 }
 0x103   :  { %v1817_v3 = vadd.f32 %v507_v0, %v471_v63  ;;  %v618_v5 = vmul.f32 %v1483_v1, %v1790_v25  ;;  %v472_v9 = vmul.f32 %v341_v2, %v341_v2 }
 0x104   :  { %v343_v6 = vpop.f32.mrf.mxu0 }
 0x105   :  { %1490 = vrsqrt.f32 %v1817_v3  ;;  %v508_v10 = vmul.f32 %v343_v6, %v343_v6  ;;  %v620_v11 = vsel %vm619_vm15, %v1790_v25, %v618_v5  ;;  %vm647_vm7 = vcmp.eq.f32.partialorder %v1817_v3, inf  ;;  %v1874_v6 = vpop.f32.mrf.mxu1 }
 0x106   :  { %v1485_v13 = vpop.eup %1484  ;;  %v345_v14 = vpop.f32.mrf.mxu0  ;;  %v623_v16 = vsel %vm621_vm0, %v622_v8, %v620_v11  ;;  %vm649_vm8 = vcmp.eq.f32.partialorder %v1817_v3, 0.0  ;;  %v650_v54 = vand.u32 2147483648, %v1817_v3 }
 0x107   :  { %v1830_v18 = vadd.f32 %v508_v10, %v472_v9  ;;  %v823_v17 = vpack.c.bf16 %v623_v16, %v616_v15  ;;  %v625_v19 = vmul.f32 %v1485_v13, %v1796_v38  ;;  %v473_v21 = vmul.f32 %v345_v14, %v345_v14 }
 0x108   :  { %v347_v20 = vpop.f32.mrf.mxu0 }
 0x109   :  { %1492 = vrsqrt.f32 %v1830_v18  ;;  %v509_v22 = vmul.f32 %v347_v20, %v347_v20  ;;  %1390 = vmatmul.mubr.bf16.gmra.mxu1 %v823_v17  ;;  %v627_v27 = vsel %vm626_vm1, %v1796_v38, %v625_v19  ;;  %vm654_vm9 = vcmp.eq.f32.partialorder %v1830_v18, inf  ;;  %v1888_v19 = vpop.f32.mrf.mxu1 }
 0x10a   :  { %v1487_v24 = vpop.eup %1486  ;;  %v351_v25 = vpop.f32.mrf.mxu0  ;;  %v630_v39 = vsel %vm628_vm2, %v629_v30, %v627_v27  ;;  %vm656_vm10 = vcmp.eq.f32.partialorder %v1830_v18, 0.0  ;;  %v657_v13 = vand.u32 2147483648, %v1830_v18 }
 0x10b   :  { %v1837_v26 = vadd.f32 %v509_v22, %v473_v21  ;;  %v632_v28 = vmul.f32 %v1487_v24, %v1801_v46  ;;  %v474_v32 = vmul.f32 %v351_v25, %v351_v25 }
 0x10c   :  { %v353_v29 = vpop.f32.mrf.mxu0 }
 0x10d   :  { %1494 = vrsqrt.f32 %v1837_v26  ;;  %v510_v33 = vmul.f32 %v353_v29, %v353_v29  ;;  %v634_v34 = vsel %vm633_vm3, %v1801_v46, %v632_v28  ;;  %vm661_vm11 = vcmp.eq.f32.partialorder %v1837_v26, inf }
 0x10e   :  { %v1489_v36 = vpop.eup %1488  ;;  %v355_v37 = vpop.f32.mrf.mxu0  ;;  %v637_v40 = vsel %vm635_vm4, %v636_v31, %v634_v34  ;;  %vm663_vm12 = vcmp.eq.f32.partialorder %v1837_v26, 0.0  ;;  %v664_v14 = vand.u32 2147483648, %v1837_v26 }
 0x10f   :  { %v1850_v41 = vadd.f32 %v510_v33, %v474_v32  ;;  %v824_v38 = vpack.c.bf16 %v637_v40, %v630_v39  ;;  %v639_v42 = vmul.f32 %v1489_v36, %v1812_v59  ;;  %v475_v44 = vmul.f32 %v355_v37, %v355_v37  ;;  %v1894_v31 = vpop.f32.mrf.mxu1 }
 0x110   :  { %v357_v43 = vpop.f32.mrf.mxu0 }
 0x111   :  { %1496 = vrsqrt.f32 %v1850_v41  ;;  %v511_v45 = vmul.f32 %v357_v43, %v357_v43  ;;  %1393 = vmatprep.mubr.bf16.mxu1 %v824_v38  ;;  %v641_v50 = vsel %vm640_vm5, %v1812_v59, %v639_v42  ;;  %vm668_vm13 = vcmp.eq.f32.partialorder %v1850_v41, inf }
 0x112   :  { %v1491_v46 = vpop.eup %1490  ;;  %v361_v48 = vpop.f32.mrf.mxu0  ;;  %v644_v62 = vsel %vm642_vm6, %v643_v53, %v641_v50  ;;  %vm670_vm14 = vcmp.eq.f32.partialorder %v1850_v41, 0.0  ;;  %v671_v39 = vand.u32 2147483648, %v1850_v41 }
 0x113   :  { %v1857_v49 = vadd.f32 %v511_v45, %v475_v44  ;;  %v646_v51 = vmul.f32 %v1491_v46, %v1817_v3  ;;  %v476_v55 = vmul.f32 %v361_v48, %v361_v48  ;;  %v1908_v44 = vpop.f32.mrf.mxu1 }
 0x114   :  { %v363_v52 = vpop.f32.mrf.mxu0 }
 0x115   :  { %1498 = vrsqrt.f32 %v1857_v49  ;;  %v512_v56 = vmul.f32 %v363_v52, %v363_v52  ;;  %v648_v57 = vsel %vm647_vm7, %v1817_v3, %v646_v51  ;;  %vm675_vm15 = vcmp.eq.f32.partialorder %v1857_v49, inf }
 0x116   :  { %v1493_v60 = vpop.eup %1492  ;;  %v365_v61 = vpop.f32.mrf.mxu0  ;;  %v651_v63 = vsel %vm649_vm8, %v650_v54, %v648_v57  ;;  %vm677_vm0 = vcmp.eq.f32.partialorder %v1857_v49, 0.0  ;;  %v678_v40 = vand.u32 2147483648, %v1857_v49  ;;  %v488_v54 = vmul.f32 %v1828_v12, %v1828_v12 }
 0x117   :  { %v1870_v0 = vadd.f32 %v512_v56, %v476_v55  ;;  %v825_v59 = vpack.c.bf16 %v651_v63, %v644_v62  ;;  %v653_v1 = vmul.f32 %v1493_v60, %v1830_v18  ;;  %v477_v4 = vmul.f32 %v365_v61, %v365_v61 }
 0x118   :  { %v367_v2 = vpop.f32.mrf.mxu0  ;;  %v524_v60 = vmul.f32 %v1834_v23, %v1834_v23  ;;  %v489_v61 = vmul.f32 %v1848_v35, %v1848_v35  ;;  %v525_v62 = vmul.f32 %v1854_v47, %v1854_v47 }
 0x119   :  { %1500 = vrsqrt.f32 %v1870_v0  ;;  %v513_v5 = vmul.f32 %v367_v2, %v367_v2  ;;  %1394 = vmatmul.mubr.bf16.gmra.mxu1 %v825_v59  ;;  %v655_v9 = vsel %vm654_vm9, %v1830_v18, %v653_v1  ;;  %vm682_vm1 = vcmp.eq.f32.partialorder %v1870_v0, inf }
 0x11a   :  { %v1495_v3 = vpop.eup %1494  ;;  %v371_v7 = vpop.f32.mrf.mxu0  ;;  %v658_v22 = vsel %vm656_vm10, %v657_v13, %v655_v9  ;;  %vm684_vm2 = vcmp.eq.f32.partialorder %v1870_v0, 0.0  ;;  %v685_v23 = vand.u32 2147483648, %v1870_v0  ;;  %v490_v9 = vmul.f32 %v1868_v58, %v1868_v58 }
 0x11b   :  { %v1877_v8 = vadd.f32 %v513_v5, %v477_v4  ;;  %v660_v10 = vmul.f32 %v1495_v3, %v1837_v26  ;;  %v478_v15 = vmul.f32 %v371_v7, %v371_v7 }
 0x11c   :  { %v373_v11 = vpop.f32.mrf.mxu0 }
 0x11d   :  { %1502 = vrsqrt.f32 %v1877_v8  ;;  %v514_v16 = vmul.f32 %v373_v11, %v373_v11  ;;  %v662_v17 = vsel %vm661_vm11, %v1837_v26, %v660_v10  ;;  %vm689_vm3 = vcmp.eq.f32.partialorder %v1877_v8, inf }
 0x11e   :  { %v1497_v20 = vpop.eup %1496  ;;  %v375_v21 = vpop.f32.mrf.mxu0  ;;  %v665_v24 = vsel %vm663_vm12, %v664_v14, %v662_v17  ;;  %vm691_vm4 = vcmp.eq.f32.partialorder %v1877_v8, 0.0  ;;  %v692_v35 = vand.u32 2147483648, %v1877_v8  ;;  %v526_v10 = vmul.f32 %v1874_v6, %v1874_v6 }
 0x11f   :  { %v1890_v25 = vadd.f32 %v514_v16, %v478_v15  ;;  %v826_v18 = vpack.c.bf16 %v665_v24, %v658_v22  ;;  %v667_v27 = vmul.f32 %v1497_v20, %v1850_v41  ;;  %v479_v29 = vmul.f32 %v375_v21, %v375_v21 }
 0x120   :  { %v377_v28 = vpop.f32.mrf.mxu0  ;;  %v1945_v20 = vadd.f32 %v524_v60, %v488_v54  ;;  %v1947_v21 = vadd.f32 %v525_v62, %v489_v61 }
 0x121   :  { %1504 = vrsqrt.f32 %v1890_v25  ;;  %v515_v30 = vmul.f32 %v377_v28, %v377_v28  ;;  %1397 = vmatprep.mubr.bf16.mxu1 %v826_v18  ;;  %v669_v34 = vsel %vm668_vm13, %v1850_v41, %v667_v27  ;;  %v491_v18 = vmul.f32 %v1888_v19, %v1888_v19 }
 0x122   :  { %v1499_v26 = vpop.eup %1498  ;;  %v381_v32 = vpop.f32.mrf.mxu0  ;;  %v672_v48 = vsel %vm670_vm14, %v671_v39, %v669_v34  ;;  %v527_v27 = vmul.f32 %v1894_v31, %v1894_v31  ;;  %vm696_vm5 = vcmp.eq.f32.partialorder %v1890_v25, inf  ;;  %vm698_vm6 = vcmp.eq.f32.partialorder %v1890_v25, 0.0 }
 0x123   :  { %v1897_v33 = vadd.f32 %v515_v30, %v479_v29  ;;  %v674_v36 = vmul.f32 %v1499_v26, %v1857_v49  ;;  %v480_v38 = vmul.f32 %v381_v32, %v381_v32  ;;  %v699_v34 = vand.u32 2147483648, %v1890_v25 }
 0x124   :  { %v383_v37 = vpop.f32.mrf.mxu0 }
 0x125   :  { %1506 = vrsqrt.f32 %v1897_v33  ;;  %v516_v42 = vmul.f32 %v383_v37, %v383_v37  ;;  %v676_v43 = vsel %vm675_vm15, %v1857_v49, %v674_v36  ;;  %v443_v49 = vpop.f32.mrf.mxu1  ;;  %vm703_vm7 = vcmp.eq.f32.partialorder %v1897_v33, inf }
 0x126   :  { %v1501_v45 = vpop.eup %1500  ;;  %v385_v46 = vpop.f32.mrf.mxu0  ;;  %v679_v50 = vsel %vm677_vm0, %v678_v40, %v676_v43  ;;  %vm705_vm8 = vcmp.eq.f32.partialorder %v1897_v33, 0.0  ;;  %v706_v19 = vand.u32 2147483648, %v1897_v33 }
 0x127   :  { %v1910_v51 = vadd.f32 %v516_v42, %v480_v38  ;;  %v827_v41 = vpack.c.bf16 %v679_v50, %v672_v48  ;;  %v681_v52 = vmul.f32 %v1501_v45, %v1870_v0  ;;  %v481_v55 = vmul.f32 %v385_v46, %v385_v46  ;;  %v1933_v5 = vpop.f32.mrf.mxu1 }
 0x128   :  { %v387_v53 = vpop.f32.mrf.mxu0  ;;  %v492_v38 = vmul.f32 %v1908_v44, %v1908_v44  ;;  %v528_v42 = vmul.f32 %v443_v49, %v443_v49 }
 0x129   :  { %1508 = vrsqrt.f32 %v1910_v51  ;;  %v517_v56 = vmul.f32 %v387_v53, %v387_v53  ;;  %1398 = vmatmul.mubr.bf16.gmra.mxu1 %v827_v41  ;;  %v683_v59 = vsel %vm682_vm1, %v1870_v0, %v681_v52  ;;  %v447_v6 = vpop.f32.mrf.mxu1  ;;  %v1950_v0 = vadd.f32 %v526_v10, %v490_v9 }
 0x12a   :  { %v1503_v57 = vpop.eup %1502  ;;  %v391_v63 = vpop.f32.mrf.mxu0  ;;  %v686_v13 = vsel %vm684_vm2, %v685_v23, %v683_v59  ;;  %vm710_vm9 = vcmp.eq.f32.partialorder %v1910_v51, inf  ;;  %vm712_vm10 = vcmp.eq.f32.partialorder %v1910_v51, 0.0  ;;  %v713_v62 = vand.u32 2147483648, %v1910_v51 }
 0x12b   :  { %v1923_v12 = vadd.f32 %v517_v56, %v481_v55  ;;  %v688_v1 = vmul.f32 %v1503_v57, %v1877_v8  ;;  %v482_v47 = vmul.f32 %v391_v63, %v391_v63  ;;  %v451_v37 = vpop.f32.mrf.mxu1  ;;  %v1981_v55 = vadd.f32 %v528_v42, %v492_v38 }
 0x12c   :  { %v393_v2 = vpop.f32.mrf.mxu0  ;;  %vm766_vm2 = vcmp.eq.f32.partialorder %v1945_v20, inf }
 0x12d   :  { %1510 = vrsqrt.f32 %v1923_v12  ;;  %v518_v4 = vmul.f32 %v393_v2, %v393_v2  ;;  %v690_v3 = vsel %vm689_vm3, %v1877_v8, %v688_v1  ;;  %v453_v44 = vpop.f32.mrf.mxu1  ;;  %vm717_vm11 = vcmp.eq.f32.partialorder %v1923_v12, inf }
 0x12e   :  { %v1505_v7 = vpop.eup %1504  ;;  %v395_v11 = vpop.f32.mrf.mxu0  ;;  %v693_v14 = vsel %vm691_vm4, %v692_v35, %v690_v3  ;;  %vm719_vm12 = vcmp.eq.f32.partialorder %v1923_v12, 0.0  ;;  %v720_v63 = vand.u32 2147483648, %v1923_v12 }
 0x12f   :  { %v1942_v15 = vadd.f32 %v518_v4, %v482_v47  ;;  %v828_v16 = vpack.c.bf16 %v693_v14, %v686_v13  ;;  %v695_v17 = vmul.f32 %v1505_v7, %v1890_v25  ;;  %v483_v58 = vmul.f32 %v395_v11, %v395_v11  ;;  %v455_v59 = vpop.f32.mrf.mxu1 }
 0x130   :  { %v397_v8 = vpop.f32.mrf.mxu0  ;;  %v493_v47 = vmul.f32 %v1933_v5, %v1933_v5  ;;  %v529_v4 = vmul.f32 %v447_v6, %v447_v6 }
 0x131   :  { %1512 = vrsqrt.f32 %v1942_v15  ;;  %v519_v22 = vmul.f32 %v397_v8, %v397_v8  ;;  %1401 = vmatprep.mubr.bf16.mxu1 %v828_v16  ;;  %v697_v30 = vsel %vm696_vm5, %v1890_v25, %v695_v17  ;;  %v1979_v25 = vadd.f32 %v527_v27, %v491_v18  ;;  %v457_v14 = vpop.f32.mrf.mxu1 }
 0x132   :  { %v1507_v24 = vpop.eup %1506  ;;  %v401_v28 = vpop.f32.mrf.mxu0  ;;  %v700_v45 = vsel %vm698_vm6, %v699_v34, %v697_v30  ;;  %v494_v8 = vmul.f32 %v451_v37, %v451_v37  ;;  %vm724_vm13 = vcmp.eq.f32.partialorder %v1942_v15, inf  ;;  %v727_v30 = vand.u32 2147483648, %v1942_v15 }
 0x133   :  { %v1957_v29 = vadd.f32 %v519_v22, %v483_v58  ;;  %v702_v26 = vmul.f32 %v1507_v24, %v1897_v33  ;;  %v484_v31 = vmul.f32 %v401_v28, %v401_v28  ;;  %v530_v58 = vmul.f32 %v453_v44, %v453_v44 }
 0x134   :  { %v403_v32 = vpop.f32.mrf.mxu0  ;;  %v495_v22 = vmul.f32 %v455_v59, %v455_v59  ;;  %v531_v28 = vmul.f32 %v457_v14, %v457_v14  ;;  %vm726_vm15 = vcmp.eq.f32.partialorder %v1942_v15, 0.0  ;;  %vm773_vm6 = vcmp.eq.f32.partialorder %v1947_v21, inf }
 0x135   :  { %1514 = vrsqrt.f32 %v1957_v29  ;;  %v520_v36 = vmul.f32 %v403_v32, %v403_v32  ;;  %v704_v39 = vsel %vm703_vm7, %v1897_v33, %v702_v26  ;;  %vm731_vm14 = vcmp.eq.f32.partialorder %v1957_v29, inf }
 0x136   :  { %v1509_v40 = vpop.eup %1508  ;;  %v405_v43 = vpop.f32.mrf.mxu0  ;;  %v707_v46 = vsel %vm705_vm8, %v706_v19, %v704_v39  ;;  %1516 = vrsqrt.f32 %v1945_v20  ;;  %v734_v26 = vand.u32 2147483648, %v1957_v29  ;;  %vm733_vm0 = vcmp.eq.f32.partialorder %v1957_v29, 0.0 }
 0x137   :  { %v1973_v48 = vadd.f32 %v520_v36, %v484_v31  ;;  %v829_v50 = vpack.c.bf16 %v707_v46, %v700_v45  ;;  %v709_v41 = vmul.f32 %v1509_v40, %v1910_v51  ;;  %1518 = vrsqrt.f32 %v1947_v21 }
 0x138   :  { %v407_v33 = vpop.f32.mrf.mxu0  ;;  %v485_v52 = vmul.f32 %v405_v43, %v405_v43  ;;  %v2021_v38 = vadd.f32 %v530_v58, %v494_v8  ;;  %v2023_v42 = vadd.f32 %v531_v28, %v495_v22  ;;  %vm768_vm7 = vcmp.eq.f32.partialorder %v1945_v20, 0.0 }
 0x139   :  { %1520 = vrsqrt.f32 %v1973_v48  ;;  %v521_v53 = vmul.f32 %v407_v33, %v407_v33  ;;  %1402 = vmatmul.mubr.bf16.gmra.mxu1 %v829_v50  ;;  %v711_v57 = vsel %vm710_vm9, %v1910_v51, %v709_v41  ;;  %v2005_v51 = vadd.f32 %v529_v4, %v493_v47 }
 0x13a   :  { %v1511_v54 = vpop.eup %1510  ;;  %1522 = vrsqrt.f32 %v1950_v0  ;;  %v411_v56 = vpop.f32.mrf.mxu0  ;;  %v714_v7 = vsel %vm712_vm10, %v713_v62, %v711_v57  ;;  %vm738_vm1 = vcmp.eq.f32.partialorder %v1973_v48, inf  ;;  %v741_v50 = vand.u32 2147483648, %v1973_v48 }
 0x13b   :  { %v1984_v49 = vadd.f32 %v521_v53, %v485_v52  ;;  %v716_v60 = vmul.f32 %v1511_v54, %v1923_v12  ;;  %v486_v1 = vmul.f32 %v411_v56, %v411_v56  ;;  %vm740_vm4 = vcmp.eq.f32.partialorder %v1973_v48, 0.0 }
 0x13c   :  { %v413_v61 = vpop.f32.mrf.mxu0  ;;  %vm775_vm8 = vcmp.eq.f32.partialorder %v1947_v21, 0.0  ;;  %vm780_vm10 = vcmp.eq.f32.partialorder %v1950_v0, inf  ;;  %v797_v58 = vand.u32 2147483648, %v1981_v55  ;;  %v804_v22 = vand.u32 2147483648, %v2005_v51 }
 0x13d   :  { %1524 = vrsqrt.f32 %v1984_v49  ;;  %v522_v2 = vmul.f32 %v413_v61, %v413_v61  ;;  %v718_v23 = vsel %vm717_vm11, %v1923_v12, %v716_v60  ;;  %vm745_vm3 = vcmp.eq.f32.partialorder %v1984_v49, inf }
 0x13e   :  { %v1513_v35 = vpop.eup %1512  ;;  %v415_v3 = vpop.f32.mrf.mxu0  ;;  %v721_v9 = vsel %vm719_vm12, %v720_v63, %v718_v23  ;;  %1526 = vrsqrt.f32 %v1979_v25  ;;  %v748_v41 = vand.u32 2147483648, %v1984_v49  ;;  %vm747_vm5 = vcmp.eq.f32.partialorder %v1984_v49, 0.0 }
 0x13f   :  { %v2000_v10 = vadd.f32 %v522_v2, %v486_v1  ;;  %v830_v11 = vpack.c.bf16 %v721_v9, %v714_v7  ;;  %v723_v13 = vmul.f32 %v1513_v35, %v1942_v15  ;;  %1528 = vrsqrt.f32 %v1981_v55 }
 0x140   :  { %v417_v12 = vpop.f32.mrf.mxu0  ;;  %v487_v5 = vmul.f32 %v415_v3, %v415_v3  ;;  %v769_v61 = vand.u32 2147483648, %v1945_v20  ;;  %vm787_vm11 = vcmp.eq.f32.partialorder %v1979_v25, inf }
 0x141   :  { %1530 = vrsqrt.f32 %v2000_v10  ;;  %v523_v16 = vmul.f32 %v417_v12, %v417_v12  ;;  %1405 = vmatprep.mubr.bf16.mxu1 %v830_v11  ;;  %v725_v24 = vsel %vm724_vm13, %v1942_v15, %v723_v13  ;;  %vm752_vm9 = vcmp.eq.f32.partialorder %v2000_v10, inf }
 0x142   :  { %v1515_v17 = vpop.eup %1514  ;;  %v728_v31 = vsel %vm726_vm15, %v727_v30, %v725_v24  ;;  %v755_v35 = vand.u32 2147483648, %v2000_v10  ;;  %vm754_vm13 = vcmp.eq.f32.partialorder %v2000_v10, 0.0  ;;  %vm782_vm15 = vcmp.eq.f32.partialorder %v1950_v0, 0.0 }
 0x143   :  { %v2008_v6 = vadd.f32 %v523_v16, %v487_v5  ;;  %v730_v18 = vmul.f32 %v1515_v17, %v1957_v29  ;;  %v1517_v27 = vpop.eup %1516  ;;  %v783_v5 = vand.u32 2147483648, %v1950_v0 }
 0x144   :  { %v1519_v32 = vpop.eup %1518  ;;  %v765_v45 = vmul.f32 %v1517_v27, %v1945_v20 }
 0x145   :  { %1532 = vrsqrt.f32 %v2008_v6  ;;  %v732_v34 = vsel %vm731_vm14, %v1957_v29, %v730_v18  ;;  %v772_v56 = vmul.f32 %v1519_v32, %v1947_v21  ;;  %vm759_vm12 = vcmp.eq.f32.partialorder %v2008_v6, inf }
 0x146   :  { %v1521_v19 = vpop.eup %1520  ;;  %1534 = vrsqrt.f32 %v2005_v51  ;;  %v735_v36 = vsel %vm733_vm0, %v734_v26, %v732_v34  ;;  %v762_v47 = vand.u32 2147483648, %v2008_v6  ;;  %vm761_vm14 = vcmp.eq.f32.partialorder %v2008_v6, 0.0 }
 0x147   :  { %v1523_v37 = vpop.eup %1522  ;;  %v831_v39 = vpack.c.bf16 %v735_v36, %v728_v31  ;;  %v737_v40 = vmul.f32 %v1521_v19, %v1973_v48  ;;  %1536 = vrsqrt.f32 %v2021_v38  ;;  %v774_v63 = vsel %vm773_vm6, %v1947_v21, %v772_v56 }
 0x148   :  { %1538 = vrsqrt.f32 %v2023_v42  ;;  %v779_v23 = vmul.f32 %v1523_v37, %v1950_v0  ;;  %vm794_vm0 = vcmp.eq.f32.partialorder %v1981_v55, inf  ;;  %vm815_vm6 = vcmp.eq.f32.partialorder %v2023_v42, inf }
 0x149   :  { %1406 = vmatmul.mubr.bf16.gmra.mxu1 %v831_v39  ;;  %v739_v15 = vsel %vm738_vm1, %v1973_v48, %v737_v40  ;;  %v767_v48 = vsel %vm766_vm2, %v1945_v20, %v765_v45  ;;  %vm801_vm1 = vcmp.eq.f32.partialorder %v2005_v51, inf  ;;  %vm789_vm2 = vcmp.eq.f32.partialorder %v1979_v25, 0.0 }
 0x14a   :  { %v1525_v43 = vpop.eup %1524  ;;  %v742_v53 = vsel %vm740_vm4, %v741_v50, %v739_v15  ;;  %v770_v20 = vsel %vm768_vm7, %v769_v61, %v767_v48  ;;  %v781_v17 = vsel %vm780_vm10, %v1950_v0, %v779_v23  ;;  %vm803_vm4 = vcmp.eq.f32.partialorder %v2005_v51, 0.0 }
 0x14b   :  { %v744_v29 = vmul.f32 %v1525_v43, %v1984_v49  ;;  %v1527_v46 = vpop.eup %1526  ;;  %v784_v27 = vsel %vm782_vm15, %v783_v5, %v781_v17  ;;  %v811_v19 = vand.u32 2147483648, %v2021_v38  ;;  %vm810_vm7 = vcmp.eq.f32.partialorder %v2021_v38, 0.0 }
 0x14c   :  { %v1529_v33 = vpop.eup %1528  ;;  %v786_v4 = vmul.f32 %v1527_v46, %v1979_v25 }
 0x14d   :  { %v746_v52 = vsel %vm745_vm3, %v1984_v49, %v744_v29  ;;  %v776_v49 = vand.u32 2147483648, %v1947_v21  ;;  %v793_v13 = vmul.f32 %v1529_v33, %v1981_v55  ;;  %v790_v21 = vand.u32 2147483648, %v1979_v25 }
 0x14e   :  { %v1531_v44 = vpop.eup %1530  ;;  %v749_v54 = vsel %vm747_vm5, %v748_v41, %v746_v52  ;;  %v788_v8 = vsel %vm787_vm11, %v1979_v25, %v786_v4  ;;  %vm796_vm3 = vcmp.eq.f32.partialorder %v1981_v55, 0.0  ;;  %vm808_vm5 = vcmp.eq.f32.partialorder %v2021_v38, inf }
 0x14f   :  { %v832_v57 = vpack.c.bf16 %v749_v54, %v742_v53  ;;  %v751_v60 = vmul.f32 %v1531_v44, %v2000_v10  ;;  %v777_v7 = vsel %vm775_vm8, %v776_v49, %v774_v63  ;;  %v795_v24 = vsel %vm794_vm0, %v1981_v55, %v793_v13 }
 0x150   :  { %v791_v28 = vsel %vm789_vm2, %v790_v21, %v788_v8  ;;  %v798_v30 = vsel %vm796_vm3, %v797_v58, %v795_v24  ;;  %vm817_vm8 = vcmp.eq.f32.partialorder %v2023_v42, 0.0 }
 0x151   :  { %1409 = vmatprep.mubr.bf16.mxu1 %v832_v57  ;;  %v753_v1 = vsel %vm752_vm9, %v2000_v10, %v751_v60  ;;  %v834_v10 = vpack.c.bf16 %v777_v7, %v770_v20  ;;  %v835_v34 = vpack.c.bf16 %v791_v28, %v784_v27 }
 0x152   :  { %v1533_v62 = vpop.eup %1532  ;;  %v756_v9 = vsel %vm754_vm13, %v755_v35, %v753_v1 }
 0x153   :  { %v1535_v59 = vpop.eup %1534  ;;  %v758_v2 = vmul.f32 %v1533_v62, %v2008_v6 }
 0x154   :  { %v800_v12 = vmul.f32 %v1535_v59, %v2005_v51  ;;  %v1537_v16 = vpop.eup %1536 }
 0x155   :  { %v760_v3 = vsel %vm759_vm12, %v2008_v6, %v758_v2  ;;  %v1539_v6 = vpop.eup %1538  ;;  %v807_v26 = vmul.f32 %v1537_v16, %v2021_v38 }
 0x156   :  { %v763_v11 = vsel %vm761_vm14, %v762_v47, %v760_v3  ;;  %v802_v18 = vsel %vm801_vm1, %v2005_v51, %v800_v12  ;;  %v814_v32 = vmul.f32 %v1539_v6, %v2023_v42  ;;  %v818_v51 = vand.u32 2147483648, %v2023_v42 }
 0x157   :  { %v833_v14 = vpack.c.bf16 %v763_v11, %v756_v9  ;;  %v805_v25 = vsel %vm803_vm4, %v804_v22, %v802_v18  ;;  %v809_v0 = vsel %vm808_vm5, %v2021_v38, %v807_v26 }
 0x158   :  { %v836_v55 = vpack.c.bf16 %v805_v25, %v798_v30  ;;  %v816_v31 = vsel %vm815_vm6, %v2023_v42, %v814_v32  ;;  %v812_v36 = vsel %vm810_vm7, %v811_v19, %v809_v0 }
 0x159   :  { %1410 = vmatmul.mubr.bf16.gmra.mxu1 %v833_v14  ;;  %v819_v37 = vsel %vm817_vm8, %v818_v51, %v816_v31 }
 0x15a   :  { %1413 = vmatprep.mubr.bf16.mxu1 %v834_v10  ;;  %v837_v39 = vpack.c.bf16 %v819_v37, %v812_v36 }
 0x161   :  { %1414 = vmatmul.mubr.bf16.gmra.mxu1 %v835_v34 }
 0x162   :  { %1417 = vmatprep.mubr.bf16.mxu1 %v836_v55 }
 0x169   :  { %1418 = vmatmul.mubr.bf16.gmra.mxu1 %v837_v39 }
 0x1b9   :  { %v1387_v40 = vpop.f32.mrf.mxu1 }
 0x1ba   :  { %v1081_v48 = vmax.f32 %v1387_v40, 1e-05 }
 0x1bb   :  { %v936_v43 = vpop.f32.mrf.mxu1 }
 0x1bc   :  { %1540 = vlog2.f32 %v1081_v48  ;;  %v1079_v59 = vmax.f32 %v936_v43, 1e-05 }
 0x1bd   :  { %v1388_v15 = vpop.f32.mrf.mxu1 }
 0x1be   :  { %v1082_v2 = vmax.f32 %v1388_v15, 1e-05 }
 0x1bf   :  { %v939_v29 = vpop.f32.mrf.mxu1 }
 0x1c0   :  { %v1080_v63 = vmax.f32 %v939_v29, 1e-05 }
 0x1c9   :  { %v1391_v45 = vpop.f32.mrf.mxu1  ;;  %v1541_v12 = vpop.eup %1540 }
 0x1ca   :  { %v1085_v14 = vmax.f32 %v1391_v45, 1e-05  ;;  %v1120_v26 = vmul.f32 0.6931472, %v1541_v12 }
 0x1cb   :  { %v952_v46 = vpop.f32.mrf.mxu1 }
 0x1cc   :  { %v1083_v47 = vmax.f32 %v952_v46, 1e-05 }
 0x1cd   :  { %v1392_v50 = vpop.f32.mrf.mxu1 }
 0x1ce   :  { %v1086_v5 = vmax.f32 %v1392_v50, 1e-05 }
 0x1cf   :  { %v955_v41 = vpop.f32.mrf.mxu1 }
 0x1d0   :  { %v1084_v13 = vmax.f32 %v955_v41, 1e-05 }
 0x1d9   :  { %v1395_v33 = vpop.f32.mrf.mxu1 }
 0x1da   :  { %v1089_v16 = vmax.f32 %v1395_v33, 1e-05 }
 0x1db   :  { %v968_v52 = vpop.f32.mrf.mxu1 }
 0x1dc   :  { %v1087_v8 = vmax.f32 %v968_v52, 1e-05  ;;  %v1189_v52 = vmul.f32 0.4342945, %v1120_v26 }
 0x1dd   :  { %v2096_v38 = vpop.f32.mrf.mxu1 }
 0x1de   :  { %v1090_v6 = vmax.f32 %v2096_v38, 1e-05 }
 0x1df   :  { %v2098_v44 = vpop.f32.mrf.mxu1 }
 0x1e0   :  { %v1088_v34 = vmax.f32 %v2098_v44, 1e-05 }
 0x1e9   :  { %v2100_v42 = vpop.f32.mrf.mxu1 }
 0x1ea   :  { %v1093_v36 = vmax.f32 %v2100_v42, 1e-05 }
 0x1eb   :  { %v2102_v53 = vpop.f32.mrf.mxu1 }
 0x1ec   :  { %v1091_v50 = vmax.f32 %v2102_v53, 1e-05 }
 0x1ed   :  { %v2104_v54 = vpop.f32.mrf.mxu1 }
 0x1ef   :  { %v2106_v56 = vpop.f32.mrf.mxu1 }
 0x1f0   :  { %v1092_v53 = vmax.f32 %v2106_v56, 1e-05 }
 0x1f9   :  { %v1403_v57 = vpop.f32.mrf.mxu1 }
 0x1fa   :  { %v1097_v62 = vmax.f32 %v1403_v57, 1e-05 }
 0x1fb   :  { %v2108_v60 = vpop.f32.mrf.mxu1 }
 0x1fd   :  { %v1404_v61 = vpop.f32.mrf.mxu1 }
 0x1fe   :  { %v1098_v49 = vmax.f32 %v1404_v61, 1e-05 }
 0x1ff   :  { %v2110_v1 = vpop.f32.mrf.mxu1 }
 0x200   :  { %1542 = vlog2.f32 %v1098_v49 }
 0x201   :  { %1544 = vlog2.f32 %v1097_v62 }
 0x202   :  { %1546 = vlog2.f32 %v1080_v63 }
 0x203   :  { %1548 = vlog2.f32 %v1079_v59 }
 0x204   :  { %1550 = vlog2.f32 %v1082_v2 }
 0x209   :  { %v1407_v20 = vpop.f32.mrf.mxu1 }
 0x20a   :  { %v1101_v3 = vmax.f32 %v1407_v20, 1e-05 }
 0x20b   :  { %v1016_v23 = vpop.f32.mrf.mxu1 }
 0x20c   :  { %v1099_v35 = vmax.f32 %v1016_v23, 1e-05 }
 0x20d   :  { %v1408_v4 = vpop.f32.mrf.mxu1  ;;  %v1543_v10 = vpop.eup %1542 }
 0x20e   :  { %1552 = vlog2.f32 %v1099_v35  ;;  %v1102_v9 = vmax.f32 %v1408_v4, 1e-05  ;;  %v1545_v21 = vpop.eup %1544  ;;  %v1154_v22 = vmul.f32 0.6931472, %v1543_v10 }
 0x20f   :  { %v1019_v7 = vpop.f32.mrf.mxu1  ;;  %1554 = vlog2.f32 %v1083_v47  ;;  %v1547_v17 = vpop.eup %1546  ;;  %v1152_v24 = vmul.f32 0.6931472, %v1545_v21 }
 0x210   :  { %v1100_v11 = vmax.f32 %v1019_v7, 1e-05  ;;  %1556 = vlog2.f32 %v1101_v3  ;;  %v1549_v58 = vpop.eup %1548  ;;  %v1118_v28 = vmul.f32 0.6931472, %v1547_v17  ;;  %v1206_v19 = vmul.f32 0.4342945, %v1154_v22 }
 0x211   :  { %v1551_v27 = vpop.eup %1550  ;;  %v1116_v32 = vmul.f32 0.6931472, %v1549_v58  ;;  %v1205_v37 = vmul.f32 0.4342945, %v1152_v24  ;;  %v1094_v7 = vmax.f32 %v2104_v54, 1e-05 }
 0x212   :  { %1558 = vlog2.f32 %v1100_v11  ;;  %v1122_v31 = vmul.f32 0.6931472, %v1551_v27  ;;  %v1188_v43 = vmul.f32 0.4342945, %v1118_v28 }
 0x213   :  { %1560 = vlog2.f32 %v1102_v9  ;;  %v1187_v46 = vmul.f32 0.4342945, %v1116_v32 }
 0x214   :  { %1562 = vlog2.f32 %v1084_v13  ;;  %v1224_v38 = vsub.f32 %v1188_v43, %v1206_v19  ;;  %v1190_v57 = vmul.f32 0.4342945, %v1122_v31 }
 0x215   :  { %1564 = vlog2.f32 %v1085_v14  ;;  %v1223_v42 = vsub.f32 %v1187_v46, %v1205_v37 }
 0x216   :  { %1566 = vlog2.f32 %v1086_v5  ;;  %v1242_v47 = vand.u32 2147483647, %v1224_v38 }
 0x217   :  { %1568 = vlog2.f32 %v1089_v16  ;;  %v1241_v9 = vand.u32 2147483647, %v1223_v42 }
 0x218   :  { %1570 = vlog2.f32 %v1087_v8  ;;  %v1095_v8 = vmax.f32 %v2108_v60, 1e-05  ;;  %v1096_v60 = vmax.f32 %v2110_v1, 1e-05 }
 0x219   :  { %v1411_v18 = vpop.f32.mrf.mxu1 }
 0x21a   :  { %v1105_v30 = vmax.f32 %v1411_v18, 1e-05 }
 0x21b   :  { %v1553_v25 = vpop.eup %1552  ;;  %v1032_v55 = vpop.f32.mrf.mxu1 }
 0x21c   :  { %v1156_v51 = vmul.f32 0.6931472, %v1553_v25  ;;  %1572 = vlog2.f32 %v1105_v30  ;;  %v1103_v0 = vmax.f32 %v1032_v55, 1e-05  ;;  %v1555_v40 = vpop.eup %1554 }
 0x21d   :  { %1574 = vlog2.f32 %v1090_v6  ;;  %v1412_v39 = vpop.f32.mrf.mxu1  ;;  %v1557_v45 = vpop.eup %1556  ;;  %v1124_v2 = vmul.f32 0.6931472, %v1555_v40  ;;  %v1259_v6 = vadd.f32 %v1242_v47, %v1241_v9 }
 0x21e   :  { %v1207_v15 = vmul.f32 0.4342945, %v1156_v51  ;;  %1576 = vlog2.f32 %v1103_v0  ;;  %v1106_v29 = vmax.f32 %v1412_v39, 1e-05  ;;  %v1160_v62 = vmul.f32 0.6931472, %v1557_v45 }
 0x21f   :  { %1578 = vlog2.f32 %v1088_v34  ;;  %v1035_v41 = vpop.f32.mrf.mxu1  ;;  %v1559_v33 = vpop.eup %1558  ;;  %v1191_v56 = vmul.f32 0.4342945, %v1124_v2 }
 0x220   :  { %1580 = vlog2.f32 %v1106_v29  ;;  %v1104_v44 = vmax.f32 %v1035_v41, 1e-05  ;;  %v1158_v61 = vmul.f32 0.6931472, %v1559_v33  ;;  %v1561_v49 = vpop.eup %1560  ;;  %v1225_v63 = vsub.f32 %v1189_v52, %v1207_v15 }
 0x221   :  { %1582 = vlog2.f32 %v1093_v36  ;;  %v1415_v48 = vpop.f32.mrf.mxu1  ;;  %v1563_v35 = vpop.eup %1562  ;;  %v1162_v11 = vmul.f32 0.6931472, %v1561_v49  ;;  %v1209_v10 = vmul.f32 0.4342945, %v1160_v62 }
 0x222   :  { %1584 = vlog2.f32 %v1104_v44  ;;  %v1109_v59 = vmax.f32 %v1415_v48, 1e-05  ;;  %v1208_v20 = vmul.f32 0.4342945, %v1158_v61  ;;  %v1565_v3 = vpop.eup %1564  ;;  %v1243_v5 = vand.u32 2147483647, %v1225_v63 }
 0x223   :  { %1586 = vlog2.f32 %v1091_v50  ;;  %v1048_v23 = vpop.f32.mrf.mxu1  ;;  %v1567_v14 = vpop.eup %1566  ;;  %v1126_v17 = vmul.f32 0.6931472, %v1563_v35  ;;  %v1128_v27 = vmul.f32 0.6931472, %v1565_v3  ;;  %v1210_v28 = vmul.f32 0.4342945, %v1162_v11 }
 0x224   :  { %1588 = vlog2.f32 %v1109_v59  ;;  %v1107_v4 = vmax.f32 %v1048_v23, 1e-05  ;;  %v1226_v13 = vsub.f32 %v1190_v57, %v1208_v20  ;;  %v1569_v16 = vpop.eup %1568  ;;  %v1227_v26 = vsub.f32 %v1191_v56, %v1209_v10 }
 0x225   :  { %v1416_v12 = vpop.f32.mrf.mxu1  ;;  %v1571_v22 = vpop.eup %1570  ;;  %v1260_v32 = vadd.f32 %v1259_v6, %v1243_v5  ;;  %v1130_v19 = vmul.f32 0.6931472, %v1567_v14  ;;  %v1192_v51 = vmul.f32 0.4342945, %v1126_v17  ;;  %v1193_v15 = vmul.f32 0.4342945, %v1128_v27 }
 0x226   :  { %1590 = vlog2.f32 %v1107_v4  ;;  %v1110_v21 = vmax.f32 %v1416_v12, 1e-05  ;;  %v1244_v24 = vand.u32 2147483647, %v1226_v13  ;;  %v1132_v29 = vmul.f32 0.6931472, %v1571_v22 }
 0x227   :  { %1592 = vlog2.f32 %v1092_v53  ;;  %v1051_v58 = vpop.f32.mrf.mxu1  ;;  %v1228_v45 = vsub.f32 %v1192_v51, %v1210_v28  ;;  %v1245_v41 = vand.u32 2147483647, %v1227_v26  ;;  %v1194_v44 = vmul.f32 0.4342945, %v1130_v19 }
 0x228   :  { %1594 = vlog2.f32 %v1110_v21  ;;  %v1108_v54 = vmax.f32 %v1051_v58, 1e-05  ;;  %v1261_v36 = vadd.f32 %v1260_v32, %v1244_v24  ;;  %v1195_v2 = vmul.f32 0.4342945, %v1132_v29 }
 0x229   :  { %v1573_v18 = vpop.eup %1572  ;;  %1596 = vlog2.f32 %v1094_v7  ;;  %v1419_v30 = vpop.f32.mrf.mxu1  ;;  %v1246_v53 = vand.u32 2147483647, %v1228_v45  ;;  %v1136_v3 = vmul.f32 0.6931472, %v1569_v16 }
 0x22a   :  { %v1575_v25 = vpop.eup %1574  ;;  %1598 = vlog2.f32 %v1108_v54  ;;  %v1113_v34 = vmax.f32 %v1419_v30, 1e-05  ;;  %v1168_v37 = vmul.f32 0.6931472, %v1573_v18  ;;  %v1262_v48 = vadd.f32 %v1261_v36, %v1245_v41 }
 0x22b   :  { %v1577_v55 = vpop.eup %1576  ;;  %1600 = vlog2.f32 %v1095_v8  ;;  %v1064_v0 = vpop.f32.mrf.mxu1  ;;  %v1138_v5 = vmul.f32 0.6931472, %v1575_v25  ;;  %v1197_v54 = vmul.f32 0.4342945, %v1136_v3 }
 0x22c   :  { %v1579_v31 = vpop.eup %1578  ;;  %v1164_v39 = vmul.f32 0.6931472, %v1577_v55  ;;  %v1111_v40 = vmax.f32 %v1064_v0, 1e-05  ;;  %1602 = vlog2.f32 %v1113_v34  ;;  %v1213_v49 = vmul.f32 0.4342945, %v1168_v37 }
 0x22d   :  { %v1581_v43 = vpop.eup %1580  ;;  %v1420_v46 = vpop.f32.mrf.mxu1  ;;  %v1134_v1 = vmul.f32 0.6931472, %v1579_v31  ;;  %v1263_v13 = vadd.f32 %v1262_v48, %v1246_v53  ;;  %v1198_v34 = vmul.f32 0.4342945, %v1138_v5 }
 0x22e   :  { %v1583_v50 = vpop.eup %1582  ;;  %v1211_v33 = vmul.f32 0.4342945, %v1164_v39  ;;  %v1170_v52 = vmul.f32 0.6931472, %v1581_v43  ;;  %1604 = vlog2.f32 %v1111_v40  ;;  %v1114_v57 = vmax.f32 %v1420_v46, 1e-05 }
 0x22f   :  { %v1585_v38 = vpop.eup %1584  ;;  %1606 = vlog2.f32 %v1096_v60  ;;  %v1067_v42 = vpop.f32.mrf.mxu1  ;;  %v1196_v7 = vmul.f32 0.4342945, %v1134_v1  ;;  %v1231_v11 = vsub.f32 %v1195_v2, %v1213_v49  ;;  %v1144_v55 = vmul.f32 0.6931472, %v1583_v50 }
 0x230   :  { %v1587_v61 = vpop.eup %1586  ;;  %v1229_v62 = vsub.f32 %v1193_v15, %v1211_v33  ;;  %v1166_v63 = vmul.f32 0.6931472, %v1585_v38  ;;  %1608 = vlog2.f32 %v1114_v57  ;;  %v1112_v20 = vmax.f32 %v1067_v42, 1e-05 }
 0x231   :  { %v1589_v59 = vpop.eup %1588  ;;  %v1214_v35 = vmul.f32 0.4342945, %v1170_v52  ;;  %v1140_v21 = vmul.f32 0.6931472, %v1587_v61  ;;  %v1249_v28 = vand.u32 2147483647, %v1231_v11 }
 0x232   :  { %v1247_v23 = vand.u32 2147483647, %v1229_v62  ;;  %v1212_v47 = vmul.f32 0.4342945, %v1166_v63  ;;  %1610 = vlog2.f32 %v1112_v20  ;;  %v1176_v14 = vmul.f32 0.6931472, %v1589_v59 }
 0x233   :  { %v1591_v4 = vpop.eup %1590  ;;  %v1232_v58 = vsub.f32 %v1196_v7, %v1214_v35  ;;  %v1199_v19 = vmul.f32 0.4342945, %v1140_v21  ;;  %v1201_v46 = vmul.f32 0.4342945, %v1144_v55 }
 0x234   :  { %v1593_v9 = vpop.eup %1592  ;;  %v1230_v12 = vsub.f32 %v1194_v44, %v1212_v47  ;;  %v1172_v56 = vmul.f32 0.6931472, %v1591_v4  ;;  %v1264_v8 = vadd.f32 %v1263_v13, %v1247_v23  ;;  %v1217_v26 = vmul.f32 0.4342945, %v1176_v14 }
 0x235   :  { %v1595_v10 = vpop.eup %1594  ;;  %v1142_v18 = vmul.f32 0.6931472, %v1593_v9  ;;  %v1250_v60 = vand.u32 2147483647, %v1232_v58 }
 0x236   :  { %v1597_v17 = vpop.eup %1596  ;;  %v1248_v22 = vand.u32 2147483647, %v1230_v12  ;;  %v1178_v6 = vmul.f32 0.6931472, %v1595_v10  ;;  %v1215_v16 = vmul.f32 0.4342945, %v1172_v56  ;;  %v1235_v43 = vsub.f32 %v1199_v19, %v1217_v26 }
 0x237   :  { %v1599_v24 = vpop.eup %1598  ;;  %v1200_v39 = vmul.f32 0.4342945, %v1142_v18  ;;  %v1146_v38 = vmul.f32 0.6931472, %v1597_v17 }
 0x238   :  { %v1601_v27 = vpop.eup %1600  ;;  %v1265_v30 = vadd.f32 %v1264_v8, %v1248_v22  ;;  %v1174_v32 = vmul.f32 0.6931472, %v1599_v24  ;;  %v1233_v25 = vsub.f32 %v1197_v54, %v1215_v16  ;;  %v1218_v31 = vmul.f32 0.4342945, %v1178_v6 }
 0x239   :  { %v1603_v51 = vpop.eup %1602  ;;  %v1148_v57 = vmul.f32 0.6931472, %v1601_v27  ;;  %v1253_v49 = vand.u32 2147483647, %v1235_v43  ;;  %v1202_v20 = vmul.f32 0.4342945, %v1146_v38  ;;  %v1282_v6 = vlaneseq }
 0x23a   :  { %v1266_v0 = vadd.f32 %v1265_v30, %v1249_v28  ;;  %v1216_v36 = vmul.f32 0.4342945, %v1174_v32  ;;  %v1251_v15 = vand.u32 2147483647, %v1233_v25  ;;  %v1184_v41 = vmul.f32 0.6931472, %v1603_v51 }
 0x23b   :  { %v1605_v37 = vpop.eup %1604  ;;  %v1236_v44 = vsub.f32 %v1200_v39, %v1218_v31  ;;  %v1203_v47 = vmul.f32 0.4342945, %v1148_v57  ;;  %v1283_v18 = vshrl.u32 %v1282_v6, 7 }
 0x23c   :  { %v1607_v40 = vpop.eup %1606  ;;  %v1267_v29 = vadd.f32 %v1266_v0, %v1250_v60  ;;  %v1234_v45 = vsub.f32 %v1198_v34, %v1216_v36  ;;  %v1180_v33 = vmul.f32 0.6931472, %v1605_v37  ;;  %v1221_v59 = vmul.f32 0.4342945, %v1184_v41 }
 0x23d   :  { %v1609_v52 = vpop.eup %1608  ;;  %v1150_v63 = vmul.f32 0.6931472, %v1607_v40  ;;  %v1254_v23 = vand.u32 2147483647, %v1236_v44  ;;  %vm1284_vm9 = vcmp.eq.s32.totalorder %v1283_v18, 0 }
 0x23e   :  { %v1268_v50 = vadd.f32 %v1267_v29, %v1251_v15  ;;  %v1252_v1 = vand.u32 2147483647, %v1234_v45  ;;  %v1219_v42 = vmul.f32 0.4342945, %v1180_v33  ;;  %v1186_v61 = vmul.f32 0.6931472, %v1609_v52 }
 0x23f   :  { %v1611_v48 = vpop.eup %1610  ;;  %v1204_v11 = vmul.f32 0.4342945, %v1150_v63  ;;  %v1239_v13 = vsub.f32 %v1203_v47, %v1221_v59 }
 0x240   :  { %v1269_v62 = vadd.f32 %v1268_v50, %v1252_v1  ;;  %v1237_v2 = vsub.f32 %v1201_v46, %v1219_v42  ;;  %v1182_v53 = vmul.f32 0.6931472, %v1611_v48  ;;  %v1222_v4 = vmul.f32 0.4342945, %v1186_v61 }
 0x241   :  { %v1257_v21 = vand.u32 2147483647, %v1239_v13 }
 0x242   :  { %v1270_v35 = vadd.f32 %v1269_v62, %v1253_v49  ;;  %v1220_v3 = vmul.f32 0.4342945, %v1182_v53  ;;  %v1255_v7 = vand.u32 2147483647, %v1237_v2  ;;  %v1240_v10 = vsub.f32 %v1204_v11, %v1222_v4 }
 0x244   :  { %v1271_v9 = vadd.f32 %v1270_v35, %v1254_v23  ;;  %v1238_v12 = vsub.f32 %v1202_v20, %v1220_v3  ;;  %v1258_v17 = vand.u32 2147483647, %v1240_v10 }
 0x246   :  { %v1272_v14 = vadd.f32 %v1271_v9, %v1255_v7  ;;  %v1256_v5 = vand.u32 2147483647, %v1238_v12 }
 0x248   :  { %v1273_v56 = vadd.f32 %v1272_v14, %v1256_v5 }
 0x24a   :  { %v1274_v8 = vadd.f32 %v1273_v56, %v1257_v21 }
 0x24c   :  { %v1275_v58 = vadd.f32 %v1274_v8, %v1258_v17 }
 0x24e   :  { %v1276_v22 = vrot.slane %v1275_v58, 4 }
 0x250   :  { %v1277_v24 = vadd.f32 %v1276_v22, %v1275_v58 }
 0x252   :  { %v1278_v54 = vrot.slane %v1277_v24, 2 }
 0x254   :  { %v1279_v16 = vadd.f32 %v1278_v54, %v1277_v24 }
 0x256   :  { %v1280_v27 = vrot.slane %v1279_v16, 1 }
 0x258   :  { %v1281_v28 = vadd.f32 %v1280_v27, %v1279_v16 }
 0x25a   :  { %v1285_v30 = vsel %vm1284_vm9, %v1281_v28, 0.0 }
 0x25b   :  { %1286 = vst [vmem:[%s2127_s4] sm:$0xff] %v1285_v30 }

// kernel: _forward.6
= control target key start
LH: loop header
LB: loop body
LE: loop exit
PB: predicated region body
PF: predicated region fallthrough
CT: control target
= control target key end

     0   :  { %v1049_v1 = vmov 0   ;;  %s1292_s2 = inlined_call_operand.vmem [shape: bf16[128,256], index: 2, kind: input, shape index: {}]   ;;  %s1293_s0 = inlined_call_operand.vmem [shape: bf16[80,128], index: 0, kind: input, shape index: {}]   ;;  %s1294_s1 = inlined_call_operand.vmem [shape: bf16[80,128], index: 1, kind: input, shape index: {}]   ;;  %s1295_s3 = inlined_call_operand.vmem [shape: bf16[128,128], index: 3, kind: input, shape index: {}]   ;;  %s1296_s4 = inlined_call_operand.vmem [shape: f32[8,128], index: 4, kind: output, shape index: {}]  }
   0x1   :  { %v927_v0 = vld [vmem:[%s1292_s2 + $0x74] ss:$8 sps:$4 sm:$0xff]   ;;  %226 = vmatprep.mubr.bf16.mxu0 %v1049_v1  ;;  %v929_v2 = vld [vmem:[%s1292_s2 + $0x70] ss:$8 sps:$4 sm:$0xff]   ;;  %v930_v3 = vld [vmem:[%s1292_s2 + $0x64] ss:$8 sps:$4 sm:$0xff]  }
   0x2   :  { %194 = vmatprep.subr.bf16.mxu0 %v927_v0  ;;  %v932_v4 = vld [vmem:[%s1292_s2 + $0x60] ss:$8 sps:$4 sm:$0xff]   ;;  %v933_v5 = vld [vmem:[%s1292_s2 + $0x54] ss:$8 sps:$4 sm:$0xff]   ;;  %v935_v6 = vld [vmem:[%s1292_s2 + $0x50] ss:$8 sps:$4 sm:$0xff]  }
   0x3   :  { %195 = vmatpush1.bf16.msra.mxu0 %v929_v2  ;;  %v936_v7 = vld [vmem:[%s1292_s2 + $0x44] ss:$8 sps:$4 sm:$0xff]   ;;  %v938_v8 = vld [vmem:[%s1292_s2 + $0x40] ss:$8 sps:$4 sm:$0xff]   ;;  %v939_v9 = vld [vmem:[%s1292_s2 + $0x34] ss:$8 sps:$4 sm:$0xff]  }
   0x4   :  { %196 = vmatprep.subr.bf16.mxu0 %v930_v3  ;;  %v941_v10 = vld [vmem:[%s1292_s2 + $0x30] ss:$8 sps:$4 sm:$0xff]   ;;  %v942_v11 = vld [vmem:[%s1292_s2 + $0x24] ss:$8 sps:$4 sm:$0xff]   ;;  %v944_v12 = vld [vmem:[%s1292_s2 + $0x20] ss:$8 sps:$4 sm:$0xff]  }
   0x5   :  { %v945_v13 = vld [vmem:[%s1292_s2 + $0x14] ss:$8 sps:$4 sm:$0xff]   ;;  %v947_v14 = vld [vmem:[%s1292_s2 + $0x10] ss:$8 sps:$4 sm:$0xff]   ;;  %v948_v15 = vld [vmem:[%s1292_s2 + $0x4] ss:$8 sps:$4 sm:$0xff]  }
   0x6   :  { %v950_v16 = vld [vmem:[%s1292_s2] ss:$8 sps:$4 sm:$0xff]   ;;  %v953_v19 = vld [vmem:[%s1293_s0 + $0x10] sm:$0xff]   ;;  %v954_v20 = vld [vmem:[%s1293_s0 + $0x18] sm:$0xff]  }
   0x7   :  { %197 = vmatpush1.bf16.msra.mxu0 %v932_v4  ;;  %v951_v17 = vld [vmem:[%s1293_s0] sm:$0xff]   ;;  %v952_v18 = vld [vmem:[%s1293_s0 + $0x8] sm:$0xff]   ;;  %v958_v24 = vld [vmem:[%s1294_s1 + $0x10] sm:$0xff]  }
   0x8   :  { %198 = vmatprep.subr.bf16.mxu0 %v933_v5  ;;  %v955_v21 = vld [vmem:[%s1293_s0 + $0x20] sm:$0xff]   ;;  %v957_v23 = vld [vmem:[%s1294_s1 + $0x8] sm:$0xff]   ;;  %v959_v25 = vld [vmem:[%s1294_s1 + $0x18] sm:$0xff]  }
   0x9   :  { %v956_v22 = vld [vmem:[%s1294_s1] sm:$0xff]   ;;  %v961_v27 = vld [vmem:[%s1295_s3 + $0x38] sm:$0xff]   ;;  %v962_v28 = vld [vmem:[%s1295_s3 + $0x30] sm:$0xff]  }
   0xa   :  { %v960_v26 = vld [vmem:[%s1294_s1 + $0x20] sm:$0xff]   ;;  %890 = vmatprep.subr.bf16.mxu1 %v961_v27  ;;  %v963_v29 = vld [vmem:[%s1295_s3 + $0x28] sm:$0xff]   ;;  %v965_v31 = vld [vmem:[%s1295_s3 + $0x18] sm:$0xff]  }
   0xb   :  { %199 = vmatpush1.bf16.msra.mxu0 %v935_v6  ;;  %891 = vmatpush3.bf16.msra.mxu1 %v961_v27  ;;  %v964_v30 = vld [vmem:[%s1295_s3 + $0x20] sm:$0xff]   ;;  %v966_v32 = vld [vmem:[%s1295_s3 + $0x10] sm:$0xff]   ;;  %v967_v33 = vld [vmem:[%s1295_s3 + $0x8] sm:$0xff]  }
   0xc   :  { %200 = vmatprep.subr.bf16.mxu0 %v936_v7  ;;  %892 = vmatprep.subr.bf16.mxu1 %v962_v28  ;;  %v968_v34 = vld [vmem:[%s1295_s3] sm:$0xff]  }
   0xf   :  { %201 = vmatpush1.bf16.msra.mxu0 %v938_v8  ;;  %893 = vmatpush3.bf16.msra.mxu1 %v962_v28 }
  0x10   :  { %202 = vmatprep.subr.bf16.mxu0 %v939_v9  ;;  %894 = vmatprep.subr.bf16.mxu1 %v963_v29 }
  0x13   :  { %203 = vmatpush1.bf16.msra.mxu0 %v941_v10  ;;  %895 = vmatpush3.bf16.msra.mxu1 %v963_v29 }
  0x14   :  { %204 = vmatprep.subr.bf16.mxu0 %v942_v11  ;;  %896 = vmatprep.subr.bf16.mxu1 %v964_v30 }
  0x17   :  { %205 = vmatpush1.bf16.msra.mxu0 %v944_v12  ;;  %897 = vmatpush3.bf16.msra.mxu1 %v964_v30 }
  0x18   :  { %206 = vmatprep.subr.bf16.mxu0 %v945_v13  ;;  %898 = vmatprep.subr.bf16.mxu1 %v965_v31 }
  0x1b   :  { %207 = vmatpush1.bf16.msra.mxu0 %v947_v14  ;;  %899 = vmatpush3.bf16.msra.mxu1 %v965_v31 }
  0x1c   :  { %208 = vmatprep.subr.bf16.mxu0 %v948_v15  ;;  %900 = vmatprep.subr.bf16.mxu1 %v966_v32 }
  0x1f   :  { %209 = vmatpush1.bf16.msra.mxu0 %v950_v16  ;;  %901 = vmatpush3.bf16.msra.mxu1 %v966_v32 }
  0x20   :  { %902 = vmatprep.subr.bf16.mxu1 %v967_v33 }
  0x22   :  { %227 = vmatmul.mubr.bf16.vlgmr.msra.gmra.mxu0 %v951_v17 }
  0x23   :  { %236 = vmatprep.mubr.bf16.mxu0 %v1049_v1  ;;  %903 = vmatpush3.bf16.msra.mxu1 %v967_v33 }
  0x24   :  { %904 = vmatprep.subr.bf16.mxu1 %v968_v34 }
  0x27   :  { %905 = vmatpush3.bf16.msra.mxu1 %v968_v34 }
  0x2a   :  { %237 = vmatmul.mubr.bf16.gmra.mxu0 %v952_v18 }
  0x2b   :  { %246 = vmatprep.mubr.bf16.mxu0 %v1049_v1 }
  0x32   :  { %247 = vmatmul.mubr.bf16.gmra.mxu0 %v953_v19 }
  0x33   :  { %256 = vmatprep.mubr.bf16.mxu0 %v1049_v1 }
  0x3a   :  { %257 = vmatmul.mubr.bf16.gmra.mxu0 %v954_v20 }
  0x3b   :  { %266 = vmatprep.mubr.bf16.mxu0 %v1049_v1 }
  0x42   :  { %267 = vmatmul.mubr.bf16.gmra.mxu0 %v955_v21 }
  0x43   :  { %276 = vmatprep.mubr.bf16.mxu0 %v1049_v1 }
  0x4a   :  { %277 = vmatmul.mubr.bf16.gmra.mxu0 %v956_v22 }
  0x4b   :  { %286 = vmatprep.mubr.bf16.mxu0 %v1049_v1 }
  0x52   :  { %287 = vmatmul.mubr.bf16.gmra.mxu0 %v957_v23 }
  0x53   :  { %296 = vmatprep.mubr.bf16.mxu0 %v1049_v1 }
  0x5a   :  { %297 = vmatmul.mubr.bf16.gmra.mxu0 %v958_v24 }
  0x5b   :  { %306 = vmatprep.mubr.bf16.mxu0 %v1049_v1 }
  0x62   :  { %307 = vmatmul.mubr.bf16.gmra.mxu0 %v959_v25 }
  0x63   :  { %316 = vmatprep.mubr.bf16.mxu0 %v1049_v1 }
  0x6a   :  { %317 = vmatmul.mubr.bf16.gmra.mxu0 %v960_v26 }
  0xe2   :  { %v228_v35 = vpop.f32.mrf.mxu0 }
  0xe3   :  { %v327_v37 = vmul.f32 %v228_v35, %v228_v35 }
  0xe4   :  { %v230_v36 = vpop.f32.mrf.mxu0 }
  0xe5   :  { %v347_v38 = vmul.f32 %v230_v36, %v230_v36 }
  0xe6   :  { %v232_v39 = vpop.f32.mrf.mxu0 }
  0xe7   :  { %v367_v40 = vadd.f32 %v347_v38, %v327_v37  ;;  %v328_v42 = vmul.f32 %v232_v39, %v232_v39 }
  0xe8   :  { %v234_v41 = vpop.f32.mrf.mxu0 }
  0xe9   :  { %969 = vrsqrt.f32 %v367_v40  ;;  %v348_v43 = vmul.f32 %v234_v41, %v234_v41  ;;  %vm389_vm0 = vcmp.eq.f32.partialorder %v367_v40, inf  ;;  %vm391_vm1 = vcmp.eq.f32.partialorder %v367_v40, 0.0 }
  0xea   :  { %v238_v44 = vpop.f32.mrf.mxu0  ;;  %v392_v8 = vand.u32 2147483648, %v367_v40 }
  0xeb   :  { %v368_v45 = vadd.f32 %v348_v43, %v328_v42  ;;  %v329_v47 = vmul.f32 %v238_v44, %v238_v44 }
  0xec   :  { %v240_v46 = vpop.f32.mrf.mxu0 }
  0xed   :  { %971 = vrsqrt.f32 %v368_v45  ;;  %v349_v48 = vmul.f32 %v240_v46, %v240_v46  ;;  %vm396_vm2 = vcmp.eq.f32.partialorder %v368_v45, inf  ;;  %vm398_vm3 = vcmp.eq.f32.partialorder %v368_v45, 0.0 }
  0xee   :  { %v242_v49 = vpop.f32.mrf.mxu0  ;;  %v399_v9 = vand.u32 2147483648, %v368_v45 }
  0xef   :  { %v1177_v50 = vadd.f32 %v349_v48, %v329_v47  ;;  %v330_v52 = vmul.f32 %v242_v49, %v242_v49 }
  0xf0   :  { %v244_v51 = vpop.f32.mrf.mxu0 }
  0xf1   :  { %973 = vrsqrt.f32 %v1177_v50  ;;  %v350_v53 = vmul.f32 %v244_v51, %v244_v51  ;;  %vm403_vm4 = vcmp.eq.f32.partialorder %v1177_v50, inf  ;;  %vm405_vm5 = vcmp.eq.f32.partialorder %v1177_v50, 0.0 }
  0xf2   :  { %v248_v54 = vpop.f32.mrf.mxu0  ;;  %v406_v29 = vand.u32 2147483648, %v1177_v50 }
  0xf3   :  { %v370_v55 = vadd.f32 %v350_v53, %v330_v52  ;;  %v331_v57 = vmul.f32 %v248_v54, %v248_v54 }
  0xf4   :  { %v250_v56 = vpop.f32.mrf.mxu0 }
  0xf5   :  { %975 = vrsqrt.f32 %v370_v55  ;;  %v351_v58 = vmul.f32 %v250_v56, %v250_v56  ;;  %vm410_vm6 = vcmp.eq.f32.partialorder %v370_v55, inf  ;;  %vm412_vm7 = vcmp.eq.f32.partialorder %v370_v55, 0.0 }
  0xf6   :  { %v970_v59 = vpop.eup %969  ;;  %v252_v60 = vpop.f32.mrf.mxu0  ;;  %v413_v30 = vand.u32 2147483648, %v370_v55 }
  0xf7   :  { %v1180_v61 = vadd.f32 %v351_v58, %v331_v57  ;;  %v388_v62 = vmul.f32 %v970_v59, %v367_v40  ;;  %v332_v0 = vmul.f32 %v252_v60, %v252_v60 }
  0xf8   :  { %v254_v63 = vpop.f32.mrf.mxu0 }
  0xf9   :  { %977 = vrsqrt.f32 %v1180_v61  ;;  %v352_v1 = vmul.f32 %v254_v63, %v254_v63  ;;  %v390_v5 = vsel %vm389_vm0, %v367_v40, %v388_v62  ;;  %vm417_vm8 = vcmp.eq.f32.partialorder %v1180_v61, inf }
  0xfa   :  { %v972_v2 = vpop.eup %971  ;;  %v258_v3 = vpop.f32.mrf.mxu0  ;;  %v393_v15 = vsel %vm391_vm1, %v392_v8, %v390_v5  ;;  %vm419_vm9 = vcmp.eq.f32.partialorder %v1180_v61, 0.0 }
  0xfb   :  { %v1183_v4 = vadd.f32 %v352_v1, %v332_v0  ;;  %v395_v6 = vmul.f32 %v972_v2, %v368_v45  ;;  %v333_v10 = vmul.f32 %v258_v3, %v258_v3 }
  0xfc   :  { %v260_v7 = vpop.f32.mrf.mxu0 }
  0xfd   :  { %979 = vrsqrt.f32 %v1183_v4  ;;  %v353_v11 = vmul.f32 %v260_v7, %v260_v7  ;;  %v397_v12 = vsel %vm396_vm2, %v368_v45, %v395_v6  ;;  %vm424_vm10 = vcmp.eq.f32.partialorder %v1183_v4, inf }
  0xfe   :  { %v974_v13 = vpop.eup %973  ;;  %v262_v14 = vpop.f32.mrf.mxu0  ;;  %v400_v16 = vsel %vm398_vm3, %v399_v9, %v397_v12  ;;  %vm426_vm11 = vcmp.eq.f32.partialorder %v1183_v4, 0.0  ;;  %v427_v51 = vand.u32 2147483648, %v1183_v4 }
  0xff   :  { %v1186_v17 = vadd.f32 %v353_v11, %v333_v10  ;;  %v527_v18 = vpack.c.bf16 %v400_v16, %v393_v15  ;;  %v402_v19 = vmul.f32 %v974_v13, %v1177_v50  ;;  %v334_v21 = vmul.f32 %v262_v14, %v262_v14 }
 0x100   :  { %v264_v20 = vpop.f32.mrf.mxu0 }
 0x101   :  { %981 = vrsqrt.f32 %v1186_v17  ;;  %v354_v22 = vmul.f32 %v264_v20, %v264_v20  ;;  %906 = vmatprep.mubr.bf16.mxu1 %v527_v18  ;;  %v404_v26 = vsel %vm403_vm4, %v1177_v50, %v402_v19  ;;  %v420_v50 = vand.u32 2147483648, %v1180_v61 }
 0x102   :  { %v976_v23 = vpop.eup %975  ;;  %v268_v24 = vpop.f32.mrf.mxu0  ;;  %v407_v36 = vsel %vm405_vm5, %v406_v29, %v404_v26  ;;  %vm431_vm12 = vcmp.eq.f32.partialorder %v1186_v17, inf  ;;  %vm433_vm13 = vcmp.eq.f32.partialorder %v1186_v17, 0.0  ;;  %v434_v7 = vand.u32 2147483648, %v1186_v17 }
 0x103   :  { %v1191_v25 = vadd.f32 %v354_v22, %v334_v21  ;;  %v409_v27 = vmul.f32 %v976_v23, %v370_v55  ;;  %v335_v31 = vmul.f32 %v268_v24, %v268_v24 }
 0x104   :  { %v270_v28 = vpop.f32.mrf.mxu0 }
 0x105   :  { %983 = vrsqrt.f32 %v1191_v25  ;;  %v355_v32 = vmul.f32 %v270_v28, %v270_v28  ;;  %v411_v33 = vsel %vm410_vm6, %v370_v55, %v409_v27  ;;  %vm438_vm14 = vcmp.eq.f32.partialorder %v1191_v25, inf }
 0x106   :  { %v978_v34 = vpop.eup %977  ;;  %v272_v35 = vpop.f32.mrf.mxu0  ;;  %v414_v37 = vsel %vm412_vm7, %v413_v30, %v411_v33  ;;  %vm440_vm15 = vcmp.eq.f32.partialorder %v1191_v25, 0.0  ;;  %v441_v8 = vand.u32 2147483648, %v1191_v25 }
 0x107   :  { %v1197_v38 = vadd.f32 %v355_v32, %v335_v31  ;;  %v528_v39 = vpack.c.bf16 %v414_v37, %v407_v36  ;;  %v416_v40 = vmul.f32 %v978_v34, %v1180_v61  ;;  %v336_v42 = vmul.f32 %v272_v35, %v272_v35 }
 0x108   :  { %v274_v41 = vpop.f32.mrf.mxu0 }
 0x109   :  { %985 = vrsqrt.f32 %v1197_v38  ;;  %v356_v43 = vmul.f32 %v274_v41, %v274_v41  ;;  %907 = vmatmul.mubr.bf16.vlgmr.msra.gmra.mxu1 %v528_v39  ;;  %v418_v47 = vsel %vm417_vm8, %v1180_v61, %v416_v40  ;;  %vm445_vm0 = vcmp.eq.f32.partialorder %v1197_v38, inf }
 0x10a   :  { %v980_v44 = vpop.eup %979  ;;  %v278_v45 = vpop.f32.mrf.mxu0  ;;  %v421_v57 = vsel %vm419_vm9, %v420_v50, %v418_v47  ;;  %vm447_vm1 = vcmp.eq.f32.partialorder %v1197_v38, 0.0  ;;  %v448_v28 = vand.u32 2147483648, %v1197_v38 }
 0x10b   :  { %v1202_v46 = vadd.f32 %v356_v43, %v336_v42  ;;  %v423_v48 = vmul.f32 %v980_v44, %v1183_v4  ;;  %v337_v52 = vmul.f32 %v278_v45, %v278_v45 }
 0x10c   :  { %v280_v49 = vpop.f32.mrf.mxu0 }
 0x10d   :  { %987 = vrsqrt.f32 %v1202_v46  ;;  %v357_v53 = vmul.f32 %v280_v49, %v280_v49  ;;  %v425_v54 = vsel %vm424_vm10, %v1183_v4, %v423_v48  ;;  %vm452_vm2 = vcmp.eq.f32.partialorder %v1202_v46, inf }
 0x10e   :  { %v982_v55 = vpop.eup %981  ;;  %v282_v56 = vpop.f32.mrf.mxu0  ;;  %v428_v58 = vsel %vm426_vm11, %v427_v51, %v425_v54  ;;  %vm454_vm3 = vcmp.eq.f32.partialorder %v1202_v46, 0.0  ;;  %v455_v29 = vand.u32 2147483648, %v1202_v46 }
 0x10f   :  { %v1213_v59 = vadd.f32 %v357_v53, %v337_v52  ;;  %v529_v60 = vpack.c.bf16 %v428_v58, %v421_v57  ;;  %v430_v61 = vmul.f32 %v982_v55, %v1186_v17  ;;  %v338_v63 = vmul.f32 %v282_v56, %v282_v56 }
 0x110   :  { %v284_v62 = vpop.f32.mrf.mxu0 }
 0x111   :  { %989 = vrsqrt.f32 %v1213_v59  ;;  %v358_v0 = vmul.f32 %v284_v62, %v284_v62  ;;  %910 = vmatprep.mubr.bf16.mxu1 %v529_v60  ;;  %v432_v4 = vsel %vm431_vm12, %v1186_v17, %v430_v61  ;;  %vm459_vm4 = vcmp.eq.f32.partialorder %v1213_v59, inf }
 0x112   :  { %v984_v1 = vpop.eup %983  ;;  %v288_v2 = vpop.f32.mrf.mxu0  ;;  %v435_v14 = vsel %vm433_vm13, %v434_v7, %v432_v4  ;;  %vm461_vm5 = vcmp.eq.f32.partialorder %v1213_v59, 0.0  ;;  %v462_v49 = vand.u32 2147483648, %v1213_v59 }
 0x113   :  { %v1218_v3 = vadd.f32 %v358_v0, %v338_v63  ;;  %v437_v5 = vmul.f32 %v984_v1, %v1191_v25  ;;  %v339_v9 = vmul.f32 %v288_v2, %v288_v2 }
 0x114   :  { %v290_v6 = vpop.f32.mrf.mxu0 }
 0x115   :  { %991 = vrsqrt.f32 %v1218_v3  ;;  %v359_v10 = vmul.f32 %v290_v6, %v290_v6  ;;  %v439_v11 = vsel %vm438_vm14, %v1191_v25, %v437_v5  ;;  %vm466_vm6 = vcmp.eq.f32.partialorder %v1218_v3, inf }
 0x116   :  { %v986_v12 = vpop.eup %985  ;;  %v292_v13 = vpop.f32.mrf.mxu0  ;;  %v442_v15 = vsel %vm440_vm15, %v441_v8, %v439_v11  ;;  %vm468_vm7 = vcmp.eq.f32.partialorder %v1218_v3, 0.0  ;;  %v469_v50 = vand.u32 2147483648, %v1218_v3 }
 0x117   :  { %v1229_v16 = vadd.f32 %v359_v10, %v339_v9  ;;  %v530_v18 = vpack.c.bf16 %v442_v15, %v435_v14  ;;  %v444_v17 = vmul.f32 %v986_v12, %v1197_v38  ;;  %v340_v20 = vmul.f32 %v292_v13, %v292_v13 }
 0x118   :  { %v294_v19 = vpop.f32.mrf.mxu0 }
 0x119   :  { %993 = vrsqrt.f32 %v1229_v16  ;;  %v360_v21 = vmul.f32 %v294_v19, %v294_v19  ;;  %911 = vmatmul.mubr.bf16.gmra.mxu1 %v530_v18  ;;  %v446_v25 = vsel %vm445_vm0, %v1197_v38, %v444_v17  ;;  %vm473_vm8 = vcmp.eq.f32.partialorder %v1229_v16, inf }
 0x11a   :  { %v988_v22 = vpop.eup %987  ;;  %v298_v23 = vpop.f32.mrf.mxu0  ;;  %v449_v35 = vsel %vm447_vm1, %v448_v28, %v446_v25  ;;  %vm475_vm9 = vcmp.eq.f32.partialorder %v1229_v16, 0.0  ;;  %v476_v6 = vand.u32 2147483648, %v1229_v16 }
 0x11b   :  { %v1234_v24 = vadd.f32 %v360_v21, %v340_v20  ;;  %v451_v26 = vmul.f32 %v988_v22, %v1202_v46  ;;  %v341_v30 = vmul.f32 %v298_v23, %v298_v23 }
 0x11c   :  { %v300_v27 = vpop.f32.mrf.mxu0 }
 0x11d   :  { %995 = vrsqrt.f32 %v1234_v24  ;;  %v361_v31 = vmul.f32 %v300_v27, %v300_v27  ;;  %v453_v32 = vsel %vm452_vm2, %v1202_v46, %v451_v26  ;;  %vm480_vm10 = vcmp.eq.f32.partialorder %v1234_v24, inf }
 0x11e   :  { %v990_v33 = vpop.eup %989  ;;  %v302_v34 = vpop.f32.mrf.mxu0  ;;  %v456_v36 = vsel %vm454_vm3, %v455_v29, %v453_v32  ;;  %vm482_vm11 = vcmp.eq.f32.partialorder %v1234_v24, 0.0  ;;  %v483_v7 = vand.u32 2147483648, %v1234_v24 }
 0x11f   :  { %v1245_v37 = vadd.f32 %v361_v31, %v341_v30  ;;  %v531_v39 = vpack.c.bf16 %v456_v36, %v449_v35  ;;  %v458_v38 = vmul.f32 %v990_v33, %v1213_v59  ;;  %v342_v41 = vmul.f32 %v302_v34, %v302_v34 }
 0x120   :  { %v304_v40 = vpop.f32.mrf.mxu0 }
 0x121   :  { %997 = vrsqrt.f32 %v1245_v37  ;;  %v362_v42 = vmul.f32 %v304_v40, %v304_v40  ;;  %914 = vmatprep.mubr.bf16.mxu1 %v531_v39  ;;  %v460_v46 = vsel %vm459_vm4, %v1213_v59, %v458_v38  ;;  %vm487_vm12 = vcmp.eq.f32.partialorder %v1245_v37, inf }
 0x122   :  { %v992_v43 = vpop.eup %991  ;;  %v308_v44 = vpop.f32.mrf.mxu0  ;;  %v463_v56 = vsel %vm461_vm5, %v462_v49, %v460_v46  ;;  %v490_v25 = vand.u32 2147483648, %v1245_v37  ;;  %vm489_vm14 = vcmp.eq.f32.partialorder %v1245_v37, 0.0 }
 0x123   :  { %v1250_v45 = vadd.f32 %v362_v42, %v342_v41  ;;  %v465_v47 = vmul.f32 %v992_v43, %v1218_v3  ;;  %v343_v51 = vmul.f32 %v308_v44, %v308_v44 }
 0x124   :  { %v310_v48 = vpop.f32.mrf.mxu0 }
 0x125   :  { %999 = vrsqrt.f32 %v1250_v45  ;;  %v363_v52 = vmul.f32 %v310_v48, %v310_v48  ;;  %v467_v53 = vsel %vm466_vm6, %v1218_v3, %v465_v47  ;;  %vm494_vm13 = vcmp.eq.f32.partialorder %v1250_v45, inf }
 0x126   :  { %v994_v54 = vpop.eup %993  ;;  %v312_v55 = vpop.f32.mrf.mxu0  ;;  %v470_v57 = vsel %vm468_vm7, %v469_v50, %v467_v53  ;;  %v497_v26 = vand.u32 2147483648, %v1250_v45  ;;  %vm496_vm15 = vcmp.eq.f32.partialorder %v1250_v45, 0.0 }
 0x127   :  { %v1261_v58 = vadd.f32 %v363_v52, %v343_v51  ;;  %v532_v60 = vpack.c.bf16 %v470_v57, %v463_v56  ;;  %v472_v59 = vmul.f32 %v994_v54, %v1229_v16  ;;  %v344_v62 = vmul.f32 %v312_v55, %v312_v55 }
 0x128   :  { %v314_v61 = vpop.f32.mrf.mxu0 }
 0x129   :  { %1001 = vrsqrt.f32 %v1261_v58  ;;  %v364_v63 = vmul.f32 %v314_v61, %v314_v61  ;;  %915 = vmatmul.mubr.bf16.gmra.mxu1 %v532_v60  ;;  %v474_v3 = vsel %vm473_vm8, %v1229_v16, %v472_v59  ;;  %vm501_vm0 = vcmp.eq.f32.partialorder %v1261_v58, inf }
 0x12a   :  { %v996_v0 = vpop.eup %995  ;;  %v318_v1 = vpop.f32.mrf.mxu0  ;;  %v477_v13 = vsel %vm475_vm9, %v476_v6, %v474_v3  ;;  %v504_v36 = vand.u32 2147483648, %v1261_v58  ;;  %vm503_vm2 = vcmp.eq.f32.partialorder %v1261_v58, 0.0 }
 0x12b   :  { %v384_v2 = vadd.f32 %v364_v63, %v344_v62  ;;  %v479_v4 = vmul.f32 %v996_v0, %v1234_v24  ;;  %v345_v8 = vmul.f32 %v318_v1, %v318_v1 }
 0x12c   :  { %v320_v5 = vpop.f32.mrf.mxu0 }
 0x12d   :  { %1003 = vrsqrt.f32 %v384_v2  ;;  %v365_v9 = vmul.f32 %v320_v5, %v320_v5  ;;  %v481_v10 = vsel %vm480_vm10, %v1234_v24, %v479_v4  ;;  %vm508_vm1 = vcmp.eq.f32.partialorder %v384_v2, inf }
 0x12e   :  { %v998_v11 = vpop.eup %997  ;;  %v322_v12 = vpop.f32.mrf.mxu0  ;;  %v484_v14 = vsel %vm482_vm11, %v483_v7, %v481_v10  ;;  %vm510_vm3 = vcmp.eq.f32.partialorder %v384_v2, 0.0 }
 0x12f   :  { %v385_v15 = vadd.f32 %v365_v9, %v345_v8  ;;  %v533_v18 = vpack.c.bf16 %v484_v14, %v477_v13  ;;  %v486_v17 = vmul.f32 %v998_v11, %v1245_v37  ;;  %v346_v19 = vmul.f32 %v322_v12, %v322_v12 }
 0x130   :  { %v324_v16 = vpop.f32.mrf.mxu0 }
 0x131   :  { %1005 = vrsqrt.f32 %v385_v15  ;;  %v366_v20 = vmul.f32 %v324_v16, %v324_v16  ;;  %918 = vmatprep.mubr.bf16.mxu1 %v533_v18  ;;  %v488_v23 = vsel %vm487_vm12, %v1245_v37, %v486_v17  ;;  %v511_v37 = vand.u32 2147483648, %v384_v2 }
 0x132   :  { %v1000_v21 = vpop.eup %999  ;;  %v491_v29 = vsel %vm489_vm14, %v490_v25, %v488_v23  ;;  %vm515_vm4 = vcmp.eq.f32.partialorder %v385_v15, inf  ;;  %v518_v47 = vand.u32 2147483648, %v385_v15  ;;  %vm517_vm6 = vcmp.eq.f32.partialorder %v385_v15, 0.0 }
 0x133   :  { %v386_v22 = vadd.f32 %v366_v20, %v346_v19  ;;  %v493_v24 = vmul.f32 %v1000_v21, %v1250_v45 }
 0x135   :  { %1007 = vrsqrt.f32 %v386_v22  ;;  %v495_v27 = vsel %vm494_vm13, %v1250_v45, %v493_v24  ;;  %vm522_vm5 = vcmp.eq.f32.partialorder %v386_v22, inf  ;;  %v525_v48 = vand.u32 2147483648, %v386_v22 }
 0x136   :  { %v1002_v28 = vpop.eup %1001  ;;  %v498_v30 = vsel %vm496_vm15, %v497_v26, %v495_v27  ;;  %vm524_vm7 = vcmp.eq.f32.partialorder %v386_v22, 0.0 }
 0x137   :  { %v534_v31 = vpack.c.bf16 %v498_v30, %v491_v29  ;;  %v500_v32 = vmul.f32 %v1002_v28, %v1261_v58 }
 0x139   :  { %919 = vmatmul.mubr.bf16.gmra.mxu1 %v534_v31  ;;  %v502_v34 = vsel %vm501_vm0, %v1261_v58, %v500_v32 }
 0x13a   :  { %v1004_v33 = vpop.eup %1003  ;;  %v505_v40 = vsel %vm503_vm2, %v504_v36, %v502_v34 }
 0x13b   :  { %v507_v35 = vmul.f32 %v1004_v33, %v384_v2 }
 0x13d   :  { %v509_v39 = vsel %vm508_vm1, %v384_v2, %v507_v35 }
 0x13e   :  { %v1006_v38 = vpop.eup %1005  ;;  %v512_v41 = vsel %vm510_vm3, %v511_v37, %v509_v39 }
 0x13f   :  { %v535_v42 = vpack.c.bf16 %v512_v41, %v505_v40  ;;  %v514_v43 = vmul.f32 %v1006_v38, %v385_v15 }
 0x141   :  { %922 = vmatprep.mubr.bf16.mxu1 %v535_v42  ;;  %v516_v45 = vsel %vm515_vm4, %v385_v15, %v514_v43 }
 0x142   :  { %v1008_v44 = vpop.eup %1007  ;;  %v519_v50 = vsel %vm517_vm6, %v518_v47, %v516_v45 }
 0x143   :  { %v521_v46 = vmul.f32 %v1008_v44, %v386_v22 }
 0x145   :  { %v523_v49 = vsel %vm522_vm5, %v386_v22, %v521_v46 }
 0x146   :  { %v526_v51 = vsel %vm524_vm7, %v525_v48, %v523_v49 }
 0x147   :  { %v536_v52 = vpack.c.bf16 %v526_v51, %v519_v50 }
 0x149   :  { %923 = vmatmul.mubr.bf16.gmra.mxu1 %v536_v52 }
 0x1c9   :  { %v908_v53 = vpop.f32.mrf.mxu1 }
 0x1ca   :  { %v716_v0 = vmax.f32 %v908_v53, 1e-05 }
 0x1cb   :  { %v635_v54 = vpop.f32.mrf.mxu1 }
 0x1cc   :  { %1009 = vlog2.f32 %v716_v0  ;;  %v714_v4 = vmax.f32 %v635_v54, 1e-05 }
 0x1cd   :  { %v909_v55 = vpop.f32.mrf.mxu1 }
 0x1ce   :  { %v717_v7 = vmax.f32 %v909_v55, 1e-05 }
 0x1cf   :  { %v638_v56 = vpop.f32.mrf.mxu1 }
 0x1d0   :  { %v715_v2 = vmax.f32 %v638_v56, 1e-05 }
 0x1d9   :  { %v912_v57 = vpop.f32.mrf.mxu1  ;;  %v1010_v17 = vpop.eup %1009 }
 0x1da   :  { %v720_v19 = vmax.f32 %v912_v57, 1e-05  ;;  %v739_v31 = vmul.f32 0.6931472, %v1010_v17 }
 0x1db   :  { %v651_v58 = vpop.f32.mrf.mxu1 }
 0x1dc   :  { %v718_v13 = vmax.f32 %v651_v58, 1e-05  ;;  %v776_v45 = vmul.f32 0.4342945, %v739_v31 }
 0x1dd   :  { %v913_v60 = vpop.f32.mrf.mxu1 }
 0x1de   :  { %v721_v22 = vmax.f32 %v913_v60, 1e-05 }
 0x1df   :  { %v654_v59 = vpop.f32.mrf.mxu1 }
 0x1e0   :  { %v719_v18 = vmax.f32 %v654_v59, 1e-05 }
 0x1e9   :  { %v916_v61 = vpop.f32.mrf.mxu1 }
 0x1ea   :  { %v724_v3 = vmax.f32 %v916_v61, 1e-05 }
 0x1eb   :  { %v667_v62 = vpop.f32.mrf.mxu1 }
 0x1ec   :  { %v722_v26 = vmax.f32 %v667_v62, 1e-05 }
 0x1ed   :  { %v917_v63 = vpop.f32.mrf.mxu1 }
 0x1ee   :  { %v725_v1 = vmax.f32 %v917_v63, 1e-05 }
 0x1ef   :  { %v670_v5 = vpop.f32.mrf.mxu1 }
 0x1f0   :  { %1011 = vlog2.f32 %v725_v1  ;;  %v723_v33 = vmax.f32 %v670_v5, 1e-05 }
 0x1f1   :  { %1013 = vlog2.f32 %v715_v2 }
 0x1f2   :  { %1015 = vlog2.f32 %v724_v3 }
 0x1f3   :  { %1017 = vlog2.f32 %v714_v4 }
 0x1f9   :  { %v920_v6 = vpop.f32.mrf.mxu1 }
 0x1fa   :  { %v728_v11 = vmax.f32 %v920_v6, 1e-05 }
 0x1fb   :  { %v683_v8 = vpop.f32.mrf.mxu1 }
 0x1fc   :  { %v726_v9 = vmax.f32 %v683_v8, 1e-05 }
 0x1fd   :  { %v921_v10 = vpop.f32.mrf.mxu1  ;;  %v1012_v16 = vpop.eup %1011 }
 0x1fe   :  { %1019 = vlog2.f32 %v726_v9  ;;  %v729_v14 = vmax.f32 %v921_v10, 1e-05  ;;  %v1014_v20 = vpop.eup %1013  ;;  %v757_v24 = vmul.f32 0.6931472, %v1012_v16 }
 0x1ff   :  { %1021 = vlog2.f32 %v717_v7  ;;  %v686_v12 = vpop.f32.mrf.mxu1  ;;  %v1016_v21 = vpop.eup %1015  ;;  %v737_v25 = vmul.f32 0.6931472, %v1014_v20 }
 0x200   :  { %v727_v15 = vmax.f32 %v686_v12, 1e-05  ;;  %1023 = vlog2.f32 %v728_v11  ;;  %v1018_v23 = vpop.eup %1017  ;;  %v755_v28 = vmul.f32 0.6931472, %v1016_v21  ;;  %v785_v36 = vmul.f32 0.4342945, %v757_v24 }
 0x201   :  { %v735_v32 = vmul.f32 0.6931472, %v1018_v23  ;;  %v775_v38 = vmul.f32 0.4342945, %v737_v25 }
 0x202   :  { %1025 = vlog2.f32 %v727_v15  ;;  %v784_v41 = vmul.f32 0.4342945, %v755_v28 }
 0x203   :  { %1027 = vlog2.f32 %v718_v13  ;;  %v774_v49 = vmul.f32 0.4342945, %v735_v32  ;;  %v795_v50 = vsub.f32 %v775_v38, %v785_v36 }
 0x204   :  { %1029 = vlog2.f32 %v729_v14 }
 0x205   :  { %1031 = vlog2.f32 %v719_v18  ;;  %v794_v55 = vsub.f32 %v774_v49, %v784_v41  ;;  %v805_v62 = vand.u32 2147483647, %v795_v50 }
 0x206   :  { %1033 = vlog2.f32 %v720_v19 }
 0x207   :  { %1035 = vlog2.f32 %v721_v22  ;;  %v804_v2 = vand.u32 2147483647, %v794_v55  ;;  %v829_v55 = vlaneseq }
 0x209   :  { %v924_v27 = vpop.f32.mrf.mxu1  ;;  %v814_v8 = vadd.f32 %v805_v62, %v804_v2 }
 0x20a   :  { %v732_v29 = vmax.f32 %v924_v27, 1e-05 }
 0x20b   :  { %v1020_v30 = vpop.eup %1019  ;;  %v699_v34 = vpop.f32.mrf.mxu1 }
 0x20c   :  { %v1022_v35 = vpop.eup %1021  ;;  %v759_v37 = vmul.f32 0.6931472, %v1020_v30  ;;  %1037 = vlog2.f32 %v732_v29  ;;  %v730_v39 = vmax.f32 %v699_v34, 1e-05 }
 0x20d   :  { %1039 = vlog2.f32 %v722_v26  ;;  %v925_v40 = vpop.f32.mrf.mxu1  ;;  %v1024_v44 = vpop.eup %1023  ;;  %v741_v46 = vmul.f32 0.6931472, %v1022_v35 }
 0x20e   :  { %v786_v42 = vmul.f32 0.4342945, %v759_v37  ;;  %1041 = vlog2.f32 %v730_v39  ;;  %v733_v43 = vmax.f32 %v925_v40, 1e-05  ;;  %v763_v56 = vmul.f32 0.6931472, %v1024_v44 }
 0x20f   :  { %1043 = vlog2.f32 %v723_v33  ;;  %v702_v47 = vpop.f32.mrf.mxu1  ;;  %v1026_v48 = vpop.eup %1025  ;;  %v777_v58 = vmul.f32 0.4342945, %v741_v46 }
 0x210   :  { %1045 = vlog2.f32 %v733_v43  ;;  %v731_v51 = vmax.f32 %v702_v47, 1e-05  ;;  %v1028_v52 = vpop.eup %1027  ;;  %v761_v53 = vmul.f32 0.6931472, %v1026_v48  ;;  %v796_v57 = vsub.f32 %v776_v45, %v786_v42 }
 0x211   :  { %v1030_v54 = vpop.eup %1029  ;;  %v743_v61 = vmul.f32 0.6931472, %v1028_v52  ;;  %v788_v3 = vmul.f32 0.4342945, %v763_v56 }
 0x212   :  { %1047 = vlog2.f32 %v731_v51  ;;  %v787_v60 = vmul.f32 0.4342945, %v761_v53  ;;  %v1032_v59 = vpop.eup %1031  ;;  %v765_v63 = vmul.f32 0.6931472, %v1030_v54  ;;  %v806_v4 = vand.u32 2147483647, %v796_v57 }
 0x213   :  { %v1034_v1 = vpop.eup %1033  ;;  %v745_v5 = vmul.f32 0.6931472, %v1032_v59  ;;  %v778_v7 = vmul.f32 0.4342945, %v743_v61 }
 0x214   :  { %v797_v0 = vsub.f32 %v777_v58, %v787_v60  ;;  %v1036_v6 = vpop.eup %1035  ;;  %v747_v11 = vmul.f32 0.6931472, %v1034_v1  ;;  %v789_v12 = vmul.f32 0.4342945, %v765_v63  ;;  %v815_v15 = vadd.f32 %v814_v8, %v806_v4 }
 0x215   :  { %v798_v14 = vsub.f32 %v778_v7, %v788_v3  ;;  %v779_v17 = vmul.f32 0.4342945, %v745_v5  ;;  %v749_v24 = vmul.f32 0.6931472, %v1036_v6  ;;  %v830_v58 = vshrl.u32 %v829_v55, 7 }
 0x216   :  { %v807_v9 = vand.u32 2147483647, %v797_v0  ;;  %v780_v23 = vmul.f32 0.4342945, %v747_v11 }
 0x217   :  { %v799_v26 = vsub.f32 %v779_v17, %v789_v12  ;;  %v808_v27 = vand.u32 2147483647, %v798_v14  ;;  %v781_v36 = vmul.f32 0.4342945, %v749_v24  ;;  %vm831_vm8 = vcmp.eq.s32.totalorder %v830_v58, 0 }
 0x218   :  { %v816_v19 = vadd.f32 %v815_v15, %v807_v9 }
 0x219   :  { %v1038_v10 = vpop.eup %1037  ;;  %v809_v39 = vand.u32 2147483647, %v799_v26 }
 0x21a   :  { %v1040_v13 = vpop.eup %1039  ;;  %v771_v20 = vmul.f32 0.6931472, %v1038_v10  ;;  %v817_v32 = vadd.f32 %v816_v19, %v808_v27 }
 0x21b   :  { %v1042_v18 = vpop.eup %1041  ;;  %v751_v25 = vmul.f32 0.6931472, %v1040_v13 }
 0x21c   :  { %v1044_v16 = vpop.eup %1043  ;;  %v767_v21 = vmul.f32 0.6931472, %v1042_v18  ;;  %v792_v33 = vmul.f32 0.4342945, %v771_v20  ;;  %v818_v44 = vadd.f32 %v817_v32, %v809_v39 }
 0x21d   :  { %v1046_v22 = vpop.eup %1045  ;;  %v753_v31 = vmul.f32 0.6931472, %v1044_v16  ;;  %v782_v37 = vmul.f32 0.4342945, %v751_v25 }
 0x21e   :  { %v790_v28 = vmul.f32 0.4342945, %v767_v21  ;;  %v773_v29 = vmul.f32 0.6931472, %v1046_v22 }
 0x21f   :  { %v1048_v30 = vpop.eup %1047  ;;  %v783_v42 = vmul.f32 0.4342945, %v753_v31  ;;  %v802_v43 = vsub.f32 %v782_v37, %v792_v33 }
 0x220   :  { %v800_v34 = vsub.f32 %v780_v23, %v790_v28  ;;  %v769_v35 = vmul.f32 0.6931472, %v1048_v30  ;;  %v793_v40 = vmul.f32 0.4342945, %v773_v29 }
 0x221   :  { %v812_v49 = vand.u32 2147483647, %v802_v43 }
 0x222   :  { %v810_v38 = vand.u32 2147483647, %v800_v34  ;;  %v791_v41 = vmul.f32 0.4342945, %v769_v35  ;;  %v803_v47 = vsub.f32 %v783_v42, %v793_v40 }
 0x224   :  { %v801_v45 = vsub.f32 %v781_v36, %v791_v41  ;;  %v819_v46 = vadd.f32 %v818_v44, %v810_v38  ;;  %v813_v51 = vand.u32 2147483647, %v803_v47 }
 0x226   :  { %v811_v48 = vand.u32 2147483647, %v801_v45 }
 0x228   :  { %v820_v50 = vadd.f32 %v819_v46, %v811_v48 }
 0x22a   :  { %v821_v52 = vadd.f32 %v820_v50, %v812_v49 }
 0x22c   :  { %v822_v53 = vadd.f32 %v821_v52, %v813_v51 }
 0x22e   :  { %v823_v54 = vrot.slane %v822_v53, 4 }
 0x230   :  { %v824_v56 = vadd.f32 %v823_v54, %v822_v53 }
 0x232   :  { %v825_v57 = vrot.slane %v824_v56, 2 }
 0x234   :  { %v826_v60 = vadd.f32 %v825_v57, %v824_v56 }
 0x236   :  { %v827_v59 = vrot.slane %v826_v60, 1 }
 0x238   :  { %v828_v61 = vadd.f32 %v827_v59, %v826_v60 }
 0x23a   :  { %v832_v62 = vsel %vm831_vm8, %v828_v61, 0.0 }
 0x23b   :  { %833 = vst [vmem:[%s1296_s4] sm:$0xff] %v832_v62 }

// kernel: _forward.7
= control target key start
LH: loop header
LB: loop body
LE: loop exit
PB: predicated region body
PF: predicated region fallthrough
CT: control target
= control target key end

     0   :  { %s2115_s2 = inlined_call_operand.vmem [shape: bf16[256,512], index: 2, kind: input, shape index: {}]   ;;  %s2116_s0 = inlined_call_operand.vmem [shape: bf16[48,256], index: 0, kind: input, shape index: {}]   ;;  %s2117_s1 = inlined_call_operand.vmem [shape: bf16[48,256], index: 1, kind: input, shape index: {}]   ;;  %s2118_s3 = inlined_call_operand.vmem [shape: bf16[256,128], index: 3, kind: input, shape index: {}]   ;;  %s2119_s4 = inlined_call_operand.vmem [shape: f32[8,128], index: 4, kind: output, shape index: {}]  }
   0x1   :  { %v1361_v0 = vld [vmem:[%s2115_s2 + $0xe4] ss:$16 sps:$4 sm:$0xff]   ;;  %v1363_v1 = vld [vmem:[%s2115_s2 + $0xec] ss:$16 sps:$4 sm:$0xff]   ;;  %v1365_v2 = vld [vmem:[%s2115_s2 + $0xe0] ss:$16 sps:$4 sm:$0xff]  }
   0x2   :  { %474 = vmatprep.subr.bf16.mxu0 %v1361_v0  ;;  %v1366_v3 = vld [vmem:[%s2115_s2 + $0xe8] ss:$16 sps:$4 sm:$0xff]   ;;  %567 = vmatprep.subr.bf16.mxu1 %v1363_v1  ;;  %v1367_v4 = vld [vmem:[%s2115_s2 + $0xc4] ss:$16 sps:$4 sm:$0xff]   ;;  %v1369_v5 = vld [vmem:[%s2115_s2 + $0xcc] ss:$16 sps:$4 sm:$0xff]  }
   0x3   :  { %475 = vmatpush1.bf16.msra.mxu0 %v1365_v2  ;;  %568 = vmatpush1.bf16.msra.mxu1 %v1366_v3  ;;  %v1371_v6 = vld [vmem:[%s2115_s2 + $0xc0] ss:$16 sps:$4 sm:$0xff]   ;;  %v1372_v7 = vld [vmem:[%s2115_s2 + $0xc8] ss:$16 sps:$4 sm:$0xff]   ;;  %v1373_v8 = vld [vmem:[%s2115_s2 + $0xa4] ss:$16 sps:$4 sm:$0xff]  }
   0x4   :  { %476 = vmatprep.subr.bf16.mxu0 %v1367_v4  ;;  %569 = vmatprep.subr.bf16.mxu1 %v1369_v5  ;;  %v1375_v9 = vld [vmem:[%s2115_s2 + $0xac] ss:$16 sps:$4 sm:$0xff]   ;;  %v1377_v10 = vld [vmem:[%s2115_s2 + $0xa0] ss:$16 sps:$4 sm:$0xff]   ;;  %v1378_v11 = vld [vmem:[%s2115_s2 + $0xa8] ss:$16 sps:$4 sm:$0xff]  }
   0x5   :  { %v1379_v12 = vld [vmem:[%s2115_s2 + $0x84] ss:$16 sps:$4 sm:$0xff]   ;;  %v1381_v13 = vld [vmem:[%s2115_s2 + $0x8c] ss:$16 sps:$4 sm:$0xff]   ;;  %v1383_v14 = vld [vmem:[%s2115_s2 + $0x80] ss:$16 sps:$4 sm:$0xff]  }
   0x6   :  { %v1384_v15 = vld [vmem:[%s2115_s2 + $0x88] ss:$16 sps:$4 sm:$0xff]   ;;  %v1385_v16 = vld [vmem:[%s2115_s2 + $0x64] ss:$16 sps:$4 sm:$0xff]   ;;  %v1387_v17 = vld [vmem:[%s2115_s2 + $0x6c] ss:$16 sps:$4 sm:$0xff]  }
   0x7   :  { %477 = vmatpush1.bf16.msra.mxu0 %v1371_v6  ;;  %570 = vmatpush1.bf16.msra.mxu1 %v1372_v7  ;;  %v1389_v18 = vld [vmem:[%s2115_s2 + $0x60] ss:$16 sps:$4 sm:$0xff]   ;;  %v1390_v19 = vld [vmem:[%s2115_s2 + $0x68] ss:$16 sps:$4 sm:$0xff]   ;;  %v1391_v20 = vld [vmem:[%s2115_s2 + $0x44] ss:$16 sps:$4 sm:$0xff]  }
   0x8   :  { %478 = vmatprep.subr.bf16.mxu0 %v1373_v8  ;;  %571 = vmatprep.subr.bf16.mxu1 %v1375_v9  ;;  %v1393_v21 = vld [vmem:[%s2115_s2 + $0x4c] ss:$16 sps:$4 sm:$0xff]   ;;  %v1395_v22 = vld [vmem:[%s2115_s2 + $0x40] ss:$16 sps:$4 sm:$0xff]   ;;  %v1396_v23 = vld [vmem:[%s2115_s2 + $0x48] ss:$16 sps:$4 sm:$0xff]  }
   0x9   :  { %v1397_v24 = vld [vmem:[%s2115_s2 + $0x24] ss:$16 sps:$4 sm:$0xff]   ;;  %v1399_v25 = vld [vmem:[%s2115_s2 + $0x2c] ss:$16 sps:$4 sm:$0xff]   ;;  %v1401_v26 = vld [vmem:[%s2115_s2 + $0x20] ss:$16 sps:$4 sm:$0xff]  }
   0xa   :  { %v1402_v27 = vld [vmem:[%s2115_s2 + $0x28] ss:$16 sps:$4 sm:$0xff]   ;;  %v1403_v28 = vld [vmem:[%s2115_s2 + $0x4] ss:$16 sps:$4 sm:$0xff]   ;;  %v1405_v29 = vld [vmem:[%s2115_s2 + $0xc] ss:$16 sps:$4 sm:$0xff]  }
   0xb   :  { %479 = vmatpush1.bf16.msra.mxu0 %v1377_v10  ;;  %572 = vmatpush1.bf16.msra.mxu1 %v1378_v11  ;;  %v1407_v30 = vld [vmem:[%s2115_s2] ss:$16 sps:$4 sm:$0xff]   ;;  %v1408_v31 = vld [vmem:[%s2115_s2 + $0x8] ss:$16 sps:$4 sm:$0xff]   ;;  %v1409_v32 = vld [vmem:[%s2115_s2 + $0x1e4] ss:$16 sps:$4 sm:$0xff]  }
   0xc   :  { %480 = vmatprep.subr.bf16.mxu0 %v1379_v12  ;;  %573 = vmatprep.subr.bf16.mxu1 %v1381_v13  ;;  %v1411_v33 = vld [vmem:[%s2115_s2 + $0x1ec] ss:$16 sps:$4 sm:$0xff]   ;;  %v1413_v34 = vld [vmem:[%s2115_s2 + $0x1e0] ss:$16 sps:$4 sm:$0xff]   ;;  %v1414_v35 = vld [vmem:[%s2115_s2 + $0x1e8] ss:$16 sps:$4 sm:$0xff]  }
   0xd   :  { %v1415_v36 = vld [vmem:[%s2115_s2 + $0x1c4] ss:$16 sps:$4 sm:$0xff]   ;;  %v1417_v37 = vld [vmem:[%s2115_s2 + $0x1cc] ss:$16 sps:$4 sm:$0xff]   ;;  %v1419_v38 = vld [vmem:[%s2115_s2 + $0x1c0] ss:$16 sps:$4 sm:$0xff]  }
   0xe   :  { %v1420_v39 = vld [vmem:[%s2115_s2 + $0x1c8] ss:$16 sps:$4 sm:$0xff]   ;;  %v1421_v40 = vld [vmem:[%s2115_s2 + $0x1a4] ss:$16 sps:$4 sm:$0xff]   ;;  %v1423_v41 = vld [vmem:[%s2115_s2 + $0x1ac] ss:$16 sps:$4 sm:$0xff]  }
   0xf   :  { %481 = vmatpush1.bf16.msra.mxu0 %v1383_v14  ;;  %574 = vmatpush1.bf16.msra.mxu1 %v1384_v15  ;;  %v1425_v42 = vld [vmem:[%s2115_s2 + $0x1a0] ss:$16 sps:$4 sm:$0xff]   ;;  %v1426_v43 = vld [vmem:[%s2115_s2 + $0x1a8] ss:$16 sps:$4 sm:$0xff]   ;;  %v1427_v44 = vld [vmem:[%s2115_s2 + $0x184] ss:$16 sps:$4 sm:$0xff]  }
  0x10   :  { %482 = vmatprep.subr.bf16.mxu0 %v1385_v16  ;;  %575 = vmatprep.subr.bf16.mxu1 %v1387_v17  ;;  %v1429_v45 = vld [vmem:[%s2115_s2 + $0x18c] ss:$16 sps:$4 sm:$0xff]   ;;  %v1431_v46 = vld [vmem:[%s2115_s2 + $0x180] ss:$16 sps:$4 sm:$0xff]   ;;  %v1432_v47 = vld [vmem:[%s2115_s2 + $0x188] ss:$16 sps:$4 sm:$0xff]  }
  0x11   :  { %v1459_v48 = vld [vmem:[%s2116_s0 + $0x4] ss:$8 sps:$4 sm:$0xff]   ;;  %v1437_v51 = vld [vmem:[%s2115_s2 + $0x160] ss:$16 sps:$4 sm:$0xff]   ;;  %v1438_v52 = vld [vmem:[%s2115_s2 + $0x168] ss:$16 sps:$4 sm:$0xff]  }
  0x12   :  { %v1433_v49 = vld [vmem:[%s2115_s2 + $0x164] ss:$16 sps:$4 sm:$0xff]   ;;  %v1435_v50 = vld [vmem:[%s2115_s2 + $0x16c] ss:$16 sps:$4 sm:$0xff]   ;;  %506 = vmatprep.mubr.bf16.mxu0 %v1459_v48  ;;  %599 = vmatprep.mubr.bf16.mxu1 %v1459_v48  ;;  %v1443_v55 = vld [vmem:[%s2115_s2 + $0x140] ss:$16 sps:$4 sm:$0xff]  }
  0x13   :  { %483 = vmatpush1.bf16.msra.mxu0 %v1389_v18  ;;  %576 = vmatpush1.bf16.msra.mxu1 %v1390_v19  ;;  %v1439_v53 = vld [vmem:[%s2115_s2 + $0x144] ss:$16 sps:$4 sm:$0xff]   ;;  %v1441_v54 = vld [vmem:[%s2115_s2 + $0x14c] ss:$16 sps:$4 sm:$0xff]   ;;  %v1444_v56 = vld [vmem:[%s2115_s2 + $0x148] ss:$16 sps:$4 sm:$0xff]  }
  0x14   :  { %484 = vmatprep.subr.bf16.mxu0 %v1391_v20  ;;  %577 = vmatprep.subr.bf16.mxu1 %v1393_v21  ;;  %v1445_v57 = vld [vmem:[%s2115_s2 + $0x124] ss:$16 sps:$4 sm:$0xff]   ;;  %v1447_v58 = vld [vmem:[%s2115_s2 + $0x12c] ss:$16 sps:$4 sm:$0xff]   ;;  %v1449_v59 = vld [vmem:[%s2115_s2 + $0x120] ss:$16 sps:$4 sm:$0xff]  }
  0x15   :  { %v1450_v60 = vld [vmem:[%s2115_s2 + $0x128] ss:$16 sps:$4 sm:$0xff]   ;;  %v1451_v61 = vld [vmem:[%s2115_s2 + $0x104] ss:$16 sps:$4 sm:$0xff]   ;;  %v1453_v62 = vld [vmem:[%s2115_s2 + $0x10c] ss:$16 sps:$4 sm:$0xff]  }
  0x16   :  { %v1455_v63 = vld [vmem:[%s2115_s2 + $0x100] ss:$16 sps:$4 sm:$0xff]   ;;  %v1456_v0 = vld [vmem:[%s2115_s2 + $0x108] ss:$16 sps:$4 sm:$0xff]   ;;  %v1460_v2 = vld [vmem:[%s2116_s0 + $0x14] ss:$8 sps:$4 sm:$0xff]  }
  0x17   :  { %485 = vmatpush1.bf16.msra.mxu0 %v1395_v22  ;;  %578 = vmatpush1.bf16.msra.mxu1 %v1396_v23  ;;  %v1457_v1 = vld [vmem:[%s2116_s0] ss:$8 sps:$4 sm:$0xff]   ;;  %v1462_v3 = vld [vmem:[%s2116_s0 + $0x10] ss:$8 sps:$4 sm:$0xff]   ;;  %v1463_v4 = vld [vmem:[%s2116_s0 + $0x24] ss:$8 sps:$4 sm:$0xff]  }
  0x18   :  { %486 = vmatprep.subr.bf16.mxu0 %v1397_v24  ;;  %579 = vmatprep.subr.bf16.mxu1 %v1399_v25  ;;  %v1465_v5 = vld [vmem:[%s2116_s0 + $0x20] ss:$8 sps:$4 sm:$0xff]   ;;  %v1466_v6 = vld [vmem:[%s2117_s1 + $0x4] ss:$8 sps:$4 sm:$0xff]   ;;  %v1469_v8 = vld [vmem:[%s2117_s1 + $0x14] ss:$8 sps:$4 sm:$0xff]  }
  0x19   :  { %v1468_v7 = vld [vmem:[%s2117_s1] ss:$8 sps:$4 sm:$0xff]   ;;  %v1471_v9 = vld [vmem:[%s2117_s1 + $0x10] ss:$8 sps:$4 sm:$0xff]   ;;  %v1472_v10 = vld [vmem:[%s2117_s1 + $0x24] ss:$8 sps:$4 sm:$0xff]  }
  0x1a   :  { %v1474_v11 = vld [vmem:[%s2117_s1 + $0x20] ss:$8 sps:$4 sm:$0xff]   ;;  %v1475_v12 = vld [vmem:[%s2118_s3 + $0x78] sm:$0xff]   ;;  %v1477_v14 = vld [vmem:[%s2118_s3 + $0x70] sm:$0xff]  }
  0x1b   :  { %487 = vmatpush1.bf16.msra.mxu0 %v1401_v26  ;;  %580 = vmatpush1.bf16.msra.mxu1 %v1402_v27  ;;  %v1476_v13 = vld [vmem:[%s2118_s3 + $0x38] sm:$0xff]   ;;  %v1478_v15 = vld [vmem:[%s2118_s3 + $0x30] sm:$0xff]   ;;  %v1479_v16 = vld [vmem:[%s2118_s3 + $0x68] sm:$0xff]  }
  0x1c   :  { %488 = vmatprep.subr.bf16.mxu0 %v1403_v28  ;;  %581 = vmatprep.subr.bf16.mxu1 %v1405_v29  ;;  %v1480_v17 = vld [vmem:[%s2118_s3 + $0x28] sm:$0xff]   ;;  %v1481_v18 = vld [vmem:[%s2118_s3 + $0x60] sm:$0xff]   ;;  %v1483_v20 = vld [vmem:[%s2118_s3 + $0x58] sm:$0xff]  }
  0x1d   :  { %v1482_v19 = vld [vmem:[%s2118_s3 + $0x20] sm:$0xff]   ;;  %v1484_v21 = vld [vmem:[%s2118_s3 + $0x18] sm:$0xff]   ;;  %v1485_v22 = vld [vmem:[%s2118_s3 + $0x50] sm:$0xff]  }
  0x1e   :  { %v1486_v23 = vld [vmem:[%s2118_s3 + $0x10] sm:$0xff]   ;;  %v1487_v24 = vld [vmem:[%s2118_s3 + $0x48] sm:$0xff]   ;;  %v1489_v26 = vld [vmem:[%s2118_s3 + $0x40] sm:$0xff]  }
  0x1f   :  { %489 = vmatpush1.bf16.msra.mxu0 %v1407_v30  ;;  %582 = vmatpush1.bf16.msra.mxu1 %v1408_v31  ;;  %v1488_v25 = vld [vmem:[%s2118_s3 + $0x8] sm:$0xff]   ;;  %v1490_v27 = vld [vmem:[%s2118_s3] sm:$0xff]  }
  0x20   :  { %490 = vmatprep.subr.bf16.mxu0 %v1409_v32  ;;  %583 = vmatprep.subr.bf16.mxu1 %v1411_v33 }
  0x23   :  { %491 = vmatpush2.bf16.msra.mxu0 %v1413_v34  ;;  %584 = vmatpush2.bf16.msra.mxu1 %v1414_v35 }
  0x24   :  { %492 = vmatprep.subr.bf16.mxu0 %v1415_v36  ;;  %585 = vmatprep.subr.bf16.mxu1 %v1417_v37 }
  0x27   :  { %493 = vmatpush2.bf16.msra.mxu0 %v1419_v38  ;;  %586 = vmatpush2.bf16.msra.mxu1 %v1420_v39 }
  0x28   :  { %494 = vmatprep.subr.bf16.mxu0 %v1421_v40  ;;  %587 = vmatprep.subr.bf16.mxu1 %v1423_v41 }
  0x2b   :  { %495 = vmatpush2.bf16.msra.mxu0 %v1425_v42  ;;  %588 = vmatpush2.bf16.msra.mxu1 %v1426_v43 }
  0x2c   :  { %496 = vmatprep.subr.bf16.mxu0 %v1427_v44  ;;  %589 = vmatprep.subr.bf16.mxu1 %v1429_v45 }
  0x2f   :  { %497 = vmatpush2.bf16.msra.mxu0 %v1431_v46  ;;  %590 = vmatpush2.bf16.msra.mxu1 %v1432_v47 }
  0x30   :  { %498 = vmatprep.subr.bf16.mxu0 %v1433_v49  ;;  %591 = vmatprep.subr.bf16.mxu1 %v1435_v50 }
  0x33   :  { %499 = vmatpush2.bf16.msra.mxu0 %v1437_v51  ;;  %592 = vmatpush2.bf16.msra.mxu1 %v1438_v52 }
  0x34   :  { %500 = vmatprep.subr.bf16.mxu0 %v1439_v53  ;;  %593 = vmatprep.subr.bf16.mxu1 %v1441_v54 }
  0x37   :  { %501 = vmatpush2.bf16.msra.mxu0 %v1443_v55  ;;  %594 = vmatpush2.bf16.msra.mxu1 %v1444_v56 }
  0x38   :  { %502 = vmatprep.subr.bf16.mxu0 %v1445_v57  ;;  %595 = vmatprep.subr.bf16.mxu1 %v1447_v58 }
  0x3b   :  { %503 = vmatpush2.bf16.msra.mxu0 %v1449_v59  ;;  %596 = vmatpush2.bf16.msra.mxu1 %v1450_v60 }
  0x3c   :  { %504 = vmatprep.subr.bf16.mxu0 %v1451_v61  ;;  %597 = vmatprep.subr.bf16.mxu1 %v1453_v62 }
  0x3f   :  { %505 = vmatpush2.bf16.msra.mxu0 %v1455_v63  ;;  %598 = vmatpush2.bf16.msra.mxu1 %v1456_v0 }
  0x40   :  { %1293 = vmatprep.subr.bf16.mxu0 %v1475_v12  ;;  %1345 = vmatprep.subr.bf16.mxu1 %v1475_v12 }
  0x42   :  { %507 = vmatmul.mubr.bf16.vlgmr.msra.gmra.mxu0 %v1457_v1  ;;  %600 = vmatmul.mubr.bf16.vlgmr.msra.gmra.mxu1 %v1457_v1 }
  0x43   :  { %516 = vmatprep.mubr.bf16.mxu0 %v1460_v2  ;;  %609 = vmatprep.mubr.bf16.mxu1 %v1460_v2 }
  0x44   :  { %1294 = vmatpush3.bf16.msra.mxu0 %v1476_v13  ;;  %1353 = vmatpush3.bf16.msra.mxu1 %v1476_v13 }
  0x45   :  { %1295 = vmatprep.subr.bf16.mxu0 %v1477_v14  ;;  %1346 = vmatprep.subr.bf16.mxu1 %v1477_v14 }
  0x48   :  { %1296 = vmatpush3.bf16.msra.mxu0 %v1478_v15  ;;  %1354 = vmatpush3.bf16.msra.mxu1 %v1478_v15 }
  0x49   :  { %1297 = vmatprep.subr.bf16.mxu0 %v1479_v16  ;;  %1347 = vmatprep.subr.bf16.mxu1 %v1479_v16 }
  0x4a   :  { %517 = vmatmul.mubr.bf16.gmra.mxu0 %v1462_v3  ;;  %610 = vmatmul.mubr.bf16.gmra.mxu1 %v1462_v3 }
  0x4b   :  { %526 = vmatprep.mubr.bf16.mxu0 %v1463_v4  ;;  %619 = vmatprep.mubr.bf16.mxu1 %v1463_v4 }
  0x4c   :  { %1298 = vmatpush3.bf16.msra.mxu0 %v1480_v17  ;;  %1355 = vmatpush3.bf16.msra.mxu1 %v1480_v17 }
  0x4d   :  { %1299 = vmatprep.subr.bf16.mxu0 %v1481_v18  ;;  %1348 = vmatprep.subr.bf16.mxu1 %v1481_v18 }
  0x50   :  { %1300 = vmatpush3.bf16.msra.mxu0 %v1482_v19  ;;  %1356 = vmatpush3.bf16.msra.mxu1 %v1482_v19 }
  0x51   :  { %1301 = vmatprep.subr.bf16.mxu0 %v1483_v20  ;;  %1349 = vmatprep.subr.bf16.mxu1 %v1483_v20 }
  0x52   :  { %527 = vmatmul.mubr.bf16.gmra.mxu0 %v1465_v5  ;;  %620 = vmatmul.mubr.bf16.gmra.mxu1 %v1465_v5 }
  0x53   :  { %536 = vmatprep.mubr.bf16.mxu0 %v1466_v6  ;;  %629 = vmatprep.mubr.bf16.mxu1 %v1466_v6 }
  0x54   :  { %1302 = vmatpush3.bf16.msra.mxu0 %v1484_v21  ;;  %1357 = vmatpush3.bf16.msra.mxu1 %v1484_v21 }
  0x55   :  { %1303 = vmatprep.subr.bf16.mxu0 %v1485_v22  ;;  %1350 = vmatprep.subr.bf16.mxu1 %v1485_v22 }
  0x58   :  { %1304 = vmatpush3.bf16.msra.mxu0 %v1486_v23  ;;  %1358 = vmatpush3.bf16.msra.mxu1 %v1486_v23 }
  0x59   :  { %1305 = vmatprep.subr.bf16.mxu0 %v1487_v24  ;;  %1351 = vmatprep.subr.bf16.mxu1 %v1487_v24 }
  0x5a   :  { %537 = vmatmul.mubr.bf16.gmra.mxu0 %v1468_v7  ;;  %630 = vmatmul.mubr.bf16.gmra.mxu1 %v1468_v7 }
  0x5b   :  { %546 = vmatprep.mubr.bf16.mxu0 %v1469_v8  ;;  %639 = vmatprep.mubr.bf16.mxu1 %v1469_v8 }
  0x5c   :  { %1306 = vmatpush3.bf16.msra.mxu0 %v1488_v25  ;;  %1359 = vmatpush3.bf16.msra.mxu1 %v1488_v25 }
  0x5d   :  { %1307 = vmatprep.subr.bf16.mxu0 %v1489_v26  ;;  %1352 = vmatprep.subr.bf16.mxu1 %v1489_v26 }
  0x60   :  { %1308 = vmatpush3.bf16.msra.mxu0 %v1490_v27  ;;  %1360 = vmatpush3.bf16.msra.mxu1 %v1490_v27 }
  0x62   :  { %547 = vmatmul.mubr.bf16.gmra.mxu0 %v1471_v9  ;;  %640 = vmatmul.mubr.bf16.gmra.mxu1 %v1471_v9 }
  0x63   :  { %556 = vmatprep.mubr.bf16.mxu0 %v1472_v10  ;;  %649 = vmatprep.mubr.bf16.mxu1 %v1472_v10 }
  0x6a   :  { %557 = vmatmul.mubr.bf16.gmra.mxu0 %v1474_v11  ;;  %650 = vmatmul.mubr.bf16.gmra.mxu1 %v1474_v11 }
 0x102   :  { %v508_v28 = vpop.f32.mrf.mxu0  ;;  %v601_v29 = vpop.f32.mrf.mxu1 }
 0x103   :  { %v660_v30 = vmul.f32 %v508_v28, %v508_v28  ;;  %v684_v31 = vmul.f32 %v601_v29, %v601_v29 }
 0x104   :  { %v510_v32 = vpop.f32.mrf.mxu0  ;;  %v603_v33 = vpop.f32.mrf.mxu1 }
 0x105   :  { %v1864_v34 = vadd.f32 %v684_v31, %v660_v30  ;;  %v661_v35 = vmul.f32 %v510_v32, %v510_v32  ;;  %v685_v36 = vmul.f32 %v603_v33, %v603_v33 }
 0x106   :  { %v512_v37 = vpop.f32.mrf.mxu0  ;;  %v605_v38 = vpop.f32.mrf.mxu1 }
 0x107   :  { %1491 = vrsqrt.f32 %v1864_v34  ;;  %v1867_v39 = vadd.f32 %v685_v36, %v661_v35  ;;  %v662_v40 = vmul.f32 %v512_v37, %v512_v37  ;;  %v686_v41 = vmul.f32 %v605_v38, %v605_v38 }
 0x108   :  { %v514_v42 = vpop.f32.mrf.mxu0  ;;  %v607_v43 = vpop.f32.mrf.mxu1  ;;  %vm734_vm0 = vcmp.eq.f32.partialorder %v1864_v34, inf  ;;  %vm736_vm2 = vcmp.eq.f32.partialorder %v1864_v34, 0.0  ;;  %v737_v12 = vand.u32 2147483648, %v1864_v34 }
 0x109   :  { %1493 = vrsqrt.f32 %v1867_v39  ;;  %v1870_v44 = vadd.f32 %v686_v41, %v662_v40  ;;  %v663_v45 = vmul.f32 %v514_v42, %v514_v42  ;;  %v687_v46 = vmul.f32 %v607_v43, %v607_v43 }
 0x10a   :  { %v518_v47 = vpop.f32.mrf.mxu0  ;;  %v611_v48 = vpop.f32.mrf.mxu1  ;;  %vm741_vm1 = vcmp.eq.f32.partialorder %v1867_v39, inf  ;;  %v744_v11 = vand.u32 2147483648, %v1867_v39  ;;  %vm743_vm4 = vcmp.eq.f32.partialorder %v1867_v39, 0.0 }
 0x10b   :  { %1495 = vrsqrt.f32 %v1870_v44  ;;  %v1873_v49 = vadd.f32 %v687_v46, %v663_v45  ;;  %v664_v50 = vmul.f32 %v518_v47, %v518_v47  ;;  %v688_v51 = vmul.f32 %v611_v48, %v611_v48 }
 0x10c   :  { %v520_v52 = vpop.f32.mrf.mxu0  ;;  %v613_v53 = vpop.f32.mrf.mxu1  ;;  %vm748_vm3 = vcmp.eq.f32.partialorder %v1870_v44, inf  ;;  %vm750_vm6 = vcmp.eq.f32.partialorder %v1870_v44, 0.0  ;;  %v751_v20 = vand.u32 2147483648, %v1870_v44 }
 0x10d   :  { %1497 = vrsqrt.f32 %v1873_v49  ;;  %v1876_v54 = vadd.f32 %v688_v51, %v664_v50  ;;  %v665_v55 = vmul.f32 %v520_v52, %v520_v52  ;;  %v689_v56 = vmul.f32 %v613_v53, %v613_v53 }
 0x10e   :  { %v522_v57 = vpop.f32.mrf.mxu0  ;;  %v615_v58 = vpop.f32.mrf.mxu1  ;;  %vm755_vm5 = vcmp.eq.f32.partialorder %v1873_v49, inf  ;;  %vm757_vm7 = vcmp.eq.f32.partialorder %v1873_v49, 0.0  ;;  %v758_v24 = vand.u32 2147483648, %v1873_v49 }
 0x10f   :  { %1499 = vrsqrt.f32 %v1876_v54  ;;  %v1879_v59 = vadd.f32 %v689_v56, %v665_v55  ;;  %v666_v60 = vmul.f32 %v522_v57, %v522_v57  ;;  %v690_v61 = vmul.f32 %v615_v58, %v615_v58 }
 0x110   :  { %v524_v62 = vpop.f32.mrf.mxu0  ;;  %v617_v63 = vpop.f32.mrf.mxu1  ;;  %vm762_vm8 = vcmp.eq.f32.partialorder %v1876_v54, inf  ;;  %v765_v29 = vand.u32 2147483648, %v1876_v54  ;;  %vm764_vm10 = vcmp.eq.f32.partialorder %v1876_v54, 0.0 }
 0x111   :  { %1501 = vrsqrt.f32 %v1879_v59  ;;  %v1882_v0 = vadd.f32 %v690_v61, %v666_v60  ;;  %v667_v1 = vmul.f32 %v524_v62, %v524_v62  ;;  %v691_v2 = vmul.f32 %v617_v63, %v617_v63 }
 0x112   :  { %v528_v3 = vpop.f32.mrf.mxu0  ;;  %v621_v4 = vpop.f32.mrf.mxu1  ;;  %vm769_vm9 = vcmp.eq.f32.partialorder %v1879_v59, inf  ;;  %v772_v40 = vand.u32 2147483648, %v1879_v59  ;;  %vm771_vm12 = vcmp.eq.f32.partialorder %v1879_v59, 0.0 }
 0x113   :  { %1503 = vrsqrt.f32 %v1882_v0  ;;  %v1886_v5 = vadd.f32 %v691_v2, %v667_v1  ;;  %v668_v6 = vmul.f32 %v528_v3, %v528_v3  ;;  %v692_v7 = vmul.f32 %v621_v4, %v621_v4 }
 0x114   :  { %v1492_v8 = vpop.eup %1491  ;;  %v530_v9 = vpop.f32.mrf.mxu0  ;;  %v779_v41 = vand.u32 2147483648, %v1882_v0  ;;  %vm776_vm11 = vcmp.eq.f32.partialorder %v1882_v0, inf  ;;  %vm778_vm14 = vcmp.eq.f32.partialorder %v1882_v0, 0.0 }
 0x115   :  { %v623_v10 = vpop.f32.mrf.mxu1  ;;  %1505 = vrsqrt.f32 %v1886_v5  ;;  %v1894_v13 = vadd.f32 %v692_v7, %v668_v6  ;;  %v669_v14 = vmul.f32 %v530_v9, %v530_v9  ;;  %v733_v19 = vmul.f32 %v1492_v8, %v1864_v34 }
 0x116   :  { %v693_v15 = vmul.f32 %v623_v10, %v623_v10  ;;  %v1494_v16 = vpop.eup %1493  ;;  %v532_v17 = vpop.f32.mrf.mxu0  ;;  %v786_v53 = vand.u32 2147483648, %v1886_v5  ;;  %vm783_vm13 = vcmp.eq.f32.partialorder %v1886_v5, inf  ;;  %vm785_vm15 = vcmp.eq.f32.partialorder %v1886_v5, 0.0 }
 0x117   :  { %v625_v18 = vpop.f32.mrf.mxu1  ;;  %v670_v22 = vmul.f32 %v532_v17, %v532_v17  ;;  %1507 = vrsqrt.f32 %v1894_v13  ;;  %v740_v28 = vmul.f32 %v1494_v16, %v1867_v39  ;;  %v735_v37 = vsel %vm734_vm0, %v1864_v34, %v733_v19 }
 0x118   :  { %v1901_v21 = vadd.f32 %v693_v15, %v669_v14  ;;  %v694_v23 = vmul.f32 %v625_v18, %v625_v18  ;;  %v1496_v25 = vpop.eup %1495  ;;  %v534_v26 = vpop.f32.mrf.mxu0  ;;  %v738_v57 = vsel %vm736_vm2, %v737_v12, %v735_v37 }
 0x119   :  { %v627_v27 = vpop.f32.mrf.mxu1  ;;  %v671_v31 = vmul.f32 %v534_v26, %v534_v26  ;;  %v747_v38 = vmul.f32 %v1496_v25, %v1870_v44  ;;  %v742_v46 = vsel %vm741_vm1, %v1867_v39, %v740_v28  ;;  %vm790_vm1 = vcmp.eq.f32.partialorder %v1894_v13, inf }
 0x11a   :  { %1509 = vrsqrt.f32 %v1901_v21  ;;  %v1910_v30 = vadd.f32 %v694_v23, %v670_v22  ;;  %v695_v32 = vmul.f32 %v627_v27, %v627_v27  ;;  %v1498_v33 = vpop.eup %1497  ;;  %v538_v35 = vpop.f32.mrf.mxu0  ;;  %v745_v63 = vsel %vm743_vm4, %v744_v11, %v742_v46 }
 0x11b   :  { %v631_v36 = vpop.f32.mrf.mxu1  ;;  %v672_v43 = vmul.f32 %v538_v35, %v538_v35  ;;  %v754_v51 = vmul.f32 %v1498_v33, %v1873_v49  ;;  %v749_v52 = vsel %vm748_vm3, %v1870_v44, %v747_v38  ;;  %v800_v12 = vand.u32 2147483648, %v1901_v21 }
 0x11c   :  { %v1919_v42 = vadd.f32 %v695_v32, %v671_v31  ;;  %v696_v45 = vmul.f32 %v631_v36, %v631_v36  ;;  %v1500_v47 = vpop.eup %1499  ;;  %1511 = vrsqrt.f32 %v1910_v30  ;;  %v540_v48 = vpop.f32.mrf.mxu0  ;;  %v752_v6 = vsel %vm750_vm6, %v751_v20, %v749_v52 }
 0x11d   :  { %v633_v50 = vpop.f32.mrf.mxu1  ;;  %v673_v55 = vmul.f32 %v540_v48, %v540_v48  ;;  %v756_v1 = vsel %vm755_vm5, %v1873_v49, %v754_v51  ;;  %v761_v34 = vmul.f32 %v1500_v47, %v1876_v54  ;;  %vm797_vm0 = vcmp.eq.f32.partialorder %v1901_v21, inf }
 0x11e   :  { %1513 = vrsqrt.f32 %v1919_v42  ;;  %v697_v56 = vmul.f32 %v633_v50, %v633_v50  ;;  %v1502_v58 = vpop.eup %1501  ;;  %v1938_v60 = vadd.f32 %v696_v45, %v672_v43  ;;  %v542_v61 = vpop.f32.mrf.mxu0  ;;  %v759_v39 = vsel %vm757_vm7, %v758_v24, %v756_v1 }
 0x11f   :  { %v635_v62 = vpop.f32.mrf.mxu1  ;;  %v674_v3 = vmul.f32 %v542_v61, %v542_v61  ;;  %v768_v10 = vmul.f32 %v1502_v58, %v1879_v59  ;;  %v763_v11 = vsel %vm762_vm8, %v1876_v54, %v761_v34  ;;  %v901_v49 = vpack.c.bf16 %v759_v39, %v745_v63 }
 0x120   :  { %v1948_v2 = vadd.f32 %v697_v56, %v673_v55  ;;  %v698_v4 = vmul.f32 %v635_v62, %v635_v62  ;;  %v1504_v7 = vpop.eup %1503  ;;  %v544_v8 = vpop.f32.mrf.mxu0  ;;  %v900_v25 = vpack.c.bf16 %v752_v6, %v738_v57  ;;  %v766_v31 = vsel %vm764_vm10, %v765_v29, %v763_v11 }
 0x121   :  { %v637_v9 = vpop.f32.mrf.mxu1  ;;  %v675_v14 = vmul.f32 %v544_v8, %v544_v8  ;;  %v770_v19 = vsel %vm769_vm9, %v1879_v59, %v768_v10  ;;  %v775_v20 = vmul.f32 %v1504_v7, %v1882_v0  ;;  %1072 = vmatprep.mubr.bf16.mxu0 %v901_v49  ;;  %vm799_vm2 = vcmp.eq.f32.partialorder %v1901_v21, 0.0 }
 0x122   :  { %1515 = vrsqrt.f32 %v1948_v2  ;;  %v1961_v44 = vadd.f32 %v698_v4, %v674_v3  ;;  %v699_v15 = vmul.f32 %v637_v9, %v637_v9  ;;  %v1506_v16 = vpop.eup %1505  ;;  %v548_v17 = vpop.f32.mrf.mxu0  ;;  %1073 = vmatmul.mubr.bf16.vlgmr.msra.gmra.mxu0 %v900_v25  ;;  %v773_v37 = vsel %vm771_vm12, %v772_v40, %v770_v19 }
 0x123   :  { %1517 = vrsqrt.f32 %v1938_v60  ;;  %v641_v18 = vpop.f32.mrf.mxu1  ;;  %v676_v23 = vmul.f32 %v548_v17, %v548_v17  ;;  %v782_v28 = vmul.f32 %v1506_v16, %v1886_v5  ;;  %v777_v32 = vsel %vm776_vm11, %v1882_v0, %v775_v20 }
 0x124   :  { %v1970_v22 = vadd.f32 %v699_v15, %v675_v14  ;;  %v700_v24 = vmul.f32 %v641_v18, %v641_v18  ;;  %1519 = vrsqrt.f32 %v1961_v44  ;;  %v550_v26 = vpop.f32.mrf.mxu0  ;;  %v1508_v33 = vpop.eup %1507  ;;  %vm792_vm3 = vcmp.eq.f32.partialorder %v1894_v13, 0.0 }
 0x125   :  { %v643_v27 = vpop.f32.mrf.mxu1  ;;  %v677_v35 = vmul.f32 %v550_v26, %v550_v26  ;;  %v784_v45 = vsel %vm783_vm13, %v1886_v5, %v782_v28  ;;  %v780_v46 = vsel %vm778_vm14, %v779_v41, %v777_v32  ;;  %vm811_vm4 = vcmp.eq.f32.partialorder %v1919_v42, inf }
 0x126   :  { %1521 = vrsqrt.f32 %v1970_v22  ;;  %v701_v36 = vmul.f32 %v643_v27, %v643_v27  ;;  %v1988_v29 = vadd.f32 %v700_v24, %v676_v23  ;;  %v552_v38 = vpop.f32.mrf.mxu0  ;;  %vm813_vm5 = vcmp.eq.f32.partialorder %v1919_v42, 0.0 }
 0x127   :  { %v1510_v54 = vpop.eup %1509  ;;  %v645_v43 = vpop.f32.mrf.mxu1  ;;  %v678_v40 = vmul.f32 %v552_v38, %v552_v38  ;;  %v787_v51 = vsel %vm785_vm15, %v786_v53, %v784_v45  ;;  %v814_v0 = vand.u32 2147483648, %v1919_v42  ;;  %v789_v41 = vmul.f32 %v1508_v33, %v1894_v13 }
 0x128   :  { %v1998_v59 = vadd.f32 %v701_v36, %v677_v35  ;;  %v702_v47 = vmul.f32 %v645_v43, %v645_v43  ;;  %v554_v48 = vpop.f32.mrf.mxu0  ;;  %v796_v52 = vmul.f32 %v1510_v54, %v1901_v21  ;;  %v903_v62 = vpack.c.bf16 %v787_v51, %v773_v37 }
 0x129   :  { %v647_v50 = vpop.f32.mrf.mxu1  ;;  %v1512_v55 = vpop.eup %1511  ;;  %v679_v57 = vmul.f32 %v554_v48, %v554_v48  ;;  %v902_v53 = vpack.c.bf16 %v780_v46, %v766_v31  ;;  %v791_v6 = vsel %vm790_vm1, %v1894_v13, %v789_v41  ;;  %v793_v39 = vand.u32 2147483648, %v1894_v13 }
 0x12a   :  { %1523 = vrsqrt.f32 %v1998_v59  ;;  %v2009_v56 = vadd.f32 %v702_v47, %v678_v40  ;;  %v703_v58 = vmul.f32 %v647_v50, %v647_v50  ;;  %v558_v63 = vpop.f32.mrf.mxu0  ;;  %v798_v1 = vsel %vm797_vm0, %v1901_v21, %v796_v52  ;;  %1080 = vmatprep.mubr.bf16.mxu0 %v903_v62 }
 0x12b   :  { %v1514_v61 = vpop.eup %1513  ;;  %1525 = vrsqrt.f32 %v1988_v29  ;;  %v651_v5 = vpop.f32.mrf.mxu1  ;;  %v680_v3 = vmul.f32 %v558_v63, %v558_v63  ;;  %v803_v10 = vmul.f32 %v1512_v55, %v1910_v30  ;;  %1081 = vmatmul.mubr.bf16.gmra.mxu0 %v902_v53  ;;  %v801_v15 = vsel %vm799_vm2, %v800_v12, %v798_v1 }
 0x12c   :  { %v2015_v34 = vadd.f32 %v703_v58, %v679_v57  ;;  %v704_v4 = vmul.f32 %v651_v5, %v651_v5  ;;  %1527 = vrsqrt.f32 %v2009_v56  ;;  %v560_v7 = vpop.f32.mrf.mxu0  ;;  %v810_v9 = vmul.f32 %v1514_v61, %v1919_v42 }
 0x12d   :  { %v653_v8 = vpop.f32.mrf.mxu1  ;;  %v681_v11 = vmul.f32 %v560_v7, %v560_v7  ;;  %v794_v20 = vsel %vm792_vm3, %v793_v39, %v791_v6  ;;  %vm804_vm6 = vcmp.eq.f32.partialorder %v1910_v30, inf  ;;  %vm806_vm7 = vcmp.eq.f32.partialorder %v1910_v30, 0.0 }
 0x12e   :  { %1529 = vrsqrt.f32 %v2015_v34  ;;  %v705_v14 = vmul.f32 %v653_v8, %v653_v8  ;;  %v2029_v49 = vadd.f32 %v704_v4, %v680_v3  ;;  %v562_v17 = vpop.f32.mrf.mxu0  ;;  %v812_v19 = vsel %vm811_vm4, %v1919_v42, %v810_v9 }
 0x12f   :  { %v1516_v16 = vpop.eup %1515  ;;  %v655_v18 = vpop.f32.mrf.mxu1  ;;  %v682_v25 = vmul.f32 %v562_v17, %v562_v17  ;;  %v815_v27 = vsel %vm813_vm5, %v814_v0, %v812_v19  ;;  %v805_v28 = vsel %vm804_vm6, %v1910_v30, %v803_v10  ;;  %v807_v31 = vand.u32 2147483648, %v1910_v30 }
 0x130   :  { %v1518_v23 = vpop.eup %1517  ;;  %v2037_v24 = vadd.f32 %v705_v14, %v681_v11  ;;  %v706_v21 = vmul.f32 %v655_v18, %v655_v18  ;;  %v564_v12 = vpop.f32.mrf.mxu0  ;;  %v824_v13 = vmul.f32 %v1516_v16, %v1948_v2  ;;  %v905_v54 = vpack.c.bf16 %v815_v27, %v801_v15 }
 0x131   :  { %v657_v26 = vpop.f32.mrf.mxu1  ;;  %v1520_v32 = vpop.eup %1519  ;;  %v683_v35 = vmul.f32 %v564_v12, %v564_v12  ;;  %v808_v38 = vsel %vm806_vm7, %v807_v31, %v805_v28  ;;  %vm825_vm8 = vcmp.eq.f32.partialorder %v1948_v2, inf  ;;  %vm827_vm9 = vcmp.eq.f32.partialorder %v1948_v2, 0.0 }
 0x132   :  { %1531 = vrsqrt.f32 %v2037_v24  ;;  %v2046_v33 = vadd.f32 %v706_v21, %v682_v25  ;;  %v707_v36 = vmul.f32 %v657_v26, %v657_v26  ;;  %v904_v30 = vpack.c.bf16 %v808_v38, %v794_v20  ;;  %1088 = vmatprep.mubr.bf16.mxu0 %v905_v54 }
 0x133   :  { %v1522_v37 = vpop.eup %1521  ;;  %1533 = vrsqrt.f32 %v2029_v49  ;;  %v826_v43 = vsel %vm825_vm8, %v1948_v2, %v824_v13  ;;  %v828_v45 = vand.u32 2147483648, %v1948_v2  ;;  %vm839_vm10 = vcmp.eq.f32.partialorder %v1970_v22, inf }
 0x134   :  { %1535 = vrsqrt.f32 %v2046_v33  ;;  %v2051_v42 = vadd.f32 %v707_v36, %v683_v35  ;;  %v838_v46 = vmul.f32 %v1522_v37, %v1970_v22  ;;  %1089 = vmatmul.mubr.bf16.gmra.mxu0 %v904_v30  ;;  %vm841_vm11 = vcmp.eq.f32.partialorder %v1970_v22, 0.0 }
 0x135   :  { %v842_v40 = vand.u32 2147483648, %v1970_v22  ;;  %v817_v47 = vmul.f32 %v1518_v23, %v1938_v60  ;;  %v829_v50 = vsel %vm827_vm9, %v828_v45, %v826_v43  ;;  %vm818_vm12 = vcmp.eq.f32.partialorder %v1938_v60, inf }
 0x136   :  { %1537 = vrsqrt.f32 %v2051_v42  ;;  %v840_v51 = vsel %vm839_vm10, %v1970_v22, %v838_v46  ;;  %v831_v2 = vmul.f32 %v1520_v32, %v1961_v44  ;;  %v821_v55 = vand.u32 2147483648, %v1938_v60 }
 0x137   :  { %v1524_v48 = vpop.eup %1523  ;;  %v843_v0 = vsel %vm841_vm11, %v842_v40, %v840_v51  ;;  %v819_v41 = vsel %vm818_vm12, %v1938_v60, %v817_v47  ;;  %vm832_vm13 = vcmp.eq.f32.partialorder %v1961_v44, inf  ;;  %vm820_vm14 = vcmp.eq.f32.partialorder %v1938_v60, 0.0 }
 0x138   :  { %v1526_v52 = vpop.eup %1525  ;;  %v907_v57 = vpack.c.bf16 %v843_v0, %v829_v50  ;;  %v833_v58 = vsel %vm832_vm13, %v1961_v44, %v831_v2  ;;  %v835_v61 = vand.u32 2147483648, %v1961_v44  ;;  %v822_v62 = vsel %vm820_vm14, %v821_v55, %v819_v41 }
 0x139   :  { %v1528_v22 = vpop.eup %1527  ;;  %vm834_vm15 = vcmp.eq.f32.partialorder %v1961_v44, 0.0  ;;  %v852_v63 = vmul.f32 %v1524_v48, %v1998_v59  ;;  %vm853_vm0 = vcmp.eq.f32.partialorder %v1998_v59, inf  ;;  %vm855_vm1 = vcmp.eq.f32.partialorder %v1998_v59, 0.0 }
 0x13a   :  { %1096 = vmatprep.mubr.bf16.mxu1 %v907_v57  ;;  %v836_v53 = vsel %vm834_vm15, %v835_v61, %v833_v58  ;;  %v856_v1 = vand.u32 2147483648, %v1998_v59  ;;  %v845_v6 = vmul.f32 %v1526_v52, %v1988_v29  ;;  %vm867_vm2 = vcmp.eq.f32.partialorder %v2015_v34, inf }
 0x13b   :  { %v1530_v5 = vpop.eup %1529  ;;  %v906_v60 = vpack.c.bf16 %v836_v53, %v822_v62  ;;  %v854_v3 = vsel %vm853_vm0, %v1998_v59, %v852_v63  ;;  %vm869_vm3 = vcmp.eq.f32.partialorder %v2015_v34, 0.0  ;;  %v870_v44 = vand.u32 2147483648, %v2015_v34 }
 0x13c   :  { %v866_v4 = vmul.f32 %v1530_v5, %v2015_v34  ;;  %v857_v7 = vsel %vm855_vm1, %v856_v1, %v854_v3  ;;  %vm846_vm4 = vcmp.eq.f32.partialorder %v1988_v29, inf  ;;  %v849_v9 = vand.u32 2147483648, %v1988_v29 }
 0x13d   :  { %1097 = vmatmul.mubr.bf16.vlgmr.msra.gmra.mxu1 %v906_v60  ;;  %v859_v59 = vmul.f32 %v1528_v22, %v2009_v56  ;;  %v847_v11 = vsel %vm846_vm4, %v1988_v29, %v845_v6  ;;  %vm860_vm5 = vcmp.eq.f32.partialorder %v2009_v56, inf  ;;  %v863_v14 = vand.u32 2147483648, %v2009_v56 }
 0x13e   :  { %v868_v8 = vsel %vm867_vm2, %v2015_v34, %v866_v4  ;;  %vm862_vm6 = vcmp.eq.f32.partialorder %v2009_v56, 0.0  ;;  %vm848_vm7 = vcmp.eq.f32.partialorder %v1988_v29, 0.0  ;;  %vm881_vm8 = vcmp.eq.f32.partialorder %v2037_v24, inf }
 0x13f   :  { %v1532_v39 = vpop.eup %1531  ;;  %v871_v10 = vsel %vm869_vm3, %v870_v44, %v868_v8  ;;  %v861_v17 = vsel %vm860_vm5, %v2009_v56, %v859_v59  ;;  %v850_v20 = vsel %vm848_vm7, %v849_v9, %v847_v11  ;;  %v884_v27 = vand.u32 2147483648, %v2037_v24 }
 0x140   :  { %v1534_v15 = vpop.eup %1533  ;;  %v909_v16 = vpack.c.bf16 %v871_v10, %v857_v7  ;;  %v880_v34 = vmul.f32 %v1532_v39, %v2037_v24  ;;  %v864_v19 = vsel %vm862_vm6, %v863_v14, %v861_v17  ;;  %vm895_vm9 = vcmp.eq.f32.partialorder %v2051_v42, inf }
 0x141   :  { %v1536_v18 = vpop.eup %1535  ;;  %v908_v25 = vpack.c.bf16 %v864_v19, %v850_v20  ;;  %v873_v26 = vmul.f32 %v1534_v15, %v2029_v49  ;;  %v898_v29 = vand.u32 2147483648, %v2051_v42  ;;  %vm888_vm10 = vcmp.eq.f32.partialorder %v2046_v33, inf }
 0x142   :  { %1104 = vmatprep.mubr.bf16.mxu1 %v909_v16  ;;  %v882_v21 = vsel %vm881_vm8, %v2037_v24, %v880_v34  ;;  %v887_v56 = vmul.f32 %v1536_v18, %v2046_v33  ;;  %vm883_vm11 = vcmp.eq.f32.partialorder %v2037_v24, 0.0  ;;  %vm897_vm12 = vcmp.eq.f32.partialorder %v2051_v42, 0.0 }
 0x143   :  { %v1538_v23 = vpop.eup %1537  ;;  %v885_v13 = vsel %vm883_vm11, %v884_v27, %v882_v21  ;;  %vm874_vm13 = vcmp.eq.f32.partialorder %v2029_v49, inf  ;;  %v891_v35 = vand.u32 2147483648, %v2046_v33  ;;  %vm890_vm14 = vcmp.eq.f32.partialorder %v2046_v33, 0.0 }
 0x144   :  { %v894_v12 = vmul.f32 %v1538_v23, %v2051_v42  ;;  %v889_v31 = vsel %vm888_vm10, %v2046_v33, %v887_v56  ;;  %v875_v37 = vsel %vm874_vm13, %v2029_v49, %v873_v26  ;;  %v877_v54 = vand.u32 2147483648, %v2029_v49 }
 0x145   :  { %1105 = vmatmul.mubr.bf16.gmra.mxu1 %v908_v25  ;;  %v892_v24 = vsel %vm890_vm14, %v891_v35, %v889_v31  ;;  %vm876_vm15 = vcmp.eq.f32.partialorder %v2029_v49, 0.0 }
 0x146   :  { %v896_v28 = vsel %vm895_vm9, %v2051_v42, %v894_v12  ;;  %v878_v38 = vsel %vm876_vm15, %v877_v54, %v875_v37 }
 0x147   :  { %v899_v32 = vsel %vm897_vm12, %v898_v29, %v896_v28  ;;  %v910_v42 = vpack.c.bf16 %v892_v24, %v878_v38 }
 0x148   :  { %v911_v36 = vpack.c.bf16 %v899_v32, %v885_v13 }
 0x14a   :  { %1112 = vmatprep.mubr.bf16.mxu1 %v911_v36 }
 0x14d   :  { %1113 = vmatmul.mubr.bf16.gmra.mxu1 %v910_v42 }
 0x1e2   :  { %v1309_v30 = vpop.f32.mrf.mxu0 }
 0x1e4   :  { %v1310_v43 = vpop.f32.mrf.mxu0 }
 0x1e5   :  { %v1311_v55 = vadd.f32 %v1310_v43, %v1309_v30 }
 0x1e6   :  { %v1312_v45 = vpop.f32.mrf.mxu0 }
 0x1e7   :  { %v1121_v53 = vmax.f32 %v1311_v55, 1e-05 }
 0x1e8   :  { %v1313_v46 = vpop.f32.mrf.mxu0 }
 0x1e9   :  { %v1314_v33 = vadd.f32 %v1313_v46, %v1312_v45 }
 0x1eb   :  { %v1315_v40 = vpop.f32.mrf.mxu0  ;;  %v1122_v49 = vmax.f32 %v1314_v33, 1e-05 }
 0x1ed   :  { %v1316_v47 = vpop.f32.mrf.mxu0  ;;  %1539 = vlog2.f32 %v1122_v49 }
 0x1ee   :  { %v1317_v58 = vadd.f32 %v1316_v47, %v1315_v40 }
 0x1ef   :  { %v1318_v48 = vpop.f32.mrf.mxu0 }
 0x1f0   :  { %v1123_v60 = vmax.f32 %v1317_v58, 1e-05 }
 0x1f1   :  { %v1319_v50 = vpop.f32.mrf.mxu0 }
 0x1f2   :  { %v1320_v61 = vadd.f32 %v1319_v50, %v1318_v48 }
 0x1f4   :  { %v1321_v51 = vpop.f32.mrf.mxu0  ;;  %v1124_v4 = vmax.f32 %v1320_v61, 1e-05 }
 0x1f6   :  { %v1322_v0 = vpop.f32.mrf.mxu0 }
 0x1f7   :  { %v1323_v6 = vadd.f32 %v1322_v0, %v1321_v51 }
 0x1f8   :  { %v1324_v63 = vpop.f32.mrf.mxu0 }
 0x1f9   :  { %v1125_v39 = vmax.f32 %v1323_v6, 1e-05 }
 0x1fa   :  { %v1325_v44 = vpop.f32.mrf.mxu0  ;;  %v1540_v23 = vpop.eup %1539 }
 0x1fb   :  { %v1326_v10 = vadd.f32 %v1325_v44, %v1324_v63  ;;  %v1136_v31 = vmul.f32 0.6931472, %v1540_v23 }
 0x1fd   :  { %v1327_v2 = vpop.f32.mrf.mxu1  ;;  %v1126_v17 = vmax.f32 %v1326_v10, 1e-05  ;;  %v1158_v38 = vmul.f32 0.4342945, %v1136_v31 }
 0x1ff   :  { %v1328_v52 = vpop.f32.mrf.mxu1 }
 0x200   :  { %v1329_v41 = vadd.f32 %v1328_v52, %v1327_v2 }
 0x201   :  { %v1330_v57 = vpop.f32.mrf.mxu1 }
 0x202   :  { %v1127_v22 = vmax.f32 %v1329_v41, 1e-05 }
 0x203   :  { %v1331_v62 = vpop.f32.mrf.mxu1 }
 0x204   :  { %v1332_v5 = vadd.f32 %v1331_v62, %v1330_v57  ;;  %1541 = vlog2.f32 %v1127_v22 }
 0x205   :  { %v1333_v1 = vpop.f32.mrf.mxu1 }
 0x206   :  { %v1128_v3 = vmax.f32 %v1332_v5, 1e-05 }
 0x207   :  { %v1334_v7 = vpop.f32.mrf.mxu1 }
 0x208   :  { %1543 = vlog2.f32 %v1128_v3  ;;  %v1335_v8 = vadd.f32 %v1334_v7, %v1333_v1 }
 0x209   :  { %1545 = vlog2.f32 %v1121_v53  ;;  %v1336_v9 = vpop.f32.mrf.mxu1 }
 0x20a   :  { %1547 = vlog2.f32 %v1123_v60  ;;  %v1129_v59 = vmax.f32 %v1335_v8, 1e-05 }
 0x20b   :  { %1549 = vlog2.f32 %v1124_v4  ;;  %v1337_v11 = vpop.f32.mrf.mxu1 }
 0x20c   :  { %1551 = vlog2.f32 %v1129_v59  ;;  %v1338_v14 = vadd.f32 %v1337_v11, %v1336_v9 }
 0x20d   :  { %v1339_v15 = vpop.f32.mrf.mxu1  ;;  %1553 = vlog2.f32 %v1125_v39 }
 0x20e   :  { %v1130_v16 = vmax.f32 %v1338_v14, 1e-05 }
 0x20f   :  { %v1340_v34 = vpop.f32.mrf.mxu1 }
 0x210   :  { %1555 = vlog2.f32 %v1130_v16  ;;  %v1341_v18 = vadd.f32 %v1340_v34, %v1339_v15  ;;  %v1192_v15 = vlaneseq }
 0x211   :  { %v1342_v19 = vpop.f32.mrf.mxu1  ;;  %1557 = vlog2.f32 %v1126_v17  ;;  %v1542_v21 = vpop.eup %1541 }
 0x212   :  { %v1131_v20 = vmax.f32 %v1341_v18, 1e-05  ;;  %v1146_v32 = vmul.f32 0.6931472, %v1542_v21  ;;  %v1193_v34 = vshrl.u32 %v1192_v15, 7 }
 0x213   :  { %v1343_v25 = vpop.f32.mrf.mxu1 }
 0x214   :  { %1559 = vlog2.f32 %v1131_v20  ;;  %v1344_v12 = vadd.f32 %v1343_v25, %v1342_v19  ;;  %v1163_v43 = vmul.f32 0.4342945, %v1146_v32  ;;  %vm1194_vm0 = vcmp.eq.s32.totalorder %v1193_v34, 0 }
 0x215   :  { %v1544_v26 = vpop.eup %1543 }
 0x216   :  { %v1546_v56 = vpop.eup %1545  ;;  %v1148_v27 = vmul.f32 0.6931472, %v1544_v26  ;;  %v1132_v29 = vmax.f32 %v1344_v12, 1e-05 }
 0x217   :  { %v1548_v28 = vpop.eup %1547  ;;  %v1134_v36 = vmul.f32 0.6931472, %v1546_v56 }
 0x218   :  { %v1550_v13 = vpop.eup %1549  ;;  %1561 = vlog2.f32 %v1132_v29  ;;  %v1138_v37 = vmul.f32 0.6931472, %v1548_v28  ;;  %v1164_v54 = vmul.f32 0.4342945, %v1148_v27 }
 0x219   :  { %v1552_v35 = vpop.eup %1551  ;;  %v1140_v30 = vmul.f32 0.6931472, %v1550_v13  ;;  %v1157_v40 = vmul.f32 0.4342945, %v1134_v36 }
 0x21a   :  { %v1150_v24 = vmul.f32 0.6931472, %v1552_v35  ;;  %v1554_v42 = vpop.eup %1553  ;;  %v1159_v47 = vmul.f32 0.4342945, %v1138_v37  ;;  %v1170_v48 = vsub.f32 %v1158_v38, %v1164_v54 }
 0x21b   :  { %v1142_v51 = vmul.f32 0.6931472, %v1554_v42  ;;  %v1160_v33 = vmul.f32 0.4342945, %v1140_v30  ;;  %v1169_v52 = vsub.f32 %v1157_v40, %v1163_v43 }
 0x21c   :  { %v1165_v45 = vmul.f32 0.4342945, %v1150_v24  ;;  %v1176_v57 = vand.u32 2147483647, %v1170_v48 }
 0x21d   :  { %v1556_v46 = vpop.eup %1555  ;;  %v1161_v61 = vmul.f32 0.4342945, %v1142_v51  ;;  %v1175_v62 = vand.u32 2147483647, %v1169_v52 }
 0x21e   :  { %v1152_v50 = vmul.f32 0.6931472, %v1556_v46  ;;  %v1558_v2 = vpop.eup %1557  ;;  %v1171_v0 = vsub.f32 %v1159_v47, %v1165_v45 }
 0x21f   :  { %v1144_v22 = vmul.f32 0.6931472, %v1558_v2  ;;  %v1181_v1 = vadd.f32 %v1176_v57, %v1175_v62 }
 0x220   :  { %v1166_v41 = vmul.f32 0.4342945, %v1152_v50  ;;  %v1177_v63 = vand.u32 2147483647, %v1171_v0 }
 0x221   :  { %v1560_v55 = vpop.eup %1559  ;;  %v1162_v6 = vmul.f32 0.4342945, %v1144_v22 }
 0x222   :  { %v1172_v49 = vsub.f32 %v1160_v33, %v1166_v41  ;;  %v1154_v58 = vmul.f32 0.6931472, %v1560_v55  ;;  %v1182_v7 = vadd.f32 %v1181_v1, %v1177_v63 }
 0x224   :  { %v1167_v5 = vmul.f32 0.4342945, %v1154_v58  ;;  %v1178_v60 = vand.u32 2147483647, %v1172_v49 }
 0x225   :  { %v1562_v53 = vpop.eup %1561 }
 0x226   :  { %v1173_v3 = vsub.f32 %v1161_v61, %v1167_v5  ;;  %v1156_v4 = vmul.f32 0.6931472, %v1562_v53  ;;  %v1183_v9 = vadd.f32 %v1182_v7, %v1178_v60 }
 0x228   :  { %v1179_v44 = vand.u32 2147483647, %v1173_v3  ;;  %v1168_v8 = vmul.f32 0.4342945, %v1156_v4 }
 0x22a   :  { %v1174_v59 = vsub.f32 %v1162_v6, %v1168_v8  ;;  %v1184_v39 = vadd.f32 %v1183_v9, %v1179_v44 }
 0x22c   :  { %v1180_v10 = vand.u32 2147483647, %v1174_v59 }
 0x22e   :  { %v1185_v11 = vadd.f32 %v1184_v39, %v1180_v10 }
 0x230   :  { %v1186_v14 = vrot.slane %v1185_v11, 4 }
 0x232   :  { %v1187_v16 = vadd.f32 %v1186_v14, %v1185_v11 }
 0x234   :  { %v1188_v17 = vrot.slane %v1187_v16, 2 }
 0x236   :  { %v1189_v18 = vadd.f32 %v1188_v17, %v1187_v16 }
 0x238   :  { %v1190_v19 = vrot.slane %v1189_v18, 1 }
 0x23a   :  { %v1191_v20 = vadd.f32 %v1190_v19, %v1189_v18 }
 0x23c   :  { %v1195_v23 = vsel %vm1194_vm0, %v1191_v20, 0.0 }
 0x23d   :  { %1196 = vst [vmem:[%s2119_s4] sm:$0xff] %v1195_v23 }

</bundles_post_ra>
